<compile_context>
chip_gen: v6e
topology: v6e:2x2x1
jax: 0.10.0
libtpu: 0.0.40
codegen_flags: <defaults>
</compile_context>

<pallas_src>
import functools
import math

import jax
import jax.numpy as jnp
from jax import lax
from jax.experimental import pallas as pl
from jax.experimental.pallas import tpu as pltpu

EPS = 1e-6

# target tile sizes (clamped to full dims at small test shapes)
TM_TGT = 512      # matmul row (token) tile
TN_TGT = 512      # matmul output-feature tile
TK_TGT = 512      # matmul reduction tile (when no LN prologue)
TL_PREP_TGT = 128 # head-prep row tile (mem-bound pass, keep VMEM modest)
TQ_TGT = 512      # attention query tile
TKV_TGT = 512     # attention key/value tile

MM_VMEM_LIMIT = 48 * 1024 * 1024    # fits v7x's 64 MiB physical with headroom
PREP_VMEM_LIMIT = 48 * 1024 * 1024
ATTN_VMEM_LIMIT = 32 * 1024 * 1024


def _row_align(dtype):
    # sublane packing granularity: 8 rows per 32-bit sublane group
    return 8 * (4 // jnp.dtype(dtype).itemsize)


def _pick_tile(dim, target, align):
    """Largest tile <= target that divides dim and is a multiple of align,
    else the full dim (full-dim blocks always satisfy the (8,128) rule)."""
    if dim <= target:
        return dim
    t = (target // align) * align
    while t >= align:
        if dim % t == 0:
            return t
        t -= align
    # TODO(synk): pad/mask ragged dims instead of falling back to a full-dim
    # block (a full-L block would blow VMEM at real Wan token counts).
    return dim


# ---------------------------------------------------------------------------
# Fused tiled matmul:  out = epilogue( prologue(x) @ w + b )
#   prologue: LayerNorm(no affine)+modulation  OR  LayerNorm(affine)   (tk==K)
#   epilogue: tanh-GELU, residual (+gate) add
# ---------------------------------------------------------------------------

def _make_mm_kernel(has_ln_mod, has_ln_affine, gelu, has_res, has_gate):
    def kernel(*refs):
        it = iter(refs)
        x_ref = next(it)
        w_ref = next(it)
        b_ref = next(it)
        shift_ref = scale_ref = g_ref = beta_ref = None
        if has_ln_mod:
            shift_ref = next(it)
            scale_ref = next(it)
        if has_ln_affine:
            g_ref = next(it)
            beta_ref = next(it)
        res_ref = next(it) if has_res else None
        gate_ref = next(it) if has_gate else None
        o_ref = next(it)
        acc_ref = next(it)

        kk = pl.program_id(3)

        @pl.when(kk == 0)
        def _():
            acc_ref[...] = jnp.zeros_like(acc_ref)

        xv = x_ref[...]
        if has_ln_mod or has_ln_affine:
            # LayerNorm prologue over the full K (=C) row, in f32.
            xf = xv.astype(jnp.float32)
            mean = jnp.mean(xf, axis=-1, keepdims=True)
            cen = xf - mean
            var = jnp.mean(cen * cen, axis=-1, keepdims=True)
            y = cen * lax.rsqrt(var + EPS)
            if has_ln_mod:
                y = (y * (1.0 + scale_ref[...].astype(jnp.float32))
                     + shift_ref[...].astype(jnp.float32))
            else:
                y = (y * g_ref[...].astype(jnp.float32)
                     + beta_ref[...].astype(jnp.float32))
            xv = y.astype(w_ref.dtype)

        # native (bf16) MXU inputs, f32 accumulation
        acc_ref[...] += jnp.dot(xv, w_ref[...],
                                preferred_element_type=jnp.float32)

        @pl.when(kk == pl.num_programs(3) - 1)
        def _():
            out = acc_ref[...] + b_ref[...].astype(jnp.float32)
            if gelu:
                c = 0.7978845608028654  # sqrt(2/pi)
                out = 0.5 * out * (1.0 + jnp.tanh(c * (out + 0.044715 * out * out * out)))
            if has_res:
                r = res_ref[...].astype(jnp.float32)
                if has_gate:
                    out = r + out * gate_ref[...].astype(jnp.float32)
                else:
                    out = r + out
            o_ref[...] = out.astype(o_ref.dtype)

    return kernel


def fused_matmul(x, w, b, *, gelu=False, ln_mod=None, ln_affine=None,
                 residual=None, gate=None, alias_residual=False):
    """x: [B, L, K] @ w: [K, N] + b: [N].

    ln_mod=(shift, scale): LayerNorm(no affine) prologue, norm(x)*(1+scale)+shift
                           with shift/scale: [B, 1, K]    (forces tk == K)
    ln_affine=(gamma, beta): LayerNorm(affine) prologue, gamma/beta: [K]
    gelu: tanh-GELU epilogue.
    residual: [B, L, N] (+ optional gate: [B, 1, N]) fused residual add.
    alias_residual: reuse the residual HBM buffer for the output.
    """
    B, L, K = x.shape
    N = w.shape[1]
    has_ln_mod = ln_mod is not None
    has_ln_affine = ln_affine is not None
    assert not (has_ln_mod and has_ln_affine)
    has_prologue = has_ln_mod or has_ln_affine

    tm = _pick_tile(L, TM_TGT, _row_align(x.dtype))
    tn = _pick_tile(N, TN_TGT, 128)
    tk = K if has_prologue else _pick_tile(K, TK_TGT, 128)

    args = [x, w, b.reshape(1, N).astype(jnp.float32)]
    in_specs = [
        pl.BlockSpec((None, tm, tk), lambda bb, i, j, k: (bb, i, k)),
        pl.BlockSpec((tk, tn), lambda bb, i, j, k: (k, j)),
        pl.BlockSpec((1, tn), lambda bb, i, j, k: (0, j)),
    ]
    if has_ln_mod:
        shift, scale = ln_mod
        args += [shift, scale]
        in_specs += [pl.BlockSpec((None, 1, tk), lambda bb, i, j, k: (bb, 0, 0)),
                     pl.BlockSpec((None, 1, tk), lambda bb, i, j, k: (bb, 0, 0))]
    if has_ln_affine:
        gamma, beta = ln_affine
        args += [gamma.reshape(1, K), beta.reshape(1, K)]
        in_specs += [pl.BlockSpec((1, tk), lambda bb, i, j, k: (0, 0)),
                     pl.BlockSpec((1, tk), lambda bb, i, j, k: (0, 0))]
    res_index = None
    if residual is not None:
        res_index = len(args)
        args.append(residual)
        in_specs.append(pl.BlockSpec((None, tm, tn), lambda bb, i, j, k: (bb, i, j)))
    if gate is not None:
        args.append(gate)
        in_specs.append(pl.BlockSpec((None, 1, tn), lambda bb, i, j, k: (bb, 0, j)))

    io_alias = {}
    if residual is not None and alias_residual and residual.dtype == x.dtype:
        io_alias = {res_index: 0}

    kernel = _make_mm_kernel(has_ln_mod, has_ln_affine, gelu,
                             residual is not None, gate is not None)

    return pl.pallas_call(
        kernel,
        grid=(B, L // tm, N // tn, K // tk),
        out_shape=jax.ShapeDtypeStruct((B, L, N), x.dtype),
        in_specs=in_specs,
        out_specs=pl.BlockSpec((None, tm, tn), lambda bb, i, j, k: (bb, i, j)),
        scratch_shapes=[pltpu.VMEM((tm, tn), jnp.float32)],
        input_output_aliases=io_alias,
        compiler_params=pltpu.CompilerParams(
            dimension_semantics=("parallel", "parallel", "parallel", "arbitrary"),
            vmem_limit_bytes=MM_VMEM_LIMIT),
    )(*args)


# ---------------------------------------------------------------------------
# Head prep: RMSNorm (over full C) + rotate-half RoPE + 1/sqrt(D) scale,
# emitting q/k/v directly in [B, H, L, D] layout (no XLA transposes).
# q/k projection weight columns are de-interleaved OFFLINE (per head: evens
# then odds), so RoPE becomes x*cos + rot_half(x)*sin_signed.
# ---------------------------------------------------------------------------

def _make_prep_kernel(q_idx, k_idx, v_idx, rope, scale, H, D):
    def kernel(*refs):
        it = iter(refs)
        x_ref = next(it)                                   # (tl, G, H, D)
        cos_ref = next(it) if rope else None               # (tl, D)
        sin_ref = next(it) if rope else None               # (tl, D)  (signed)
        wq_ref = next(it) if q_idx is not None else None   # (H, D)
        wk_ref = next(it) if k_idx is not None else None   # (H, D)
        q_out = next(it) if q_idx is not None else None    # (H, tl, D)
        k_out = next(it) if k_idx is not None else None
        v_out = next(it) if v_idx is not None else None

        if rope:
            cos = cos_ref[...].astype(jnp.float32)[:, None, :]   # (tl, 1, D)
            sin = sin_ref[...].astype(jnp.float32)[:, None, :]

        def rms(t, w_ref):                                  # t: (tl, H, D) f32
            # RMS over the full model dim C = H*D (matches RMSNorm(dim))
            ms = jnp.mean(jnp.mean(t * t, axis=-1, keepdims=True),
                          axis=-2, keepdims=True)
            return t * lax.rsqrt(ms + EPS) * w_ref[...].astype(jnp.float32)[None]

        def rot(t):                                         # rotate-half RoPE
            if D % 128 == 0:
                r = pltpu.roll(t, shift=D // 2, axis=-1)    # XLU lane rotate
            else:
                # tiny-D fallback (test shapes): slice + concat
                r = jnp.concatenate([t[..., D // 2:], t[..., :D // 2]], axis=-1)
            return t * cos + r * sin

        def write(out_ref, t):                              # (tl,H,D) -> (H,tl,D)
            for h in range(H):
                out_ref[h] = t[:, h]

        if q_idx is not None:
            q = x_ref[:, q_idx].astype(jnp.float32)
            q = rms(q, wq_ref)
            if rope:
                q = rot(q)
            write(q_out, (q * scale).astype(q_out.dtype))   # scale folded in f32
        if k_idx is not None:
            k = x_ref[:, k_idx].astype(jnp.float32)
            k = rms(k, wk_ref)
            if rope:
                k = rot(k)
            write(k_out, k.astype(k_out.dtype))
        if v_idx is not None:
            write(v_out, x_ref[:, v_idx])

    return kernel


def head_prep(x_grp, *, q_idx=None, k_idx=None, v_idx=None,
              rms_q=None, rms_k=None, cos=None, sin=None, scale=1.0):
    """x_grp: [B, L, G, H, D] -> tuple of present (q, k, v), each [B, H, L, D]."""
    B, L, G, H, D = x_grp.shape
    rope = cos is not None
    tl = _pick_tile(L, TL_PREP_TGT, _row_align(x_grp.dtype))

    args = [x_grp]
    in_specs = [pl.BlockSpec((None, tl, G, H, D), lambda b, i: (b, i, 0, 0, 0))]
    if rope:
        args += [cos, sin]
        in_specs += [pl.BlockSpec((tl, D), lambda b, i: (i, 0)),
                     pl.BlockSpec((tl, D), lambda b, i: (i, 0))]
    if q_idx is not None:
        args.append(rms_q.reshape(H, D))
        in_specs.append(pl.BlockSpec((H, D), lambda b, i: (0, 0)))
    if k_idx is not None:
        args.append(rms_k.reshape(H, D))
        in_specs.append(pl.BlockSpec((H, D), lambda b, i: (0, 0)))

    out_shapes, out_specs = [], []
    for idx in (q_idx, k_idx, v_idx):
        if idx is not None:
            out_shapes.append(jax.ShapeDtypeStruct((B, H, L, D), x_grp.dtype))
            out_specs.append(pl.BlockSpec((None, H, tl, D), lambda b, i: (b, 0, i, 0)))

    kernel = _make_prep_kernel(q_idx, k_idx, v_idx, rope, scale, H, D)
    return pl.pallas_call(
        kernel,
        grid=(B, L // tl),
        out_shape=tuple(out_shapes),
        in_specs=in_specs,
        out_specs=tuple(out_specs),
        compiler_params=pltpu.CompilerParams(
            dimension_semantics=("parallel", "parallel"),
            vmem_limit_bytes=PREP_VMEM_LIMIT),
    )(*args)


# ---------------------------------------------------------------------------
# Flash-style attention (online softmax), q/k/v in [B, H, L, D], q pre-scaled.
# ---------------------------------------------------------------------------

def _flash_attn_kernel(q_ref, k_ref, v_ref, o_ref, m_ref, l_ref, acc_ref):
    j = pl.program_id(3)

    @pl.when(j == 0)
    def _():
        m_ref[...] = jnp.full_like(m_ref, -jnp.inf)
        l_ref[...] = jnp.zeros_like(l_ref)
        acc_ref[...] = jnp.zeros_like(acc_ref)

    s = lax.dot_general(q_ref[...], k_ref[...], (((1,), (1,)), ((), ())),
                        preferred_element_type=jnp.float32)   # (tq, tkv) f32

    m_prev = m_ref[...]
    m_new = jnp.maximum(m_prev, jnp.max(s, axis=-1, keepdims=True))
    alpha = jnp.exp(m_prev - m_new)
    p = jnp.exp(s - m_new)
    l_ref[...] = alpha * l_ref[...] + jnp.sum(p, axis=-1, keepdims=True)
    acc_ref[...] = alpha * acc_ref[...] + jnp.dot(
        p.astype(v_ref.dtype), v_ref[...], preferred_element_type=jnp.float32)
    m_ref[...] = m_new

    @pl.when(j == pl.num_programs(3) - 1)
    def _():
        # exact division (review correctness concern about approx reciprocal)
        o_ref[...] = (acc_ref[...] / l_ref[...]).astype(o_ref.dtype)


def attention(q, k, v):
    """q: [B, H, Lq, D] (pre-scaled), k/v: [B, H, Lk, D] -> [B, Lq, H*D]."""
    B, H, Lq, D = q.shape
    Lk = k.shape[2]
    tq = _pick_tile(Lq, TQ_TGT, _row_align(q.dtype))
    tkv = _pick_tile(Lk, TKV_TGT, _row_align(k.dtype))

    direct = (D % 128 == 0)   # real Wan: D = 128 -> lane-dense direct output
    if direct:
        out_shape = jax.ShapeDtypeStruct((B, Lq, H * D), q.dtype)
        out_spec = pl.BlockSpec((None, tq, D), lambda b, h, i, j: (b, i, h))
    else:
        out_shape = jax.ShapeDtypeStruct((B, H, Lq, D), q.dtype)
        out_spec = pl.BlockSpec((None, None, tq, D), lambda b, h, i, j: (b, h, i, 0))

    out = pl.pallas_call(
        _flash_attn_kernel,
        grid=(B, H, Lq // tq, Lk // tkv),
        out_shape=out_shape,
        in_specs=[pl.BlockSpec((None, None, tq, D), lambda b, h, i, j: (b, h, i, 0)),
                  pl.BlockSpec((None, None, tkv, D), lambda b, h, i, j: (b, h, j, 0)),
                  pl.BlockSpec((None, None, tkv, D), lambda b, h, i, j: (b, h, j, 0))],
        out_specs=out_spec,
        scratch_shapes=[pltpu.VMEM((tq, 1), jnp.float32),
                        pltpu.VMEM((tq, 1), jnp.float32),
                        pltpu.VMEM((tq, D), jnp.float32)],
        compiler_params=pltpu.CompilerParams(
            dimension_semantics=("parallel", "parallel", "parallel", "arbitrary"),
            vmem_limit_bytes=ATTN_VMEM_LIMIT),
    )(q, k, v)

    if direct:
        return out
    # TODO(synk): only the tiny-D test path takes this XLA transpose; real Wan
    # (D=128) writes the [B, L, H*D] output directly above.
    return out.transpose(0, 2, 1, 3).reshape(B, Lq, H * D)


# ---------------------------------------------------------------------------
# Parameter init (deterministic, synthetic).  Weights bf16 (MXU operands);
# biases / norm weights / modulation f32.  Self-attn q/k columns are
# de-interleaved offline for the rotate-half RoPE.
# ---------------------------------------------------------------------------

def _lin_init(key, din, dout, scale=0.02):
    kw, kb = jax.random.split(key)
    w = jax.random.normal(kw, (din, dout), jnp.float32) * scale
    b = jax.random.normal(kb, (dout,), jnp.float32) * scale
    return w, b


def _deinterleave_perm(dim, num_heads):
    d = dim // num_heads
    idx = []
    for h in range(num_heads):
        idx.extend(range(h * d, (h + 1) * d, 2))      # even (real) parts
        idx.extend(range(h * d + 1, (h + 1) * d, 2))  # odd (imag) parts
    return jnp.asarray(idx, jnp.int32)


def init_self_attn_params(key, dim, num_heads):
    ks = jax.random.split(key, 4)
    q_w, q_b = _lin_init(ks[0], dim, dim)
    k_w, k_b = _lin_init(ks[1], dim, dim)
    v_w, v_b = _lin_init(ks[2], dim, dim)
    o_w, o_b = _lin_init(ks[3], dim, dim)
    norm_q = jnp.ones((dim,), jnp.float32)
    norm_k = jnp.ones((dim,), jnp.float32)
    perm = _deinterleave_perm(dim, num_heads)
    q_w, q_b, norm_q = q_w[:, perm], q_b[perm], norm_q[perm]
    k_w, k_b, norm_k = k_w[:, perm], k_b[perm], norm_k[perm]
    return {
        'qkv_w': jnp.concatenate([q_w, k_w, v_w], axis=1).astype(jnp.bfloat16),
        'qkv_b': jnp.concatenate([q_b, k_b, v_b]),
        'norm_q_w': norm_q, 'norm_k_w': norm_k,
        'o_w': o_w.astype(jnp.bfloat16), 'o_b': o_b,
    }


def init_cross_attn_params(key, dim):
    ks = jax.random.split(key, 4)
    q_w, q_b = _lin_init(ks[0], dim, dim)
    k_w, k_b = _lin_init(ks[1], dim, dim)
    v_w, v_b = _lin_init(ks[2], dim, dim)
    o_w, o_b = _lin_init(ks[3], dim, dim)
    return {
        'q_w': q_w.astype(jnp.bfloat16), 'q_b': q_b,
        'kv_w': jnp.concatenate([k_w, v_w], axis=1).astype(jnp.bfloat16),
        'kv_b': jnp.concatenate([k_b, v_b]),
        'norm_q_w': jnp.ones((dim,), jnp.float32),
        'norm_k_w': jnp.ones((dim,), jnp.float32),
        'o_w': o_w.astype(jnp.bfloat16), 'o_b': o_b,
    }


def init_block_params(key, dim, ffn_dim, num_heads):
    ks = jax.random.split(key, 5)
    w1, b1 = _lin_init(ks[3], dim, ffn_dim)
    w2, b2 = _lin_init(ks[4], ffn_dim, dim)
    return {
        'modulation': jax.random.normal(ks[0], (1, 6, dim), jnp.float32) * 0.02,
        'self_attn': init_self_attn_params(ks[1], dim, num_heads),
        'cross_attn': init_cross_attn_params(ks[2], dim),
        'norm3_g': jnp.ones((dim,), jnp.float32),
        'norm3_b': jnp.zeros((dim,), jnp.float32),
        'ffn_w1': w1.astype(jnp.bfloat16), 'ffn_b1': b1,
        'ffn_w2': w2.astype(jnp.bfloat16), 'ffn_b2': b2,
    }


# ---------------------------------------------------------------------------
# WanAttentionBlock forward (t2v cross-attention, cross_attn_norm=True)
# ---------------------------------------------------------------------------

def wan_attention_block(params, x, e, freqs_cos, freqs_sin, context, *, num_heads):
    B, L, C = x.shape
    H = num_heads
    D = C // H
    Lc = context.shape[1]
    inv_sqrt_d = 1.0 / math.sqrt(D)

    # e = (modulation + e).chunk(6, dim=1)  (kept f32; tiny)
    e_full = params['modulation'] + e.astype(jnp.float32)       # [B, 6, C]
    ech = [e_full[:, i:i + 1, :] for i in range(6)]              # each [B, 1, C]

    # RoPE tables in de-interleaved layout: cos_full=[cos,cos], sin=[-sin,sin]
    cos_h = freqs_cos[:L].astype(jnp.float32)                    # [L, D/2]
    sin_h = freqs_sin[:L].astype(jnp.float32)
    cos_f = jnp.concatenate([cos_h, cos_h], axis=-1)             # [L, D]
    sin_f = jnp.concatenate([-sin_h, sin_h], axis=-1)            # [L, D]

    # ------------------ self attention ------------------
    sa = params['self_attn']
    # fused QKV projection with LayerNorm+modulation prologue (norm1)
    qkv = fused_matmul(x, sa['qkv_w'], sa['qkv_b'], ln_mod=(ech[0], ech[1]))
    qkv5 = qkv.reshape(B, L, 3, H, D)                            # free reshape
    q, k, v = head_prep(qkv5, q_idx=0, k_idx=1, v_idx=2,
                        rms_q=sa['norm_q_w'], rms_k=sa['norm_k_w'],
                        cos=cos_f, sin=sin_f, scale=inv_sqrt_d)  # [B, H, L, D]
    y = attention(q, k, v)                                       # [B, L, C]
    # o-projection fused with gated residual: x + o(y) * e2
    x = fused_matmul(y, sa['o_w'], sa['o_b'], residual=x, gate=ech[2],
                     alias_residual=True)

    # ------------------ cross attention (t2v) ------------------
    ca = params['cross_attn']
    # q projection with affine-LayerNorm prologue (norm3)
    q_raw = fused_matmul(x, ca['q_w'], ca['q_b'],
                         ln_affine=(params['norm3_g'], params['norm3_b']))
    kv_raw = fused_matmul(context, ca['kv_w'], ca['kv_b'])       # [B, Lc, 2C]
    (q,) = head_prep(q_raw.reshape(B, L, 1, H, D), q_idx=0,
                     rms_q=ca['norm_q_w'], scale=inv_sqrt_d)
    k, v = head_prep(kv_raw.reshape(B, Lc, 2, H, D), k_idx=0, v_idx=1,
                     rms_k=ca['norm_k_w'])
    y = attention(q, k, v)                                       # [B, L, C]
    # o-projection fused with plain residual: x + o(y)
    x = fused_matmul(y, ca['o_w'], ca['o_b'], residual=x, alias_residual=True)

    # ------------------ FFN ------------------
    # up projection with LayerNorm+modulation prologue (norm2) + tanh-GELU
    g = fused_matmul(x, params['ffn_w1'], params['ffn_b1'],
                     ln_mod=(ech[3], ech[4]), gelu=True)
    # down projection fused with gated residual: x + ffn(h) * e5
    x = fused_matmul(g, params['ffn_w2'], params['ffn_b2'],
                     residual=x, gate=ech[5], alias_residual=True)
    return x


# ---------------------------------------------------------------------------
# main
# ---------------------------------------------------------------------------

if __name__ == "__main__":
    B, L, C = 2, 8, 32
    num_heads = 4
    head_dim = C // num_heads
    ffn_dim = 64
    Lc = 12  # context length (t2v)

    root = jax.random.PRNGKey(0)
    k_param, k_x, k_e, k_ctx = jax.random.split(root, 4)

    params = init_block_params(k_param, C, ffn_dim, num_heads)

    x = jax.random.normal(k_x, (B, L, C), jnp.float32).astype(jnp.bfloat16)
    e = jax.random.normal(k_e, (B, 6, C), jnp.float32) * 0.1
    context = (jax.random.normal(k_ctx, (B, Lc, C), jnp.float32)
               ).astype(jnp.bfloat16)

    # RoPE freqs table, shape [1024, head_dim//2] (cos/sin), as in the docstring.
    pos = jnp.arange(1024, dtype=jnp.float32)[:, None]
    inv_freq = 1.0 / (10000.0 ** (jnp.arange(0, head_dim, 2, dtype=jnp.float32)
                                  / head_dim))
    angles = pos * inv_freq[None, :]
    freqs_cos = jnp.cos(angles)
    freqs_sin = jnp.sin(angles)

    fwd = jax.jit(functools.partial(wan_attention_block, num_heads=num_heads))
    out = fwd(params, x, e, freqs_cos, freqs_sin, context)
    out = jax.block_until_ready(out)

    assert out.shape == (B, L, C)
    assert out.dtype == jnp.bfloat16
    assert bool(jnp.all(jnp.isfinite(out.astype(jnp.float32))))
    print("KERNEL_OK")
</pallas_src>

<mosaic_0001>
module attributes {stable_mosaic.version = 11 : i64} {
  func.func @kernel(%arg0: i32, %arg1: i32, %arg2: i32, %arg3: i32, %arg4: memref<1x8x32xbf16, #tpu.memory_space<vmem>>, %arg5: memref<32x96xbf16, #tpu.memory_space<vmem>>, %arg6: memref<1x96xf32, #tpu.memory_space<vmem>>, %arg7: memref<1x1x32xf32, #tpu.memory_space<vmem>>, %arg8: memref<1x1x32xf32, #tpu.memory_space<vmem>>, %arg9: memref<1x8x96xbf16, #tpu.memory_space<vmem>>, %arg10: memref<8x96xf32, #tpu.memory_space<vmem>>) attributes {dimension_semantics = [#tpu.dimension_semantics<parallel>, #tpu.dimension_semantics<parallel>, #tpu.dimension_semantics<parallel>, #tpu.dimension_semantics<arbitrary>], iteration_bounds = array<i64: 2, 1, 1, 1>, scalar_prefetch = 0 : i64, scratch_operands = 1 : i64, tpu.core_type = #tpu.core_type<tc>, window_params = [{transform_indices = @transform_0, window_bounds = array<i64: 1, 8, 32>}, {transform_indices = @transform_1, window_bounds = array<i64: 32, 96>}, {transform_indices = @transform_2, window_bounds = array<i64: 1, 96>}, {transform_indices = @transform_3, window_bounds = array<i64: 1, 1, 32>}, {transform_indices = @transform_4, window_bounds = array<i64: 1, 1, 32>}, {transform_indices = @transform_5, window_bounds = array<i64: 1, 8, 96>}]} {
    %c0_i32 = arith.constant 0 : i32
    %0 = arith.cmpi eq, %arg3, %c0_i32 : i32
    %1 = arith.extui %0 : i1 to i32
    %c0_i32_0 = arith.constant 0 : i32
    %2 = arith.cmpi ne, %1, %c0_i32_0 : i32
    scf.if %2 {
      %cst_23 = arith.constant 0.000000e+00 : f32
      %41 = vector.broadcast %cst_23 : f32 to vector<8x96xf32>
      %c0_24 = arith.constant 0 : index
      %c0_25 = arith.constant 0 : index
      %42 = vector.load %arg10[%c0_24, %c0_25] : memref<8x96xf32, #tpu.memory_space<vmem>>, vector<8x96xf32>
      tpu.vector_store %arg10[%c0_24, %c0_25], %41 {strides = array<i32>} : memref<8x96xf32, #tpu.memory_space<vmem>>, vector<8x96xf32>,
    } else {
    }
    %c0 = arith.constant 0 : index
    %c0_1 = arith.constant 0 : index
    %c0_2 = arith.constant 0 : index
    %3 = vector.load %arg4[%c0, %c0_1, %c0_2] : memref<1x8x32xbf16, #tpu.memory_space<vmem>>, vector<1x8x32xbf16>
    %4 = vector.shape_cast %3 : vector<1x8x32xbf16> to vector<8x32xbf16>
    %5 = arith.extf %4 : vector<8x32xbf16> to vector<8x32xf32>
    %cst = arith.constant dense<0.000000e+00> : vector<8xf32>
    %6 = vector.multi_reduction <add>, %5, %cst [1] : vector<8x32xf32> to vector<8xf32>
    %7 = vector.shape_cast %6 : vector<8xf32> to vector<8x1xf32>
    %cst_3 = arith.constant 3.200000e+01 : f32
    %8 = vector.broadcast %cst_3 : f32 to vector<8x1xf32>
    %9 = arith.divf %7, %8 : vector<8x1xf32>
    %10 = vector.broadcast %9 : vector<8x1xf32> to vector<8x32xf32>
    %11 = arith.subf %5, %10 : vector<8x32xf32>
    %12 = arith.mulf %11, %11 : vector<8x32xf32>
    %cst_4 = arith.constant dense<0.000000e+00> : vector<8xf32>
    %13 = vector.multi_reduction <add>, %12, %cst_4 [1] : vector<8x32xf32> to vector<8xf32>
    %14 = vector.shape_cast %13 : vector<8xf32> to vector<8x1xf32>
    %cst_5 = arith.constant 3.200000e+01 : f32
    %15 = vector.broadcast %cst_5 : f32 to vector<8x1xf32>
    %16 = arith.divf %14, %15 : vector<8x1xf32>
    %cst_6 = arith.constant 9.99999997E-7 : f32
    %17 = vector.broadcast %cst_6 : f32 to vector<8x1xf32>
    %18 = arith.addf %16, %17 : vector<8x1xf32>
    %19 = math.rsqrt %18 : vector<8x1xf32>
    %20 = vector.broadcast %19 : vector<8x1xf32> to vector<8x32xf32>
    %21 = arith.mulf %11, %20 : vector<8x32xf32>
    %c0_7 = arith.constant 0 : index
    %c0_8 = arith.constant 0 : index
    %c0_9 = arith.constant 0 : index
    %22 = vector.load %arg8[%c0_7, %c0_8, %c0_9] : memref<1x1x32xf32, #tpu.memory_space<vmem>>, vector<1x1x32xf32>
    %23 = vector.shape_cast %22 : vector<1x1x32xf32> to vector<1x32xf32>
    %cst_10 = arith.constant 1.000000e+00 : f32
    %24 = vector.broadcast %cst_10 : f32 to vector<1x32xf32>
    %25 = arith.addf %24, %23 : vector<1x32xf32>
    %26 = vector.broadcast %25 : vector<1x32xf32> to vector<8x32xf32>
    %27 = arith.mulf %21, %26 : vector<8x32xf32>
    %c0_11 = arith.constant 0 : index
    %c0_12 = arith.constant 0 : index
    %c0_13 = arith.constant 0 : index
    %28 = vector.load %arg7[%c0_11, %c0_12, %c0_13] : memref<1x1x32xf32, #tpu.memory_space<vmem>>, vector<1x1x32xf32>
    %29 = vector.shape_cast %28 : vector<1x1x32xf32> to vector<1x32xf32>
    %30 = vector.broadcast %29 : vector<1x32xf32> to vector<8x32xf32>
    %31 = arith.addf %27, %30 : vector<8x32xf32>
    %32 = arith.truncf %31 : vector<8x32xf32> to vector<8x32xbf16>
    %c0_14 = arith.constant 0 : index
    %c0_15 = arith.constant 0 : index
    %33 = vector.load %arg10[%c0_14, %c0_15] : memref<8x96xf32, #tpu.memory_space<vmem>>, vector<8x96xf32>
    %c0_16 = arith.constant 0 : index
    %c0_17 = arith.constant 0 : index
    %34 = vector.load %arg5[%c0_16, %c0_17] : memref<32x96xbf16, #tpu.memory_space<vmem>>, vector<32x96xbf16>
    %cst_18 = arith.constant dense<0.000000e+00> : vector<8x96xf32>
    %35 = tpu.matmul %32, %34, %cst_18 {dimension_numbers = #tpu.dot_dimension_numbers<[1], [0], [0], [1], [0, 0, 1, 1], [], []>} : vector<8x32xbf16>, vector<32x96xbf16>, vector<8x96xf32> -> vector<8x96xf32>
    %36 = arith.addf %33, %35 : vector<8x96xf32>
    %c0_19 = arith.constant 0 : index
    %c0_20 = arith.constant 0 : index
    %37 = vector.load %arg10[%c0_19, %c0_20] : memref<8x96xf32, #tpu.memory_space<vmem>>, vector<8x96xf32>
    tpu.vector_store %arg10[%c0_19, %c0_20], %36 {strides = array<i32>} : memref<8x96xf32, #tpu.memory_space<vmem>>, vector<8x96xf32>,
    %c0_i32_21 = arith.constant 0 : i32
    %38 = arith.cmpi eq, %arg3, %c0_i32_21 : i32
    %39 = arith.extui %38 : i1 to i32
    %c0_i32_22 = arith.constant 0 : i32
    %40 = arith.cmpi ne, %39, %c0_i32_22 : i32
    scf.if %40 {
      %c0_23 = arith.constant 0 : index
      %c0_24 = arith.constant 0 : index
      %41 = vector.load %arg10[%c0_23, %c0_24] : memref<8x96xf32, #tpu.memory_space<vmem>>, vector<8x96xf32>
      %c0_25 = arith.constant 0 : index
      %c0_26 = arith.constant 0 : index
      %42 = vector.load %arg6[%c0_25, %c0_26] : memref<1x96xf32, #tpu.memory_space<vmem>>, vector<1x96xf32>
      %43 = vector.broadcast %42 : vector<1x96xf32> to vector<8x96xf32>
      %44 = arith.addf %41, %43 : vector<8x96xf32>
      %45 = arith.truncf %44 : vector<8x96xf32> to vector<8x96xbf16>
      %c0_27 = arith.constant 0 : index
      %c0_28 = arith.constant 0 : index
      %c0_29 = arith.constant 0 : index
      %46 = vector.load %arg9[%c0_27, %c0_28, %c0_29] : memref<1x8x96xbf16, #tpu.memory_space<vmem>>, vector<1x8x96xbf16>
      %47 = vector.shape_cast %46 : vector<1x8x96xbf16> to vector<8x96xbf16>
      %48 = vector.shape_cast %45 : vector<8x96xbf16> to vector<1x8x96xbf16>
      tpu.vector_store %arg9[%c0_27, %c0_28, %c0_29], %48 {strides = array<i32>} : memref<1x8x96xbf16, #tpu.memory_space<vmem>>, vector<1x8x96xbf16>,
    } else {
    }
    return
  }
  func.func @transform_0(%arg0: i32, %arg1: i32, %arg2: i32, %arg3: i32) -> (i32, i32, i32) {
    %c0_i32 = arith.constant 0 : i32
    return %arg0, %arg1, %arg3 : i32, i32, i32
  }
  func.func @transform_1(%arg0: i32, %arg1: i32, %arg2: i32, %arg3: i32) -> (i32, i32) {
    %c0_i32 = arith.constant 0 : i32
    return %arg3, %arg2 : i32, i32
  }
  func.func @transform_2(%arg0: i32, %arg1: i32, %arg2: i32, %arg3: i32) -> (i32, i32) {
    %c0_i32 = arith.constant 0 : i32
    %c0_i32_0 = arith.constant 0 : i32
    return %c0_i32, %arg2 : i32, i32
  }
  func.func @transform_3(%arg0: i32, %arg1: i32, %arg2: i32, %arg3: i32) -> (i32, i32, i32) {
    %c0_i32 = arith.constant 0 : i32
    %c0_i32_0 = arith.constant 0 : i32
    %c0_i32_1 = arith.constant 0 : i32
    return %arg0, %c0_i32, %c0_i32_0 : i32, i32, i32
  }
  func.func @transform_4(%arg0: i32, %arg1: i32, %arg2: i32, %arg3: i32) -> (i32, i32, i32) {
    %c0_i32 = arith.constant 0 : i32
    %c0_i32_0 = arith.constant 0 : i32
    %c0_i32_1 = arith.constant 0 : i32
    return %arg0, %c0_i32, %c0_i32_0 : i32, i32, i32
  }
  func.func @transform_5(%arg0: i32, %arg1: i32, %arg2: i32, %arg3: i32) -> (i32, i32, i32) {
    %c0_i32 = arith.constant 0 : i32
    return %arg0, %arg1, %arg2 : i32, i32, i32
  }
}

module attributes {stable_mosaic.version = 11 : i64} {
  func.func @kernel(%arg0: i32, %arg1: i32, %arg2: memref<1x8x3x4x8xbf16, #tpu.memory_space<vmem>>, %arg3: memref<8x8xf32, #tpu.memory_space<vmem>>, %arg4: memref<8x8xf32, #tpu.memory_space<vmem>>, %arg5: memref<4x8xf32, #tpu.memory_space<vmem>>, %arg6: memref<4x8xf32, #tpu.memory_space<vmem>>, %arg7: memref<1x4x8x8xbf16, #tpu.memory_space<vmem>>, %arg8: memref<1x4x8x8xbf16, #tpu.memory_space<vmem>>, %arg9: memref<1x4x8x8xbf16, #tpu.memory_space<vmem>>) attributes {dimension_semantics = [#tpu.dimension_semantics<parallel>, #tpu.dimension_semantics<parallel>], iteration_bounds = array<i64: 2, 1>, scalar_prefetch = 0 : i64, scratch_operands = 0 : i64, tpu.core_type = #tpu.core_type<tc>, window_params = [{transform_indices = @transform_0, window_bounds = array<i64: 1, 8, 3, 4, 8>}, {transform_indices = @transform_1, window_bounds = array<i64: 8, 8>}, {transform_indices = @transform_2, window_bounds = array<i64: 8, 8>}, {pipeline_mode = #tpu.pipeline_mode<synchronous>, transform_indices = @transform_3, window_bounds = array<i64: 4, 8>}, {pipeline_mode = #tpu.pipeline_mode<synchronous>, transform_indices = @transform_4, window_bounds = array<i64: 4, 8>}, {transform_indices = @transform_5, window_bounds = array<i64: 1, 4, 8, 8>}, {transform_indices = @transform_6, window_bounds = array<i64: 1, 4, 8, 8>}, {transform_indices = @transform_7, window_bounds = array<i64: 1, 4, 8, 8>}]} {
    %c0 = arith.constant 0 : index
    %c0_0 = arith.constant 0 : index
    %0 = vector.load %arg3[%c0, %c0_0] : memref<8x8xf32, #tpu.memory_space<vmem>>, vector<8x8xf32>
    %1 = vector.shape_cast %0 : vector<8x8xf32> to vector<8x1x8xf32>
    %c0_1 = arith.constant 0 : index
    %c0_2 = arith.constant 0 : index
    %2 = vector.load %arg4[%c0_1, %c0_2] : memref<8x8xf32, #tpu.memory_space<vmem>>, vector<8x8xf32>
    %3 = vector.shape_cast %2 : vector<8x8xf32> to vector<8x1x8xf32>
    %c0_3 = arith.constant 0 : index
    %c0_4 = arith.constant 0 : index
    %c0_5 = arith.constant 0 : index
    %c0_6 = arith.constant 0 : index
    %c0_7 = arith.constant 0 : index
    %4 = vector.load %arg2[%c0_3, %c0_4, %c0_5, %c0_6, %c0_7] : memref<1x8x3x4x8xbf16, #tpu.memory_space<vmem>>, vector<1x8x1x4x8xbf16>
    %5 = vector.shape_cast %4 : vector<1x8x1x4x8xbf16> to vector<8x4x8xbf16>
    %6 = arith.extf %5 : vector<8x4x8xbf16> to vector<8x4x8xf32>
    %7 = arith.mulf %6, %6 : vector<8x4x8xf32>
    %cst = arith.constant dense<0.000000e+00> : vector<8x4xf32>
    %8 = vector.multi_reduction <add>, %7, %cst [2] : vector<8x4x8xf32> to vector<8x4xf32>
    %9 = vector.shape_cast %8 : vector<8x4xf32> to vector<8x4x1xf32>
    %cst_8 = arith.constant 8.000000e+00 : f32
    %10 = vector.broadcast %cst_8 : f32 to vector<8x4x1xf32>
    %11 = arith.divf %9, %10 : vector<8x4x1xf32>
    %cst_9 = arith.constant dense<0.000000e+00> : vector<8x1xf32>
    %12 = vector.multi_reduction <add>, %11, %cst_9 [1] : vector<8x4x1xf32> to vector<8x1xf32>
    %13 = vector.shape_cast %12 : vector<8x1xf32> to vector<8x1x1xf32>
    %cst_10 = arith.constant 4.000000e+00 : f32
    %14 = vector.broadcast %cst_10 : f32 to vector<8x1x1xf32>
    %15 = arith.divf %13, %14 : vector<8x1x1xf32>
    %cst_11 = arith.constant 9.99999997E-7 : f32
    %16 = vector.broadcast %cst_11 : f32 to vector<8x1x1xf32>
    %17 = arith.addf %15, %16 : vector<8x1x1xf32>
    %18 = math.rsqrt %17 : vector<8x1x1xf32>
    %19 = vector.broadcast %18 : vector<8x1x1xf32> to vector<8x4x8xf32>
    %20 = arith.mulf %6, %19 : vector<8x4x8xf32>
    %c0_12 = arith.constant 0 : index
    %c0_13 = arith.constant 0 : index
    %21 = vector.load %arg5[%c0_12, %c0_13] : memref<4x8xf32, #tpu.memory_space<vmem>>, vector<4x8xf32>
    %22 = vector.shape_cast %21 : vector<4x8xf32> to vector<1x4x8xf32>
    %23 = vector.broadcast %22 : vector<1x4x8xf32> to vector<8x4x8xf32>
    %24 = arith.mulf %20, %23 : vector<8x4x8xf32>
    %25 = vector.extract_strided_slice %24 {offsets = [0, 0, 4], sizes = [8, 4, 4], strides = [1, 1, 1]} : vector<8x4x8xf32> to vector<8x4x4xf32>
    %26 = vector.extract_strided_slice %24 {offsets = [0, 0, 0], sizes = [8, 4, 4], strides = [1, 1, 1]} : vector<8x4x8xf32> to vector<8x4x4xf32>
    %27 = tpu.concatenate %25, %26 in 2 : vector<8x4x4xf32>, vector<8x4x4xf32> -> vector<8x4x8xf32>
    %28 = vector.broadcast %1 : vector<8x1x8xf32> to vector<8x4x8xf32>
    %29 = arith.mulf %24, %28 : vector<8x4x8xf32>
    %30 = vector.broadcast %3 : vector<8x1x8xf32> to vector<8x4x8xf32>
    %31 = arith.mulf %27, %30 : vector<8x4x8xf32>
    %32 = arith.addf %29, %31 : vector<8x4x8xf32>
    %cst_14 = arith.constant 0.353553385 : f32
    %33 = vector.broadcast %cst_14 : f32 to vector<8x4x8xf32>
    %34 = arith.mulf %32, %33 : vector<8x4x8xf32>
    %35 = arith.truncf %34 : vector<8x4x8xf32> to vector<8x4x8xbf16>
    %36 = vector.extract_strided_slice %35 {offsets = [0, 0, 0], sizes = [8, 1, 8], strides = [1, 1, 1]} : vector<8x4x8xbf16> to vector<8x1x8xbf16>
    %37 = vector.shape_cast %36 : vector<8x1x8xbf16> to vector<8x8xbf16>
    %c0_15 = arith.constant 0 : index
    %c0_16 = arith.constant 0 : index
    %c0_17 = arith.constant 0 : index
    %c0_18 = arith.constant 0 : index
    %38 = vector.load %arg7[%c0_15, %c0_16, %c0_17, %c0_18] : memref<1x4x8x8xbf16, #tpu.memory_space<vmem>>, vector<1x1x8x8xbf16>
    %39 = vector.shape_cast %38 : vector<1x1x8x8xbf16> to vector<8x8xbf16>
    %40 = vector.shape_cast %37 : vector<8x8xbf16> to vector<1x1x8x8xbf16>
    tpu.vector_store %arg7[%c0_15, %c0_16, %c0_17, %c0_18], %40 {strides = array<i32>} : memref<1x4x8x8xbf16, #tpu.memory_space<vmem>>, vector<1x1x8x8xbf16>,
    %41 = vector.extract_strided_slice %35 {offsets = [0, 1, 0], sizes = [8, 1, 8], strides = [1, 1, 1]} : vector<8x4x8xbf16> to vector<8x1x8xbf16>
    %42 = vector.shape_cast %41 : vector<8x1x8xbf16> to vector<8x8xbf16>
    %c0_19 = arith.constant 0 : index
    %c1 = arith.constant 1 : index
    %c0_20 = arith.constant 0 : index
    %c0_21 = arith.constant 0 : index
    %43 = vector.load %arg7[%c0_19, %c1, %c0_20, %c0_21] : memref<1x4x8x8xbf16, #tpu.memory_space<vmem>>, vector<1x1x8x8xbf16>
    %44 = vector.shape_cast %43 : vector<1x1x8x8xbf16> to vector<8x8xbf16>
    %45 = vector.shape_cast %42 : vector<8x8xbf16> to vector<1x1x8x8xbf16>
    tpu.vector_store %arg7[%c0_19, %c1, %c0_20, %c0_21], %45 {strides = array<i32>} : memref<1x4x8x8xbf16, #tpu.memory_space<vmem>>, vector<1x1x8x8xbf16>,
    %46 = vector.extract_strided_slice %35 {offsets = [0, 2, 0], sizes = [8, 1, 8], strides = [1, 1, 1]} : vector<8x4x8xbf16> to vector<8x1x8xbf16>
    %47 = vector.shape_cast %46 : vector<8x1x8xbf16> to vector<8x8xbf16>
    %c0_22 = arith.constant 0 : index
    %c2 = arith.constant 2 : index
    %c0_23 = arith.constant 0 : index
    %c0_24 = arith.constant 0 : index
    %48 = vector.load %arg7[%c0_22, %c2, %c0_23, %c0_24] : memref<1x4x8x8xbf16, #tpu.memory_space<vmem>>, vector<1x1x8x8xbf16>
    %49 = vector.shape_cast %48 : vector<1x1x8x8xbf16> to vector<8x8xbf16>
    %50 = vector.shape_cast %47 : vector<8x8xbf16> to vector<1x1x8x8xbf16>
    tpu.vector_store %arg7[%c0_22, %c2, %c0_23, %c0_24], %50 {strides = array<i32>} : memref<1x4x8x8xbf16, #tpu.memory_space<vmem>>, vector<1x1x8x8xbf16>,
    %51 = vector.extract_strided_slice %35 {offsets = [0, 3, 0], sizes = [8, 1, 8], strides = [1, 1, 1]} : vector<8x4x8xbf16> to vector<8x1x8xbf16>
    %52 = vector.shape_cast %51 : vector<8x1x8xbf16> to vector<8x8xbf16>
    %c0_25 = arith.constant 0 : index
    %c3 = arith.constant 3 : index
    %c0_26 = arith.constant 0 : index
    %c0_27 = arith.constant 0 : index
    %53 = vector.load %arg7[%c0_25, %c3, %c0_26, %c0_27] : memref<1x4x8x8xbf16, #tpu.memory_space<vmem>>, vector<1x1x8x8xbf16>
    %54 = vector.shape_cast %53 : vector<1x1x8x8xbf16> to vector<8x8xbf16>
    %55 = vector.shape_cast %52 : vector<8x8xbf16> to vector<1x1x8x8xbf16>
    tpu.vector_store %arg7[%c0_25, %c3, %c0_26, %c0_27], %55 {strides = array<i32>} : memref<1x4x8x8xbf16, #tpu.memory_space<vmem>>, vector<1x1x8x8xbf16>,
    %c0_28 = arith.constant 0 : index
    %c0_29 = arith.constant 0 : index
    %c1_30 = arith.constant 1 : index
    %c0_31 = arith.constant 0 : index
    %c0_32 = arith.constant 0 : index
    %56 = vector.load %arg2[%c0_28, %c0_29, %c1_30, %c0_31, %c0_32] : memref<1x8x3x4x8xbf16, #tpu.memory_space<vmem>>, vector<1x8x1x4x8xbf16>
    %57 = vector.shape_cast %56 : vector<1x8x1x4x8xbf16> to vector<8x4x8xbf16>
    %58 = arith.extf %57 : vector<8x4x8xbf16> to vector<8x4x8xf32>
    %59 = arith.mulf %58, %58 : vector<8x4x8xf32>
    %cst_33 = arith.constant dense<0.000000e+00> : vector<8x4xf32>
    %60 = vector.multi_reduction <add>, %59, %cst_33 [2] : vector<8x4x8xf32> to vector<8x4xf32>
    %61 = vector.shape_cast %60 : vector<8x4xf32> to vector<8x4x1xf32>
    %cst_34 = arith.constant 8.000000e+00 : f32
    %62 = vector.broadcast %cst_34 : f32 to vector<8x4x1xf32>
    %63 = arith.divf %61, %62 : vector<8x4x1xf32>
    %cst_35 = arith.constant dense<0.000000e+00> : vector<8x1xf32>
    %64 = vector.multi_reduction <add>, %63, %cst_35 [1] : vector<8x4x1xf32> to vector<8x1xf32>
    %65 = vector.shape_cast %64 : vector<8x1xf32> to vector<8x1x1xf32>
    %cst_36 = arith.constant 4.000000e+00 : f32
    %66 = vector.broadcast %cst_36 : f32 to vector<8x1x1xf32>
    %67 = arith.divf %65, %66 : vector<8x1x1xf32>
    %cst_37 = arith.constant 9.99999997E-7 : f32
    %68 = vector.broadcast %cst_37 : f32 to vector<8x1x1xf32>
    %69 = arith.addf %67, %68 : vector<8x1x1xf32>
    %70 = math.rsqrt %69 : vector<8x1x1xf32>
    %71 = vector.broadcast %70 : vector<8x1x1xf32> to vector<8x4x8xf32>
    %72 = arith.mulf %58, %71 : vector<8x4x8xf32>
    %c0_38 = arith.constant 0 : index
    %c0_39 = arith.constant 0 : index
    %73 = vector.load %arg6[%c0_38, %c0_39] : memref<4x8xf32, #tpu.memory_space<vmem>>, vector<4x8xf32>
    %74 = vector.shape_cast %73 : vector<4x8xf32> to vector<1x4x8xf32>
    %75 = vector.broadcast %74 : vector<1x4x8xf32> to vector<8x4x8xf32>
    %76 = arith.mulf %72, %75 : vector<8x4x8xf32>
    %77 = vector.extract_strided_slice %76 {offsets = [0, 0, 4], sizes = [8, 4, 4], strides = [1, 1, 1]} : vector<8x4x8xf32> to vector<8x4x4xf32>
    %78 = vector.extract_strided_slice %76 {offsets = [0, 0, 0], sizes = [8, 4, 4], strides = [1, 1, 1]} : vector<8x4x8xf32> to vector<8x4x4xf32>
    %79 = tpu.concatenate %77, %78 in 2 : vector<8x4x4xf32>, vector<8x4x4xf32> -> vector<8x4x8xf32>
    %80 = vector.broadcast %1 : vector<8x1x8xf32> to vector<8x4x8xf32>
    %81 = arith.mulf %76, %80 : vector<8x4x8xf32>
    %82 = vector.broadcast %3 : vector<8x1x8xf32> to vector<8x4x8xf32>
    %83 = arith.mulf %79, %82 : vector<8x4x8xf32>
    %84 = arith.addf %81, %83 : vector<8x4x8xf32>
    %85 = arith.truncf %84 : vector<8x4x8xf32> to vector<8x4x8xbf16>
    %86 = vector.extract_strided_slice %85 {offsets = [0, 0, 0], sizes = [8, 1, 8], strides = [1, 1, 1]} : vector<8x4x8xbf16> to vector<8x1x8xbf16>
    %87 = vector.shape_cast %86 : vector<8x1x8xbf16> to vector<8x8xbf16>
    %c0_40 = arith.constant 0 : index
    %c0_41 = arith.constant 0 : index
    %c0_42 = arith.constant 0 : index
    %c0_43 = arith.constant 0 : index
    %88 = vector.load %arg8[%c0_40, %c0_41, %c0_42, %c0_43] : memref<1x4x8x8xbf16, #tpu.memory_space<vmem>>, vector<1x1x8x8xbf16>
    %89 = vector.shape_cast %88 : vector<1x1x8x8xbf16> to vector<8x8xbf16>
    %90 = vector.shape_cast %87 : vector<8x8xbf16> to vector<1x1x8x8xbf16>
    tpu.vector_store %arg8[%c0_40, %c0_41, %c0_42, %c0_43], %90 {strides = array<i32>} : memref<1x4x8x8xbf16, #tpu.memory_space<vmem>>, vector<1x1x8x8xbf16>,
    %91 = vector.extract_strided_slice %85 {offsets = [0, 1, 0], sizes = [8, 1, 8], strides = [1, 1, 1]} : vector<8x4x8xbf16> to vector<8x1x8xbf16>
    %92 = vector.shape_cast %91 : vector<8x1x8xbf16> to vector<8x8xbf16>
    %c0_44 = arith.constant 0 : index
    %c1_45 = arith.constant 1 : index
    %c0_46 = arith.constant 0 : index
    %c0_47 = arith.constant 0 : index
    %93 = vector.load %arg8[%c0_44, %c1_45, %c0_46, %c0_47] : memref<1x4x8x8xbf16, #tpu.memory_space<vmem>>, vector<1x1x8x8xbf16>
    %94 = vector.shape_cast %93 : vector<1x1x8x8xbf16> to vector<8x8xbf16>
    %95 = vector.shape_cast %92 : vector<8x8xbf16> to vector<1x1x8x8xbf16>
    tpu.vector_store %arg8[%c0_44, %c1_45, %c0_46, %c0_47], %95 {strides = array<i32>} : memref<1x4x8x8xbf16, #tpu.memory_space<vmem>>, vector<1x1x8x8xbf16>,
    %96 = vector.extract_strided_slice %85 {offsets = [0, 2, 0], sizes = [8, 1, 8], strides = [1, 1, 1]} : vector<8x4x8xbf16> to vector<8x1x8xbf16>
    %97 = vector.shape_cast %96 : vector<8x1x8xbf16> to vector<8x8xbf16>
    %c0_48 = arith.constant 0 : index
    %c2_49 = arith.constant 2 : index
    %c0_50 = arith.constant 0 : index
    %c0_51 = arith.constant 0 : index
    %98 = vector.load %arg8[%c0_48, %c2_49, %c0_50, %c0_51] : memref<1x4x8x8xbf16, #tpu.memory_space<vmem>>, vector<1x1x8x8xbf16>
    %99 = vector.shape_cast %98 : vector<1x1x8x8xbf16> to vector<8x8xbf16>
    %100 = vector.shape_cast %97 : vector<8x8xbf16> to vector<1x1x8x8xbf16>
    tpu.vector_store %arg8[%c0_48, %c2_49, %c0_50, %c0_51], %100 {strides = array<i32>} : memref<1x4x8x8xbf16, #tpu.memory_space<vmem>>, vector<1x1x8x8xbf16>,
    %101 = vector.extract_strided_slice %85 {offsets = [0, 3, 0], sizes = [8, 1, 8], strides = [1, 1, 1]} : vector<8x4x8xbf16> to vector<8x1x8xbf16>
    %102 = vector.shape_cast %101 : vector<8x1x8xbf16> to vector<8x8xbf16>
    %c0_52 = arith.constant 0 : index
    %c3_53 = arith.constant 3 : index
    %c0_54 = arith.constant 0 : index
    %c0_55 = arith.constant 0 : index
    %103 = vector.load %arg8[%c0_52, %c3_53, %c0_54, %c0_55] : memref<1x4x8x8xbf16, #tpu.memory_space<vmem>>, vector<1x1x8x8xbf16>
    %104 = vector.shape_cast %103 : vector<1x1x8x8xbf16> to vector<8x8xbf16>
    %105 = vector.shape_cast %102 : vector<8x8xbf16> to vector<1x1x8x8xbf16>
    tpu.vector_store %arg8[%c0_52, %c3_53, %c0_54, %c0_55], %105 {strides = array<i32>} : memref<1x4x8x8xbf16, #tpu.memory_space<vmem>>, vector<1x1x8x8xbf16>,
    %c0_56 = arith.constant 0 : index
    %c0_57 = arith.constant 0 : index
    %c2_58 = arith.constant 2 : index
    %c0_59 = arith.constant 0 : index
    %c0_60 = arith.constant 0 : index
    %106 = vector.load %arg2[%c0_56, %c0_57, %c2_58, %c0_59, %c0_60] : memref<1x8x3x4x8xbf16, #tpu.memory_space<vmem>>, vector<1x8x1x4x8xbf16>
    %107 = vector.shape_cast %106 : vector<1x8x1x4x8xbf16> to vector<8x4x8xbf16>
    %108 = vector.extract_strided_slice %107 {offsets = [0, 0, 0], sizes = [8, 1, 8], strides = [1, 1, 1]} : vector<8x4x8xbf16> to vector<8x1x8xbf16>
    %109 = vector.shape_cast %108 : vector<8x1x8xbf16> to vector<8x8xbf16>
    %c0_61 = arith.constant 0 : index
    %c0_62 = arith.constant 0 : index
    %c0_63 = arith.constant 0 : index
    %c0_64 = arith.constant 0 : index
    %110 = vector.load %arg9[%c0_61, %c0_62, %c0_63, %c0_64] : memref<1x4x8x8xbf16, #tpu.memory_space<vmem>>, vector<1x1x8x8xbf16>
    %111 = vector.shape_cast %110 : vector<1x1x8x8xbf16> to vector<8x8xbf16>
    %112 = vector.shape_cast %109 : vector<8x8xbf16> to vector<1x1x8x8xbf16>
    tpu.vector_store %arg9[%c0_61, %c0_62, %c0_63, %c0_64], %112 {strides = array<i32>} : memref<1x4x8x8xbf16, #tpu.memory_space<vmem>>, vector<1x1x8x8xbf16>,
    %113 = vector.extract_strided_slice %107 {offsets = [0, 1, 0], sizes = [8, 1, 8], strides = [1, 1, 1]} : vector<8x4x8xbf16> to vector<8x1x8xbf16>
    %114 = vector.shape_cast %113 : vector<8x1x8xbf16> to vector<8x8xbf16>
    %c0_65 = arith.constant 0 : index
    %c1_66 = arith.constant 1 : index
    %c0_67 = arith.constant 0 : index
    %c0_68 = arith.constant 0 : index
    %115 = vector.load %arg9[%c0_65, %c1_66, %c0_67, %c0_68] : memref<1x4x8x8xbf16, #tpu.memory_space<vmem>>, vector<1x1x8x8xbf16>
    %116 = vector.shape_cast %115 : vector<1x1x8x8xbf16> to vector<8x8xbf16>
    %117 = vector.shape_cast %114 : vector<8x8xbf16> to vector<1x1x8x8xbf16>
    tpu.vector_store %arg9[%c0_65, %c1_66, %c0_67, %c0_68], %117 {strides = array<i32>} : memref<1x4x8x8xbf16, #tpu.memory_space<vmem>>, vector<1x1x8x8xbf16>,
    %118 = vector.extract_strided_slice %107 {offsets = [0, 2, 0], sizes = [8, 1, 8], strides = [1, 1, 1]} : vector<8x4x8xbf16> to vector<8x1x8xbf16>
    %119 = vector.shape_cast %118 : vector<8x1x8xbf16> to vector<8x8xbf16>
    %c0_69 = arith.constant 0 : index
    %c2_70 = arith.constant 2 : index
    %c0_71 = arith.constant 0 : index
    %c0_72 = arith.constant 0 : index
    %120 = vector.load %arg9[%c0_69, %c2_70, %c0_71, %c0_72] : memref<1x4x8x8xbf16, #tpu.memory_space<vmem>>, vector<1x1x8x8xbf16>
    %121 = vector.shape_cast %120 : vector<1x1x8x8xbf16> to vector<8x8xbf16>
    %122 = vector.shape_cast %119 : vector<8x8xbf16> to vector<1x1x8x8xbf16>
    tpu.vector_store %arg9[%c0_69, %c2_70, %c0_71, %c0_72], %122 {strides = array<i32>} : memref<1x4x8x8xbf16, #tpu.memory_space<vmem>>, vector<1x1x8x8xbf16>,
    %123 = vector.extract_strided_slice %107 {offsets = [0, 3, 0], sizes = [8, 1, 8], strides = [1, 1, 1]} : vector<8x4x8xbf16> to vector<8x1x8xbf16>
    %124 = vector.shape_cast %123 : vector<8x1x8xbf16> to vector<8x8xbf16>
    %c0_73 = arith.constant 0 : index
    %c3_74 = arith.constant 3 : index
    %c0_75 = arith.constant 0 : index
    %c0_76 = arith.constant 0 : index
    %125 = vector.load %arg9[%c0_73, %c3_74, %c0_75, %c0_76] : memref<1x4x8x8xbf16, #tpu.memory_space<vmem>>, vector<1x1x8x8xbf16>
    %126 = vector.shape_cast %125 : vector<1x1x8x8xbf16> to vector<8x8xbf16>
    %127 = vector.shape_cast %124 : vector<8x8xbf16> to vector<1x1x8x8xbf16>
    tpu.vector_store %arg9[%c0_73, %c3_74, %c0_75, %c0_76], %127 {strides = array<i32>} : memref<1x4x8x8xbf16, #tpu.memory_space<vmem>>, vector<1x1x8x8xbf16>,
    return
  }
  func.func @transform_0(%arg0: i32, %arg1: i32) -> (i32, i32, i32, i32, i32) {
    %c0_i32 = arith.constant 0 : i32
    %c0_i32_0 = arith.constant 0 : i32
    %c0_i32_1 = arith.constant 0 : i32
    %c0_i32_2 = arith.constant 0 : i32
    return %arg0, %arg1, %c0_i32, %c0_i32_0, %c0_i32_1 : i32, i32, i32, i32, i32
  }
  func.func @transform_1(%arg0: i32, %arg1: i32) -> (i32, i32) {
    %c0_i32 = arith.constant 0 : i32
    %c0_i32_0 = arith.constant 0 : i32
    return %arg1, %c0_i32 : i32, i32
  }
  func.func @transform_2(%arg0: i32, %arg1: i32) -> (i32, i32) {
    %c0_i32 = arith.constant 0 : i32
    %c0_i32_0 = arith.constant 0 : i32
    return %arg1, %c0_i32 : i32, i32
  }
  func.func @transform_3(%arg0: i32, %arg1: i32) -> (i32, i32) {
    %c0_i32 = arith.constant 0 : i32
    %c0_i32_0 = arith.constant 0 : i32
    %c0_i32_1 = arith.constant 0 : i32
    return %c0_i32, %c0_i32_0 : i32, i32
  }
  func.func @transform_4(%arg0: i32, %arg1: i32) -> (i32, i32) {
    %c0_i32 = arith.constant 0 : i32
    %c0_i32_0 = arith.constant 0 : i32
    %c0_i32_1 = arith.constant 0 : i32
    return %c0_i32, %c0_i32_0 : i32, i32
  }
  func.func @transform_5(%arg0: i32, %arg1: i32) -> (i32, i32, i32, i32) {
    %c0_i32 = arith.constant 0 : i32
    %c0_i32_0 = arith.constant 0 : i32
    %c0_i32_1 = arith.constant 0 : i32
    return %arg0, %c0_i32, %arg1, %c0_i32_0 : i32, i32, i32, i32
  }
  func.func @transform_6(%arg0: i32, %arg1: i32) -> (i32, i32, i32, i32) {
    %c0_i32 = arith.constant 0 : i32
    %c0_i32_0 = arith.constant 0 : i32
    %c0_i32_1 = arith.constant 0 : i32
    return %arg0, %c0_i32, %arg1, %c0_i32_0 : i32, i32, i32, i32
  }
  func.func @transform_7(%arg0: i32, %arg1: i32) -> (i32, i32, i32, i32) {
    %c0_i32 = arith.constant 0 : i32
    %c0_i32_0 = arith.constant 0 : i32
    %c0_i32_1 = arith.constant 0 : i32
    return %arg0, %c0_i32, %arg1, %c0_i32_0 : i32, i32, i32, i32
  }
}

module attributes {stable_mosaic.version = 11 : i64} {
  func.func @_flash_attn_kernel(%arg0: i32, %arg1: i32, %arg2: i32, %arg3: i32, %arg4: memref<1x1x8x8xbf16, #tpu.memory_space<vmem>>, %arg5: memref<1x1x8x8xbf16, #tpu.memory_space<vmem>>, %arg6: memref<1x1x8x8xbf16, #tpu.memory_space<vmem>>, %arg7: memref<1x1x8x8xbf16, #tpu.memory_space<vmem>>, %arg8: memref<8x1xf32, #tpu.memory_space<vmem>>, %arg9: memref<8x1xf32, #tpu.memory_space<vmem>>, %arg10: memref<8x8xf32, #tpu.memory_space<vmem>>) attributes {dimension_semantics = [#tpu.dimension_semantics<parallel>, #tpu.dimension_semantics<parallel>, #tpu.dimension_semantics<parallel>, #tpu.dimension_semantics<arbitrary>], iteration_bounds = array<i64: 2, 4, 1, 1>, scalar_prefetch = 0 : i64, scratch_operands = 3 : i64, tpu.core_type = #tpu.core_type<tc>, window_params = [{transform_indices = @transform_0, window_bounds = array<i64: 1, 1, 8, 8>}, {transform_indices = @transform_1, window_bounds = array<i64: 1, 1, 8, 8>}, {transform_indices = @transform_2, window_bounds = array<i64: 1, 1, 8, 8>}, {transform_indices = @transform_3, window_bounds = array<i64: 1, 1, 8, 8>}]} {
    %c0_i32 = arith.constant 0 : i32
    %0 = arith.cmpi eq, %arg3, %c0_i32 : i32
    %1 = arith.extui %0 : i1 to i32
    %c0_i32_0 = arith.constant 0 : i32
    %2 = arith.cmpi ne, %1, %c0_i32_0 : i32
    scf.if %2 {
      %cst_29 = arith.constant 0xFF800000 : f32
      %36 = vector.broadcast %cst_29 : f32 to vector<8x1xf32>
      %c0_30 = arith.constant 0 : index
      %c0_31 = arith.constant 0 : index
      %37 = vector.load %arg8[%c0_30, %c0_31] : memref<8x1xf32, #tpu.memory_space<vmem>>, vector<8x1xf32>
      tpu.vector_store %arg8[%c0_30, %c0_31], %36 {strides = array<i32>} : memref<8x1xf32, #tpu.memory_space<vmem>>, vector<8x1xf32>,
      %cst_32 = arith.constant 0.000000e+00 : f32
      %38 = vector.broadcast %cst_32 : f32 to vector<8x1xf32>
      %c0_33 = arith.constant 0 : index
      %c0_34 = arith.constant 0 : index
      %39 = vector.load %arg9[%c0_33, %c0_34] : memref<8x1xf32, #tpu.memory_space<vmem>>, vector<8x1xf32>
      tpu.vector_store %arg9[%c0_33, %c0_34], %38 {strides = array<i32>} : memref<8x1xf32, #tpu.memory_space<vmem>>, vector<8x1xf32>,
      %cst_35 = arith.constant 0.000000e+00 : f32
      %40 = vector.broadcast %cst_35 : f32 to vector<8x8xf32>
      %c0_36 = arith.constant 0 : index
      %c0_37 = arith.constant 0 : index
      %41 = vector.load %arg10[%c0_36, %c0_37] : memref<8x8xf32, #tpu.memory_space<vmem>>, vector<8x8xf32>
      tpu.vector_store %arg10[%c0_36, %c0_37], %40 {strides = array<i32>} : memref<8x8xf32, #tpu.memory_space<vmem>>, vector<8x8xf32>,
    } else {
    }
    %c0 = arith.constant 0 : index
    %c0_1 = arith.constant 0 : index
    %c0_2 = arith.constant 0 : index
    %c0_3 = arith.constant 0 : index
    %3 = vector.load %arg4[%c0, %c0_1, %c0_2, %c0_3] : memref<1x1x8x8xbf16, #tpu.memory_space<vmem>>, vector<1x1x8x8xbf16>
    %4 = vector.shape_cast %3 : vector<1x1x8x8xbf16> to vector<8x8xbf16>
    %c0_4 = arith.constant 0 : index
    %c0_5 = arith.constant 0 : index
    %c0_6 = arith.constant 0 : index
    %c0_7 = arith.constant 0 : index
    %5 = vector.load %arg5[%c0_4, %c0_5, %c0_6, %c0_7] : memref<1x1x8x8xbf16, #tpu.memory_space<vmem>>, vector<1x1x8x8xbf16>
    %6 = vector.shape_cast %5 : vector<1x1x8x8xbf16> to vector<8x8xbf16>
    %cst = arith.constant dense<0.000000e+00> : vector<8x8xf32>
    %7 = tpu.matmul %4, %6, %cst {dimension_numbers = #tpu.dot_dimension_numbers<[1], [1], [0], [0], [0, 0, 1, 0], [], []>} : vector<8x8xbf16>, vector<8x8xbf16>, vector<8x8xf32> -> vector<8x8xf32>
    %c0_8 = arith.constant 0 : index
    %c0_9 = arith.constant 0 : index
    %8 = vector.load %arg8[%c0_8, %c0_9] : memref<8x1xf32, #tpu.memory_space<vmem>>, vector<8x1xf32>
    %cst_10 = arith.constant dense<0xFF800000> : vector<8xf32>
    %9 = vector.multi_reduction <maximumf>, %7, %cst_10 [1] : vector<8x8xf32> to vector<8xf32>
    %10 = vector.shape_cast %9 : vector<8xf32> to vector<8x1xf32>
    %11 = arith.maximumf %8, %10 : vector<8x1xf32>
    %12 = arith.subf %8, %11 : vector<8x1xf32>
    %13 = math.exp %12 : vector<8x1xf32>
    %14 = vector.broadcast %11 : vector<8x1xf32> to vector<8x8xf32>
    %15 = arith.subf %7, %14 : vector<8x8xf32>
    %16 = math.exp %15 : vector<8x8xf32>
    %c0_11 = arith.constant 0 : index
    %c0_12 = arith.constant 0 : index
    %17 = vector.load %arg9[%c0_11, %c0_12] : memref<8x1xf32, #tpu.memory_space<vmem>>, vector<8x1xf32>
    %18 = arith.mulf %13, %17 : vector<8x1xf32>
    %cst_13 = arith.constant dense<0.000000e+00> : vector<8xf32>
    %19 = vector.multi_reduction <add>, %16, %cst_13 [1] : vector<8x8xf32> to vector<8xf32>
    %20 = vector.shape_cast %19 : vector<8xf32> to vector<8x1xf32>
    %21 = arith.addf %18, %20 : vector<8x1xf32>
    %c0_14 = arith.constant 0 : index
    %c0_15 = arith.constant 0 : index
    %22 = vector.load %arg9[%c0_14, %c0_15] : memref<8x1xf32, #tpu.memory_space<vmem>>, vector<8x1xf32>
    tpu.vector_store %arg9[%c0_14, %c0_15], %21 {strides = array<i32>} : memref<8x1xf32, #tpu.memory_space<vmem>>, vector<8x1xf32>,
    %c0_16 = arith.constant 0 : index
    %c0_17 = arith.constant 0 : index
    %23 = vector.load %arg10[%c0_16, %c0_17] : memref<8x8xf32, #tpu.memory_space<vmem>>, vector<8x8xf32>
    %24 = vector.broadcast %13 : vector<8x1xf32> to vector<8x8xf32>
    %25 = arith.mulf %24, %23 : vector<8x8xf32>
    %26 = arith.truncf %16 : vector<8x8xf32> to vector<8x8xbf16>
    %c0_18 = arith.constant 0 : index
    %c0_19 = arith.constant 0 : index
    %c0_20 = arith.constant 0 : index
    %c0_21 = arith.constant 0 : index
    %27 = vector.load %arg6[%c0_18, %c0_19, %c0_20, %c0_21] : memref<1x1x8x8xbf16, #tpu.memory_space<vmem>>, vector<1x1x8x8xbf16>
    %28 = vector.shape_cast %27 : vector<1x1x8x8xbf16> to vector<8x8xbf16>
    %cst_22 = arith.constant dense<0.000000e+00> : vector<8x8xf32>
    %29 = tpu.matmul %26, %28, %cst_22 {dimension_numbers = #tpu.dot_dimension_numbers<[1], [0], [0], [1], [0, 0, 1, 1], [], []>} : vector<8x8xbf16>, vector<8x8xbf16>, vector<8x8xf32> -> vector<8x8xf32>
    %30 = arith.addf %25, %29 : vector<8x8xf32>
    %c0_23 = arith.constant 0 : index
    %c0_24 = arith.constant 0 : index
    %31 = vector.load %arg10[%c0_23, %c0_24] : memref<8x8xf32, #tpu.memory_space<vmem>>, vector<8x8xf32>
    tpu.vector_store %arg10[%c0_23, %c0_24], %30 {strides = array<i32>} : memref<8x8xf32, #tpu.memory_space<vmem>>, vector<8x8xf32>,
    %c0_25 = arith.constant 0 : index
    %c0_26 = arith.constant 0 : index
    %32 = vector.load %arg8[%c0_25, %c0_26] : memref<8x1xf32, #tpu.memory_space<vmem>>, vector<8x1xf32>
    tpu.vector_store %arg8[%c0_25, %c0_26], %11 {strides = array<i32>} : memref<8x1xf32, #tpu.memory_space<vmem>>, vector<8x1xf32>,
    %c0_i32_27 = arith.constant 0 : i32
    %33 = arith.cmpi eq, %arg3, %c0_i32_27 : i32
    %34 = arith.extui %33 : i1 to i32
    %c0_i32_28 = arith.constant 0 : i32
    %35 = arith.cmpi ne, %34, %c0_i32_28 : i32
    scf.if %35 {
      %c0_29 = arith.constant 0 : index
      %c0_30 = arith.constant 0 : index
      %36 = vector.load %arg10[%c0_29, %c0_30] : memref<8x8xf32, #tpu.memory_space<vmem>>, vector<8x8xf32>
      %c0_31 = arith.constant 0 : index
      %c0_32 = arith.constant 0 : index
      %37 = vector.load %arg9[%c0_31, %c0_32] : memref<8x1xf32, #tpu.memory_space<vmem>>, vector<8x1xf32>
      %38 = vector.broadcast %37 : vector<8x1xf32> to vector<8x8xf32>
      %39 = arith.divf %36, %38 : vector<8x8xf32>
      %40 = arith.truncf %39 : vector<8x8xf32> to vector<8x8xbf16>
      %c0_33 = arith.constant 0 : index
      %c0_34 = arith.constant 0 : index
      %c0_35 = arith.constant 0 : index
      %c0_36 = arith.constant 0 : index
      %41 = vector.load %arg7[%c0_33, %c0_34, %c0_35, %c0_36] : memref<1x1x8x8xbf16, #tpu.memory_space<vmem>>, vector<1x1x8x8xbf16>
      %42 = vector.shape_cast %41 : vector<1x1x8x8xbf16> to vector<8x8xbf16>
      %43 = vector.shape_cast %40 : vector<8x8xbf16> to vector<1x1x8x8xbf16>
      tpu.vector_store %arg7[%c0_33, %c0_34, %c0_35, %c0_36], %43 {strides = array<i32>} : memref<1x1x8x8xbf16, #tpu.memory_space<vmem>>, vector<1x1x8x8xbf16>,
    } else {
    }
    return
  }
  func.func @transform_0(%arg0: i32, %arg1: i32, %arg2: i32, %arg3: i32) -> (i32, i32, i32, i32) {
    %c0_i32 = arith.constant 0 : i32
    %c0_i32_0 = arith.constant 0 : i32
    return %arg0, %arg1, %arg2, %c0_i32 : i32, i32, i32, i32
  }
  func.func @transform_1(%arg0: i32, %arg1: i32, %arg2: i32, %arg3: i32) -> (i32, i32, i32, i32) {
    %c0_i32 = arith.constant 0 : i32
    %c0_i32_0 = arith.constant 0 : i32
    return %arg0, %arg1, %arg3, %c0_i32 : i32, i32, i32, i32
  }
  func.func @transform_2(%arg0: i32, %arg1: i32, %arg2: i32, %arg3: i32) -> (i32, i32, i32, i32) {
    %c0_i32 = arith.constant 0 : i32
    %c0_i32_0 = arith.constant 0 : i32
    return %arg0, %arg1, %arg3, %c0_i32 : i32, i32, i32, i32
  }
  func.func @transform_3(%arg0: i32, %arg1: i32, %arg2: i32, %arg3: i32) -> (i32, i32, i32, i32) {
    %c0_i32 = arith.constant 0 : i32
    %c0_i32_0 = arith.constant 0 : i32
    return %arg0, %arg1, %arg2, %c0_i32 : i32, i32, i32, i32
  }
}

module attributes {stable_mosaic.version = 11 : i64} {
  func.func @kernel(%arg0: i32, %arg1: i32, %arg2: i32, %arg3: i32, %arg4: memref<1x8x32xbf16, #tpu.memory_space<vmem>>, %arg5: memref<32x32xbf16, #tpu.memory_space<vmem>>, %arg6: memref<1x32xf32, #tpu.memory_space<vmem>>, %arg7: memref<1x8x32xbf16, #tpu.memory_space<vmem>>, %arg8: memref<1x1x32xf32, #tpu.memory_space<vmem>>, %arg9: memref<1x8x32xbf16, #tpu.memory_space<vmem>>, %arg10: memref<8x32xf32, #tpu.memory_space<vmem>>) attributes {dimension_semantics = [#tpu.dimension_semantics<parallel>, #tpu.dimension_semantics<parallel>, #tpu.dimension_semantics<parallel>, #tpu.dimension_semantics<arbitrary>], iteration_bounds = array<i64: 2, 1, 1, 1>, scalar_prefetch = 0 : i64, scratch_operands = 1 : i64, tpu.core_type = #tpu.core_type<tc>, window_params = [{transform_indices = @transform_0, window_bounds = array<i64: 1, 8, 32>}, {transform_indices = @transform_1, window_bounds = array<i64: 32, 32>}, {transform_indices = @transform_2, window_bounds = array<i64: 1, 32>}, {transform_indices = @transform_3, window_bounds = array<i64: 1, 8, 32>}, {transform_indices = @transform_4, window_bounds = array<i64: 1, 1, 32>}, {transform_indices = @transform_5, window_bounds = array<i64: 1, 8, 32>}]} {
    %c0_i32 = arith.constant 0 : i32
    %0 = arith.cmpi eq, %arg3, %c0_i32 : i32
    %1 = arith.extui %0 : i1 to i32
    %c0_i32_0 = arith.constant 0 : i32
    %2 = arith.cmpi ne, %1, %c0_i32_0 : i32
    scf.if %2 {
      %cst_11 = arith.constant 0.000000e+00 : f32
      %13 = vector.broadcast %cst_11 : f32 to vector<8x32xf32>
      %c0_12 = arith.constant 0 : index
      %c0_13 = arith.constant 0 : index
      %14 = vector.load %arg10[%c0_12, %c0_13] : memref<8x32xf32, #tpu.memory_space<vmem>>, vector<8x32xf32>
      tpu.vector_store %arg10[%c0_12, %c0_13], %13 {strides = array<i32>} : memref<8x32xf32, #tpu.memory_space<vmem>>, vector<8x32xf32>,
    } else {
    }
    %c0 = arith.constant 0 : index
    %c0_1 = arith.constant 0 : index
    %c0_2 = arith.constant 0 : index
    %3 = vector.load %arg4[%c0, %c0_1, %c0_2] : memref<1x8x32xbf16, #tpu.memory_space<vmem>>, vector<1x8x32xbf16>
    %4 = vector.shape_cast %3 : vector<1x8x32xbf16> to vector<8x32xbf16>
    %c0_3 = arith.constant 0 : index
    %c0_4 = arith.constant 0 : index
    %5 = vector.load %arg10[%c0_3, %c0_4] : memref<8x32xf32, #tpu.memory_space<vmem>>, vector<8x32xf32>
    %c0_5 = arith.constant 0 : index
    %c0_6 = arith.constant 0 : index
    %6 = vector.load %arg5[%c0_5, %c0_6] : memref<32x32xbf16, #tpu.memory_space<vmem>>, vector<32x32xbf16>
    %cst = arith.constant dense<0.000000e+00> : vector<8x32xf32>
    %7 = tpu.matmul %4, %6, %cst {dimension_numbers = #tpu.dot_dimension_numbers<[1], [0], [0], [1], [0, 0, 1, 1], [], []>} : vector<8x32xbf16>, vector<32x32xbf16>, vector<8x32xf32> -> vector<8x32xf32>
    %8 = arith.addf %5, %7 : vector<8x32xf32>
    %c0_7 = arith.constant 0 : index
    %c0_8 = arith.constant 0 : index
    %9 = vector.load %arg10[%c0_7, %c0_8] : memref<8x32xf32, #tpu.memory_space<vmem>>, vector<8x32xf32>
    tpu.vector_store %arg10[%c0_7, %c0_8], %8 {strides = array<i32>} : memref<8x32xf32, #tpu.memory_space<vmem>>, vector<8x32xf32>,
    %c0_i32_9 = arith.constant 0 : i32
    %10 = arith.cmpi eq, %arg3, %c0_i32_9 : i32
    %11 = arith.extui %10 : i1 to i32
    %c0_i32_10 = arith.constant 0 : i32
    %12 = arith.cmpi ne, %11, %c0_i32_10 : i32
    scf.if %12 {
      %c0_11 = arith.constant 0 : index
      %c0_12 = arith.constant 0 : index
      %13 = vector.load %arg10[%c0_11, %c0_12] : memref<8x32xf32, #tpu.memory_space<vmem>>, vector<8x32xf32>
      %c0_13 = arith.constant 0 : index
      %c0_14 = arith.constant 0 : index
      %14 = vector.load %arg6[%c0_13, %c0_14] : memref<1x32xf32, #tpu.memory_space<vmem>>, vector<1x32xf32>
      %15 = vector.broadcast %14 : vector<1x32xf32> to vector<8x32xf32>
      %16 = arith.addf %13, %15 : vector<8x32xf32>
      %c0_15 = arith.constant 0 : index
      %c0_16 = arith.constant 0 : index
      %c0_17 = arith.constant 0 : index
      %17 = vector.load %arg7[%c0_15, %c0_16, %c0_17] : memref<1x8x32xbf16, #tpu.memory_space<vmem>>, vector<1x8x32xbf16>
      %18 = vector.shape_cast %17 : vector<1x8x32xbf16> to vector<8x32xbf16>
      %19 = arith.extf %18 : vector<8x32xbf16> to vector<8x32xf32>
      %c0_18 = arith.constant 0 : index
      %c0_19 = arith.constant 0 : index
      %c0_20 = arith.constant 0 : index
      %20 = vector.load %arg8[%c0_18, %c0_19, %c0_20] : memref<1x1x32xf32, #tpu.memory_space<vmem>>, vector<1x1x32xf32>
      %21 = vector.shape_cast %20 : vector<1x1x32xf32> to vector<1x32xf32>
      %22 = vector.broadcast %21 : vector<1x32xf32> to vector<8x32xf32>
      %23 = arith.mulf %16, %22 : vector<8x32xf32>
      %24 = arith.addf %19, %23 : vector<8x32xf32>
      %25 = arith.truncf %24 : vector<8x32xf32> to vector<8x32xbf16>
      %c0_21 = arith.constant 0 : index
      %c0_22 = arith.constant 0 : index
      %c0_23 = arith.constant 0 : index
      %26 = vector.load %arg9[%c0_21, %c0_22, %c0_23] : memref<1x8x32xbf16, #tpu.memory_space<vmem>>, vector<1x8x32xbf16>
      %27 = vector.shape_cast %26 : vector<1x8x32xbf16> to vector<8x32xbf16>
      %28 = vector.shape_cast %25 : vector<8x32xbf16> to vector<1x8x32xbf16>
      tpu.vector_store %arg9[%c0_21, %c0_22, %c0_23], %28 {strides = array<i32>} : memref<1x8x32xbf16, #tpu.memory_space<vmem>>, vector<1x8x32xbf16>,
    } else {
    }
    return
  }
  func.func @transform_0(%arg0: i32, %arg1: i32, %arg2: i32, %arg3: i32) -> (i32, i32, i32) {
    %c0_i32 = arith.constant 0 : i32
    return %arg0, %arg1, %arg3 : i32, i32, i32
  }
  func.func @transform_1(%arg0: i32, %arg1: i32, %arg2: i32, %arg3: i32) -> (i32, i32) {
    %c0_i32 = arith.constant 0 : i32
    return %arg3, %arg2 : i32, i32
  }
  func.func @transform_2(%arg0: i32, %arg1: i32, %arg2: i32, %arg3: i32) -> (i32, i32) {
    %c0_i32 = arith.constant 0 : i32
    %c0_i32_0 = arith.constant 0 : i32
    return %c0_i32, %arg2 : i32, i32
  }
  func.func @transform_3(%arg0: i32, %arg1: i32, %arg2: i32, %arg3: i32) -> (i32, i32, i32) {
    %c0_i32 = arith.constant 0 : i32
    return %arg0, %arg1, %arg2 : i32, i32, i32
  }
  func.func @transform_4(%arg0: i32, %arg1: i32, %arg2: i32, %arg3: i32) -> (i32, i32, i32) {
    %c0_i32 = arith.constant 0 : i32
    %c0_i32_0 = arith.constant 0 : i32
    return %arg0, %c0_i32, %arg2 : i32, i32, i32
  }
  func.func @transform_5(%arg0: i32, %arg1: i32, %arg2: i32, %arg3: i32) -> (i32, i32, i32) {
    %c0_i32 = arith.constant 0 : i32
    return %arg0, %arg1, %arg2 : i32, i32, i32
  }
}

module attributes {stable_mosaic.version = 11 : i64} {
  func.func @kernel(%arg0: i32, %arg1: i32, %arg2: i32, %arg3: i32, %arg4: memref<1x8x32xbf16, #tpu.memory_space<vmem>>, %arg5: memref<32x32xbf16, #tpu.memory_space<vmem>>, %arg6: memref<1x32xf32, #tpu.memory_space<vmem>>, %arg7: memref<1x32xf32, #tpu.memory_space<vmem>>, %arg8: memref<1x32xf32, #tpu.memory_space<vmem>>, %arg9: memref<1x8x32xbf16, #tpu.memory_space<vmem>>, %arg10: memref<8x32xf32, #tpu.memory_space<vmem>>) attributes {dimension_semantics = [#tpu.dimension_semantics<parallel>, #tpu.dimension_semantics<parallel>, #tpu.dimension_semantics<parallel>, #tpu.dimension_semantics<arbitrary>], iteration_bounds = array<i64: 2, 1, 1, 1>, scalar_prefetch = 0 : i64, scratch_operands = 1 : i64, tpu.core_type = #tpu.core_type<tc>, window_params = [{transform_indices = @transform_0, window_bounds = array<i64: 1, 8, 32>}, {transform_indices = @transform_1, window_bounds = array<i64: 32, 32>}, {transform_indices = @transform_2, window_bounds = array<i64: 1, 32>}, {pipeline_mode = #tpu.pipeline_mode<synchronous>, transform_indices = @transform_3, window_bounds = array<i64: 1, 32>}, {pipeline_mode = #tpu.pipeline_mode<synchronous>, transform_indices = @transform_4, window_bounds = array<i64: 1, 32>}, {transform_indices = @transform_5, window_bounds = array<i64: 1, 8, 32>}]} {
    %c0_i32 = arith.constant 0 : i32
    %0 = arith.cmpi eq, %arg3, %c0_i32 : i32
    %1 = arith.extui %0 : i1 to i32
    %c0_i32_0 = arith.constant 0 : i32
    %2 = arith.cmpi ne, %1, %c0_i32_0 : i32
    scf.if %2 {
      %cst_20 = arith.constant 0.000000e+00 : f32
      %37 = vector.broadcast %cst_20 : f32 to vector<8x32xf32>
      %c0_21 = arith.constant 0 : index
      %c0_22 = arith.constant 0 : index
      %38 = vector.load %arg10[%c0_21, %c0_22] : memref<8x32xf32, #tpu.memory_space<vmem>>, vector<8x32xf32>
      tpu.vector_store %arg10[%c0_21, %c0_22], %37 {strides = array<i32>} : memref<8x32xf32, #tpu.memory_space<vmem>>, vector<8x32xf32>,
    } else {
    }
    %c0 = arith.constant 0 : index
    %c0_1 = arith.constant 0 : index
    %c0_2 = arith.constant 0 : index
    %3 = vector.load %arg4[%c0, %c0_1, %c0_2] : memref<1x8x32xbf16, #tpu.memory_space<vmem>>, vector<1x8x32xbf16>
    %4 = vector.shape_cast %3 : vector<1x8x32xbf16> to vector<8x32xbf16>
    %5 = arith.extf %4 : vector<8x32xbf16> to vector<8x32xf32>
    %cst = arith.constant dense<0.000000e+00> : vector<8xf32>
    %6 = vector.multi_reduction <add>, %5, %cst [1] : vector<8x32xf32> to vector<8xf32>
    %7 = vector.shape_cast %6 : vector<8xf32> to vector<8x1xf32>
    %cst_3 = arith.constant 3.200000e+01 : f32
    %8 = vector.broadcast %cst_3 : f32 to vector<8x1xf32>
    %9 = arith.divf %7, %8 : vector<8x1xf32>
    %10 = vector.broadcast %9 : vector<8x1xf32> to vector<8x32xf32>
    %11 = arith.subf %5, %10 : vector<8x32xf32>
    %12 = arith.mulf %11, %11 : vector<8x32xf32>
    %cst_4 = arith.constant dense<0.000000e+00> : vector<8xf32>
    %13 = vector.multi_reduction <add>, %12, %cst_4 [1] : vector<8x32xf32> to vector<8xf32>
    %14 = vector.shape_cast %13 : vector<8xf32> to vector<8x1xf32>
    %cst_5 = arith.constant 3.200000e+01 : f32
    %15 = vector.broadcast %cst_5 : f32 to vector<8x1xf32>
    %16 = arith.divf %14, %15 : vector<8x1xf32>
    %cst_6 = arith.constant 9.99999997E-7 : f32
    %17 = vector.broadcast %cst_6 : f32 to vector<8x1xf32>
    %18 = arith.addf %16, %17 : vector<8x1xf32>
    %19 = math.rsqrt %18 : vector<8x1xf32>
    %20 = vector.broadcast %19 : vector<8x1xf32> to vector<8x32xf32>
    %21 = arith.mulf %11, %20 : vector<8x32xf32>
    %c0_7 = arith.constant 0 : index
    %c0_8 = arith.constant 0 : index
    %22 = vector.load %arg7[%c0_7, %c0_8] : memref<1x32xf32, #tpu.memory_space<vmem>>, vector<1x32xf32>
    %23 = vector.broadcast %22 : vector<1x32xf32> to vector<8x32xf32>
    %24 = arith.mulf %21, %23 : vector<8x32xf32>
    %c0_9 = arith.constant 0 : index
    %c0_10 = arith.constant 0 : index
    %25 = vector.load %arg8[%c0_9, %c0_10] : memref<1x32xf32, #tpu.memory_space<vmem>>, vector<1x32xf32>
    %26 = vector.broadcast %25 : vector<1x32xf32> to vector<8x32xf32>
    %27 = arith.addf %24, %26 : vector<8x32xf32>
    %28 = arith.truncf %27 : vector<8x32xf32> to vector<8x32xbf16>
    %c0_11 = arith.constant 0 : index
    %c0_12 = arith.constant 0 : index
    %29 = vector.load %arg10[%c0_11, %c0_12] : memref<8x32xf32, #tpu.memory_space<vmem>>, vector<8x32xf32>
    %c0_13 = arith.constant 0 : index
    %c0_14 = arith.constant 0 : index
    %30 = vector.load %arg5[%c0_13, %c0_14] : memref<32x32xbf16, #tpu.memory_space<vmem>>, vector<32x32xbf16>
    %cst_15 = arith.constant dense<0.000000e+00> : vector<8x32xf32>
    %31 = tpu.matmul %28, %30, %cst_15 {dimension_numbers = #tpu.dot_dimension_numbers<[1], [0], [0], [1], [0, 0, 1, 1], [], []>} : vector<8x32xbf16>, vector<32x32xbf16>, vector<8x32xf32> -> vector<8x32xf32>
    %32 = arith.addf %29, %31 : vector<8x32xf32>
    %c0_16 = arith.constant 0 : index
    %c0_17 = arith.constant 0 : index
    %33 = vector.load %arg10[%c0_16, %c0_17] : memref<8x32xf32, #tpu.memory_space<vmem>>, vector<8x32xf32>
    tpu.vector_store %arg10[%c0_16, %c0_17], %32 {strides = array<i32>} : memref<8x32xf32, #tpu.memory_space<vmem>>, vector<8x32xf32>,
    %c0_i32_18 = arith.constant 0 : i32
    %34 = arith.cmpi eq, %arg3, %c0_i32_18 : i32
    %35 = arith.extui %34 : i1 to i32
    %c0_i32_19 = arith.constant 0 : i32
    %36 = arith.cmpi ne, %35, %c0_i32_19 : i32
    scf.if %36 {
      %c0_20 = arith.constant 0 : index
      %c0_21 = arith.constant 0 : index
      %37 = vector.load %arg10[%c0_20, %c0_21] : memref<8x32xf32, #tpu.memory_space<vmem>>, vector<8x32xf32>
      %c0_22 = arith.constant 0 : index
      %c0_23 = arith.constant 0 : index
      %38 = vector.load %arg6[%c0_22, %c0_23] : memref<1x32xf32, #tpu.memory_space<vmem>>, vector<1x32xf32>
      %39 = vector.broadcast %38 : vector<1x32xf32> to vector<8x32xf32>
      %40 = arith.addf %37, %39 : vector<8x32xf32>
      %41 = arith.truncf %40 : vector<8x32xf32> to vector<8x32xbf16>
      %c0_24 = arith.constant 0 : index
      %c0_25 = arith.constant 0 : index
      %c0_26 = arith.constant 0 : index
      %42 = vector.load %arg9[%c0_24, %c0_25, %c0_26] : memref<1x8x32xbf16, #tpu.memory_space<vmem>>, vector<1x8x32xbf16>
      %43 = vector.shape_cast %42 : vector<1x8x32xbf16> to vector<8x32xbf16>
      %44 = vector.shape_cast %41 : vector<8x32xbf16> to vector<1x8x32xbf16>
      tpu.vector_store %arg9[%c0_24, %c0_25, %c0_26], %44 {strides = array<i32>} : memref<1x8x32xbf16, #tpu.memory_space<vmem>>, vector<1x8x32xbf16>,
    } else {
    }
    return
  }
  func.func @transform_0(%arg0: i32, %arg1: i32, %arg2: i32, %arg3: i32) -> (i32, i32, i32) {
    %c0_i32 = arith.constant 0 : i32
    return %arg0, %arg1, %arg3 : i32, i32, i32
  }
  func.func @transform_1(%arg0: i32, %arg1: i32, %arg2: i32, %arg3: i32) -> (i32, i32) {
    %c0_i32 = arith.constant 0 : i32
    return %arg3, %arg2 : i32, i32
  }
  func.func @transform_2(%arg0: i32, %arg1: i32, %arg2: i32, %arg3: i32) -> (i32, i32) {
    %c0_i32 = arith.constant 0 : i32
    %c0_i32_0 = arith.constant 0 : i32
    return %c0_i32, %arg2 : i32, i32
  }
  func.func @transform_3(%arg0: i32, %arg1: i32, %arg2: i32, %arg3: i32) -> (i32, i32) {
    %c0_i32 = arith.constant 0 : i32
    %c0_i32_0 = arith.constant 0 : i32
    %c0_i32_1 = arith.constant 0 : i32
    return %c0_i32, %c0_i32_0 : i32, i32
  }
  func.func @transform_4(%arg0: i32, %arg1: i32, %arg2: i32, %arg3: i32) -> (i32, i32) {
    %c0_i32 = arith.constant 0 : i32
    %c0_i32_0 = arith.constant 0 : i32
    %c0_i32_1 = arith.constant 0 : i32
    return %c0_i32, %c0_i32_0 : i32, i32
  }
  func.func @transform_5(%arg0: i32, %arg1: i32, %arg2: i32, %arg3: i32) -> (i32, i32, i32) {
    %c0_i32 = arith.constant 0 : i32
    return %arg0, %arg1, %arg2 : i32, i32, i32
  }
}

module attributes {stable_mosaic.version = 11 : i64} {
  func.func @kernel(%arg0: i32, %arg1: i32, %arg2: memref<1x8x1x4x8xbf16, #tpu.memory_space<vmem>>, %arg3: memref<4x8xf32, #tpu.memory_space<vmem>>, %arg4: memref<1x4x8x8xbf16, #tpu.memory_space<vmem>>) attributes {dimension_semantics = [#tpu.dimension_semantics<parallel>, #tpu.dimension_semantics<parallel>], iteration_bounds = array<i64: 2, 1>, scalar_prefetch = 0 : i64, scratch_operands = 0 : i64, tpu.core_type = #tpu.core_type<tc>, window_params = [{transform_indices = @transform_0, window_bounds = array<i64: 1, 8, 1, 4, 8>}, {pipeline_mode = #tpu.pipeline_mode<synchronous>, transform_indices = @transform_1, window_bounds = array<i64: 4, 8>}, {transform_indices = @transform_2, window_bounds = array<i64: 1, 4, 8, 8>}]} {
    %c0 = arith.constant 0 : index
    %c0_0 = arith.constant 0 : index
    %c0_1 = arith.constant 0 : index
    %c0_2 = arith.constant 0 : index
    %c0_3 = arith.constant 0 : index
    %0 = vector.load %arg2[%c0, %c0_0, %c0_1, %c0_2, %c0_3] : memref<1x8x1x4x8xbf16, #tpu.memory_space<vmem>>, vector<1x8x1x4x8xbf16>
    %1 = vector.shape_cast %0 : vector<1x8x1x4x8xbf16> to vector<8x4x8xbf16>
    %2 = arith.extf %1 : vector<8x4x8xbf16> to vector<8x4x8xf32>
    %3 = arith.mulf %2, %2 : vector<8x4x8xf32>
    %cst = arith.constant dense<0.000000e+00> : vector<8x4xf32>
    %4 = vector.multi_reduction <add>, %3, %cst [2] : vector<8x4x8xf32> to vector<8x4xf32>
    %5 = vector.shape_cast %4 : vector<8x4xf32> to vector<8x4x1xf32>
    %cst_4 = arith.constant 8.000000e+00 : f32
    %6 = vector.broadcast %cst_4 : f32 to vector<8x4x1xf32>
    %7 = arith.divf %5, %6 : vector<8x4x1xf32>
    %cst_5 = arith.constant dense<0.000000e+00> : vector<8x1xf32>
    %8 = vector.multi_reduction <add>, %7, %cst_5 [1] : vector<8x4x1xf32> to vector<8x1xf32>
    %9 = vector.shape_cast %8 : vector<8x1xf32> to vector<8x1x1xf32>
    %cst_6 = arith.constant 4.000000e+00 : f32
    %10 = vector.broadcast %cst_6 : f32 to vector<8x1x1xf32>
    %11 = arith.divf %9, %10 : vector<8x1x1xf32>
    %cst_7 = arith.constant 9.99999997E-7 : f32
    %12 = vector.broadcast %cst_7 : f32 to vector<8x1x1xf32>
    %13 = arith.addf %11, %12 : vector<8x1x1xf32>
    %14 = math.rsqrt %13 : vector<8x1x1xf32>
    %15 = vector.broadcast %14 : vector<8x1x1xf32> to vector<8x4x8xf32>
    %16 = arith.mulf %2, %15 : vector<8x4x8xf32>
    %c0_8 = arith.constant 0 : index
    %c0_9 = arith.constant 0 : index
    %17 = vector.load %arg3[%c0_8, %c0_9] : memref<4x8xf32, #tpu.memory_space<vmem>>, vector<4x8xf32>
    %18 = vector.shape_cast %17 : vector<4x8xf32> to vector<1x4x8xf32>
    %19 = vector.broadcast %18 : vector<1x4x8xf32> to vector<8x4x8xf32>
    %20 = arith.mulf %16, %19 : vector<8x4x8xf32>
    %cst_10 = arith.constant 0.353553385 : f32
    %21 = vector.broadcast %cst_10 : f32 to vector<8x4x8xf32>
    %22 = arith.mulf %20, %21 : vector<8x4x8xf32>
    %23 = arith.truncf %22 : vector<8x4x8xf32> to vector<8x4x8xbf16>
    %24 = vector.extract_strided_slice %23 {offsets = [0, 0, 0], sizes = [8, 1, 8], strides = [1, 1, 1]} : vector<8x4x8xbf16> to vector<8x1x8xbf16>
    %25 = vector.shape_cast %24 : vector<8x1x8xbf16> to vector<8x8xbf16>
    %c0_11 = arith.constant 0 : index
    %c0_12 = arith.constant 0 : index
    %c0_13 = arith.constant 0 : index
    %c0_14 = arith.constant 0 : index
    %26 = vector.load %arg4[%c0_11, %c0_12, %c0_13, %c0_14] : memref<1x4x8x8xbf16, #tpu.memory_space<vmem>>, vector<1x1x8x8xbf16>
    %27 = vector.shape_cast %26 : vector<1x1x8x8xbf16> to vector<8x8xbf16>
    %28 = vector.shape_cast %25 : vector<8x8xbf16> to vector<1x1x8x8xbf16>
    tpu.vector_store %arg4[%c0_11, %c0_12, %c0_13, %c0_14], %28 {strides = array<i32>} : memref<1x4x8x8xbf16, #tpu.memory_space<vmem>>, vector<1x1x8x8xbf16>,
    %29 = vector.extract_strided_slice %23 {offsets = [0, 1, 0], sizes = [8, 1, 8], strides = [1, 1, 1]} : vector<8x4x8xbf16> to vector<8x1x8xbf16>
    %30 = vector.shape_cast %29 : vector<8x1x8xbf16> to vector<8x8xbf16>
    %c0_15 = arith.constant 0 : index
    %c1 = arith.constant 1 : index
    %c0_16 = arith.constant 0 : index
    %c0_17 = arith.constant 0 : index
    %31 = vector.load %arg4[%c0_15, %c1, %c0_16, %c0_17] : memref<1x4x8x8xbf16, #tpu.memory_space<vmem>>, vector<1x1x8x8xbf16>
    %32 = vector.shape_cast %31 : vector<1x1x8x8xbf16> to vector<8x8xbf16>
    %33 = vector.shape_cast %30 : vector<8x8xbf16> to vector<1x1x8x8xbf16>
    tpu.vector_store %arg4[%c0_15, %c1, %c0_16, %c0_17], %33 {strides = array<i32>} : memref<1x4x8x8xbf16, #tpu.memory_space<vmem>>, vector<1x1x8x8xbf16>,
    %34 = vector.extract_strided_slice %23 {offsets = [0, 2, 0], sizes = [8, 1, 8], strides = [1, 1, 1]} : vector<8x4x8xbf16> to vector<8x1x8xbf16>
    %35 = vector.shape_cast %34 : vector<8x1x8xbf16> to vector<8x8xbf16>
    %c0_18 = arith.constant 0 : index
    %c2 = arith.constant 2 : index
    %c0_19 = arith.constant 0 : index
    %c0_20 = arith.constant 0 : index
    %36 = vector.load %arg4[%c0_18, %c2, %c0_19, %c0_20] : memref<1x4x8x8xbf16, #tpu.memory_space<vmem>>, vector<1x1x8x8xbf16>
    %37 = vector.shape_cast %36 : vector<1x1x8x8xbf16> to vector<8x8xbf16>
    %38 = vector.shape_cast %35 : vector<8x8xbf16> to vector<1x1x8x8xbf16>
    tpu.vector_store %arg4[%c0_18, %c2, %c0_19, %c0_20], %38 {strides = array<i32>} : memref<1x4x8x8xbf16, #tpu.memory_space<vmem>>, vector<1x1x8x8xbf16>,
    %39 = vector.extract_strided_slice %23 {offsets = [0, 3, 0], sizes = [8, 1, 8], strides = [1, 1, 1]} : vector<8x4x8xbf16> to vector<8x1x8xbf16>
    %40 = vector.shape_cast %39 : vector<8x1x8xbf16> to vector<8x8xbf16>
    %c0_21 = arith.constant 0 : index
    %c3 = arith.constant 3 : index
    %c0_22 = arith.constant 0 : index
    %c0_23 = arith.constant 0 : index
    %41 = vector.load %arg4[%c0_21, %c3, %c0_22, %c0_23] : memref<1x4x8x8xbf16, #tpu.memory_space<vmem>>, vector<1x1x8x8xbf16>
    %42 = vector.shape_cast %41 : vector<1x1x8x8xbf16> to vector<8x8xbf16>
    %43 = vector.shape_cast %40 : vector<8x8xbf16> to vector<1x1x8x8xbf16>
    tpu.vector_store %arg4[%c0_21, %c3, %c0_22, %c0_23], %43 {strides = array<i32>} : memref<1x4x8x8xbf16, #tpu.memory_space<vmem>>, vector<1x1x8x8xbf16>,
    return
  }
  func.func @transform_0(%arg0: i32, %arg1: i32) -> (i32, i32, i32, i32, i32) {
    %c0_i32 = arith.constant 0 : i32
    %c0_i32_0 = arith.constant 0 : i32
    %c0_i32_1 = arith.constant 0 : i32
    %c0_i32_2 = arith.constant 0 : i32
    return %arg0, %arg1, %c0_i32, %c0_i32_0, %c0_i32_1 : i32, i32, i32, i32, i32
  }
  func.func @transform_1(%arg0: i32, %arg1: i32) -> (i32, i32) {
    %c0_i32 = arith.constant 0 : i32
    %c0_i32_0 = arith.constant 0 : i32
    %c0_i32_1 = arith.constant 0 : i32
    return %c0_i32, %c0_i32_0 : i32, i32
  }
  func.func @transform_2(%arg0: i32, %arg1: i32) -> (i32, i32, i32, i32) {
    %c0_i32 = arith.constant 0 : i32
    %c0_i32_0 = arith.constant 0 : i32
    %c0_i32_1 = arith.constant 0 : i32
    return %arg0, %c0_i32, %arg1, %c0_i32_0 : i32, i32, i32, i32
  }
}

module attributes {stable_mosaic.version = 11 : i64} {
  func.func @kernel(%arg0: i32, %arg1: i32, %arg2: i32, %arg3: i32, %arg4: memref<1x12x32xbf16, #tpu.memory_space<vmem>>, %arg5: memref<32x64xbf16, #tpu.memory_space<vmem>>, %arg6: memref<1x64xf32, #tpu.memory_space<vmem>>, %arg7: memref<1x12x64xbf16, #tpu.memory_space<vmem>>, %arg8: memref<12x64xf32, #tpu.memory_space<vmem>>) attributes {dimension_semantics = [#tpu.dimension_semantics<parallel>, #tpu.dimension_semantics<parallel>, #tpu.dimension_semantics<parallel>, #tpu.dimension_semantics<arbitrary>], iteration_bounds = array<i64: 2, 1, 1, 1>, scalar_prefetch = 0 : i64, scratch_operands = 1 : i64, tpu.core_type = #tpu.core_type<tc>, window_params = [{transform_indices = @transform_0, window_bounds = array<i64: 1, 12, 32>}, {transform_indices = @transform_1, window_bounds = array<i64: 32, 64>}, {transform_indices = @transform_2, window_bounds = array<i64: 1, 64>}, {transform_indices = @transform_3, window_bounds = array<i64: 1, 12, 64>}]} {
    %c0_i32 = arith.constant 0 : i32
    %0 = arith.cmpi eq, %arg3, %c0_i32 : i32
    %1 = arith.extui %0 : i1 to i32
    %c0_i32_0 = arith.constant 0 : i32
    %2 = arith.cmpi ne, %1, %c0_i32_0 : i32
    scf.if %2 {
      %cst_11 = arith.constant 0.000000e+00 : f32
      %13 = vector.broadcast %cst_11 : f32 to vector<12x64xf32>
      %c0_12 = arith.constant 0 : index
      %c0_13 = arith.constant 0 : index
      %14 = vector.load %arg8[%c0_12, %c0_13] : memref<12x64xf32, #tpu.memory_space<vmem>>, vector<12x64xf32>
      tpu.vector_store %arg8[%c0_12, %c0_13], %13 {strides = array<i32>} : memref<12x64xf32, #tpu.memory_space<vmem>>, vector<12x64xf32>,
    } else {
    }
    %c0 = arith.constant 0 : index
    %c0_1 = arith.constant 0 : index
    %c0_2 = arith.constant 0 : index
    %3 = vector.load %arg4[%c0, %c0_1, %c0_2] : memref<1x12x32xbf16, #tpu.memory_space<vmem>>, vector<1x12x32xbf16>
    %4 = vector.shape_cast %3 : vector<1x12x32xbf16> to vector<12x32xbf16>
    %c0_3 = arith.constant 0 : index
    %c0_4 = arith.constant 0 : index
    %5 = vector.load %arg8[%c0_3, %c0_4] : memref<12x64xf32, #tpu.memory_space<vmem>>, vector<12x64xf32>
    %c0_5 = arith.constant 0 : index
    %c0_6 = arith.constant 0 : index
    %6 = vector.load %arg5[%c0_5, %c0_6] : memref<32x64xbf16, #tpu.memory_space<vmem>>, vector<32x64xbf16>
    %cst = arith.constant dense<0.000000e+00> : vector<12x64xf32>
    %7 = tpu.matmul %4, %6, %cst {dimension_numbers = #tpu.dot_dimension_numbers<[1], [0], [0], [1], [0, 0, 1, 1], [], []>} : vector<12x32xbf16>, vector<32x64xbf16>, vector<12x64xf32> -> vector<12x64xf32>
    %8 = arith.addf %5, %7 : vector<12x64xf32>
    %c0_7 = arith.constant 0 : index
    %c0_8 = arith.constant 0 : index
    %9 = vector.load %arg8[%c0_7, %c0_8] : memref<12x64xf32, #tpu.memory_space<vmem>>, vector<12x64xf32>
    tpu.vector_store %arg8[%c0_7, %c0_8], %8 {strides = array<i32>} : memref<12x64xf32, #tpu.memory_space<vmem>>, vector<12x64xf32>,
    %c0_i32_9 = arith.constant 0 : i32
    %10 = arith.cmpi eq, %arg3, %c0_i32_9 : i32
    %11 = arith.extui %10 : i1 to i32
    %c0_i32_10 = arith.constant 0 : i32
    %12 = arith.cmpi ne, %11, %c0_i32_10 : i32
    scf.if %12 {
      %c0_11 = arith.constant 0 : index
      %c0_12 = arith.constant 0 : index
      %13 = vector.load %arg8[%c0_11, %c0_12] : memref<12x64xf32, #tpu.memory_space<vmem>>, vector<12x64xf32>
      %c0_13 = arith.constant 0 : index
      %c0_14 = arith.constant 0 : index
      %14 = vector.load %arg6[%c0_13, %c0_14] : memref<1x64xf32, #tpu.memory_space<vmem>>, vector<1x64xf32>
      %15 = vector.broadcast %14 : vector<1x64xf32> to vector<12x64xf32>
      %16 = arith.addf %13, %15 : vector<12x64xf32>
      %17 = arith.truncf %16 : vector<12x64xf32> to vector<12x64xbf16>
      %c0_15 = arith.constant 0 : index
      %c0_16 = arith.constant 0 : index
      %c0_17 = arith.constant 0 : index
      %18 = vector.load %arg7[%c0_15, %c0_16, %c0_17] : memref<1x12x64xbf16, #tpu.memory_space<vmem>>, vector<1x12x64xbf16>
      %19 = vector.shape_cast %18 : vector<1x12x64xbf16> to vector<12x64xbf16>
      %20 = vector.shape_cast %17 : vector<12x64xbf16> to vector<1x12x64xbf16>
      tpu.vector_store %arg7[%c0_15, %c0_16, %c0_17], %20 {strides = array<i32>} : memref<1x12x64xbf16, #tpu.memory_space<vmem>>, vector<1x12x64xbf16>,
    } else {
    }
    return
  }
  func.func @transform_0(%arg0: i32, %arg1: i32, %arg2: i32, %arg3: i32) -> (i32, i32, i32) {
    %c0_i32 = arith.constant 0 : i32
    return %arg0, %arg1, %arg3 : i32, i32, i32
  }
  func.func @transform_1(%arg0: i32, %arg1: i32, %arg2: i32, %arg3: i32) -> (i32, i32) {
    %c0_i32 = arith.constant 0 : i32
    return %arg3, %arg2 : i32, i32
  }
  func.func @transform_2(%arg0: i32, %arg1: i32, %arg2: i32, %arg3: i32) -> (i32, i32) {
    %c0_i32 = arith.constant 0 : i32
    %c0_i32_0 = arith.constant 0 : i32
    return %c0_i32, %arg2 : i32, i32
  }
  func.func @transform_3(%arg0: i32, %arg1: i32, %arg2: i32, %arg3: i32) -> (i32, i32, i32) {
    %c0_i32 = arith.constant 0 : i32
    return %arg0, %arg1, %arg2 : i32, i32, i32
  }
}

module attributes {stable_mosaic.version = 11 : i64} {
  func.func @kernel(%arg0: i32, %arg1: i32, %arg2: memref<1x12x2x4x8xbf16, #tpu.memory_space<vmem>>, %arg3: memref<4x8xf32, #tpu.memory_space<vmem>>, %arg4: memref<1x4x12x8xbf16, #tpu.memory_space<vmem>>, %arg5: memref<1x4x12x8xbf16, #tpu.memory_space<vmem>>) attributes {dimension_semantics = [#tpu.dimension_semantics<parallel>, #tpu.dimension_semantics<parallel>], iteration_bounds = array<i64: 2, 1>, scalar_prefetch = 0 : i64, scratch_operands = 0 : i64, tpu.core_type = #tpu.core_type<tc>, window_params = [{transform_indices = @transform_0, window_bounds = array<i64: 1, 12, 2, 4, 8>}, {pipeline_mode = #tpu.pipeline_mode<synchronous>, transform_indices = @transform_1, window_bounds = array<i64: 4, 8>}, {transform_indices = @transform_2, window_bounds = array<i64: 1, 4, 12, 8>}, {transform_indices = @transform_3, window_bounds = array<i64: 1, 4, 12, 8>}]} {
    %c0 = arith.constant 0 : index
    %c0_0 = arith.constant 0 : index
    %c0_1 = arith.constant 0 : index
    %c0_2 = arith.constant 0 : index
    %c0_3 = arith.constant 0 : index
    %0 = vector.load %arg2[%c0, %c0_0, %c0_1, %c0_2, %c0_3] : memref<1x12x2x4x8xbf16, #tpu.memory_space<vmem>>, vector<1x12x1x4x8xbf16>
    %1 = vector.shape_cast %0 : vector<1x12x1x4x8xbf16> to vector<12x4x8xbf16>
    %2 = arith.extf %1 : vector<12x4x8xbf16> to vector<12x4x8xf32>
    %3 = arith.mulf %2, %2 : vector<12x4x8xf32>
    %cst = arith.constant dense<0.000000e+00> : vector<12x4xf32>
    %4 = vector.multi_reduction <add>, %3, %cst [2] : vector<12x4x8xf32> to vector<12x4xf32>
    %5 = vector.shape_cast %4 : vector<12x4xf32> to vector<12x4x1xf32>
    %cst_4 = arith.constant 8.000000e+00 : f32
    %6 = vector.broadcast %cst_4 : f32 to vector<12x4x1xf32>
    %7 = arith.divf %5, %6 : vector<12x4x1xf32>
    %cst_5 = arith.constant dense<0.000000e+00> : vector<12x1xf32>
    %8 = vector.multi_reduction <add>, %7, %cst_5 [1] : vector<12x4x1xf32> to vector<12x1xf32>
    %9 = vector.shape_cast %8 : vector<12x1xf32> to vector<12x1x1xf32>
    %cst_6 = arith.constant 4.000000e+00 : f32
    %10 = vector.broadcast %cst_6 : f32 to vector<12x1x1xf32>
    %11 = arith.divf %9, %10 : vector<12x1x1xf32>
    %cst_7 = arith.constant 9.99999997E-7 : f32
    %12 = vector.broadcast %cst_7 : f32 to vector<12x1x1xf32>
    %13 = arith.addf %11, %12 : vector<12x1x1xf32>
    %14 = math.rsqrt %13 : vector<12x1x1xf32>
    %15 = vector.broadcast %14 : vector<12x1x1xf32> to vector<12x4x8xf32>
    %16 = arith.mulf %2, %15 : vector<12x4x8xf32>
    %c0_8 = arith.constant 0 : index
    %c0_9 = arith.constant 0 : index
    %17 = vector.load %arg3[%c0_8, %c0_9] : memref<4x8xf32, #tpu.memory_space<vmem>>, vector<4x8xf32>
    %18 = vector.shape_cast %17 : vector<4x8xf32> to vector<1x4x8xf32>
    %19 = vector.broadcast %18 : vector<1x4x8xf32> to vector<12x4x8xf32>
    %20 = arith.mulf %16, %19 : vector<12x4x8xf32>
    %21 = arith.truncf %20 : vector<12x4x8xf32> to vector<12x4x8xbf16>
    %22 = vector.extract_strided_slice %21 {offsets = [0, 0, 0], sizes = [12, 1, 8], strides = [1, 1, 1]} : vector<12x4x8xbf16> to vector<12x1x8xbf16>
    %23 = vector.shape_cast %22 : vector<12x1x8xbf16> to vector<12x8xbf16>
    %c0_10 = arith.constant 0 : index
    %c0_11 = arith.constant 0 : index
    %c0_12 = arith.constant 0 : index
    %c0_13 = arith.constant 0 : index
    %24 = vector.load %arg4[%c0_10, %c0_11, %c0_12, %c0_13] : memref<1x4x12x8xbf16, #tpu.memory_space<vmem>>, vector<1x1x12x8xbf16>
    %25 = vector.shape_cast %24 : vector<1x1x12x8xbf16> to vector<12x8xbf16>
    %26 = vector.shape_cast %23 : vector<12x8xbf16> to vector<1x1x12x8xbf16>
    tpu.vector_store %arg4[%c0_10, %c0_11, %c0_12, %c0_13], %26 {strides = array<i32>} : memref<1x4x12x8xbf16, #tpu.memory_space<vmem>>, vector<1x1x12x8xbf16>,
    %27 = vector.extract_strided_slice %21 {offsets = [0, 1, 0], sizes = [12, 1, 8], strides = [1, 1, 1]} : vector<12x4x8xbf16> to vector<12x1x8xbf16>
    %28 = vector.shape_cast %27 : vector<12x1x8xbf16> to vector<12x8xbf16>
    %c0_14 = arith.constant 0 : index
    %c1 = arith.constant 1 : index
    %c0_15 = arith.constant 0 : index
    %c0_16 = arith.constant 0 : index
    %29 = vector.load %arg4[%c0_14, %c1, %c0_15, %c0_16] : memref<1x4x12x8xbf16, #tpu.memory_space<vmem>>, vector<1x1x12x8xbf16>
    %30 = vector.shape_cast %29 : vector<1x1x12x8xbf16> to vector<12x8xbf16>
    %31 = vector.shape_cast %28 : vector<12x8xbf16> to vector<1x1x12x8xbf16>
    tpu.vector_store %arg4[%c0_14, %c1, %c0_15, %c0_16], %31 {strides = array<i32>} : memref<1x4x12x8xbf16, #tpu.memory_space<vmem>>, vector<1x1x12x8xbf16>,
    %32 = vector.extract_strided_slice %21 {offsets = [0, 2, 0], sizes = [12, 1, 8], strides = [1, 1, 1]} : vector<12x4x8xbf16> to vector<12x1x8xbf16>
    %33 = vector.shape_cast %32 : vector<12x1x8xbf16> to vector<12x8xbf16>
    %c0_17 = arith.constant 0 : index
    %c2 = arith.constant 2 : index
    %c0_18 = arith.constant 0 : index
    %c0_19 = arith.constant 0 : index
    %34 = vector.load %arg4[%c0_17, %c2, %c0_18, %c0_19] : memref<1x4x12x8xbf16, #tpu.memory_space<vmem>>, vector<1x1x12x8xbf16>
    %35 = vector.shape_cast %34 : vector<1x1x12x8xbf16> to vector<12x8xbf16>
    %36 = vector.shape_cast %33 : vector<12x8xbf16> to vector<1x1x12x8xbf16>
    tpu.vector_store %arg4[%c0_17, %c2, %c0_18, %c0_19], %36 {strides = array<i32>} : memref<1x4x12x8xbf16, #tpu.memory_space<vmem>>, vector<1x1x12x8xbf16>,
    %37 = vector.extract_strided_slice %21 {offsets = [0, 3, 0], sizes = [12, 1, 8], strides = [1, 1, 1]} : vector<12x4x8xbf16> to vector<12x1x8xbf16>
    %38 = vector.shape_cast %37 : vector<12x1x8xbf16> to vector<12x8xbf16>
    %c0_20 = arith.constant 0 : index
    %c3 = arith.constant 3 : index
    %c0_21 = arith.constant 0 : index
    %c0_22 = arith.constant 0 : index
    %39 = vector.load %arg4[%c0_20, %c3, %c0_21, %c0_22] : memref<1x4x12x8xbf16, #tpu.memory_space<vmem>>, vector<1x1x12x8xbf16>
    %40 = vector.shape_cast %39 : vector<1x1x12x8xbf16> to vector<12x8xbf16>
    %41 = vector.shape_cast %38 : vector<12x8xbf16> to vector<1x1x12x8xbf16>
    tpu.vector_store %arg4[%c0_20, %c3, %c0_21, %c0_22], %41 {strides = array<i32>} : memref<1x4x12x8xbf16, #tpu.memory_space<vmem>>, vector<1x1x12x8xbf16>,
    %c0_23 = arith.constant 0 : index
    %c0_24 = arith.constant 0 : index
    %c1_25 = arith.constant 1 : index
    %c0_26 = arith.constant 0 : index
    %c0_27 = arith.constant 0 : index
    %42 = vector.load %arg2[%c0_23, %c0_24, %c1_25, %c0_26, %c0_27] : memref<1x12x2x4x8xbf16, #tpu.memory_space<vmem>>, vector<1x12x1x4x8xbf16>
    %43 = vector.shape_cast %42 : vector<1x12x1x4x8xbf16> to vector<12x4x8xbf16>
    %44 = vector.extract_strided_slice %43 {offsets = [0, 0, 0], sizes = [12, 1, 8], strides = [1, 1, 1]} : vector<12x4x8xbf16> to vector<12x1x8xbf16>
    %45 = vector.shape_cast %44 : vector<12x1x8xbf16> to vector<12x8xbf16>
    %c0_28 = arith.constant 0 : index
    %c0_29 = arith.constant 0 : index
    %c0_30 = arith.constant 0 : index
    %c0_31 = arith.constant 0 : index
    %46 = vector.load %arg5[%c0_28, %c0_29, %c0_30, %c0_31] : memref<1x4x12x8xbf16, #tpu.memory_space<vmem>>, vector<1x1x12x8xbf16>
    %47 = vector.shape_cast %46 : vector<1x1x12x8xbf16> to vector<12x8xbf16>
    %48 = vector.shape_cast %45 : vector<12x8xbf16> to vector<1x1x12x8xbf16>
    tpu.vector_store %arg5[%c0_28, %c0_29, %c0_30, %c0_31], %48 {strides = array<i32>} : memref<1x4x12x8xbf16, #tpu.memory_space<vmem>>, vector<1x1x12x8xbf16>,
    %49 = vector.extract_strided_slice %43 {offsets = [0, 1, 0], sizes = [12, 1, 8], strides = [1, 1, 1]} : vector<12x4x8xbf16> to vector<12x1x8xbf16>
    %50 = vector.shape_cast %49 : vector<12x1x8xbf16> to vector<12x8xbf16>
    %c0_32 = arith.constant 0 : index
    %c1_33 = arith.constant 1 : index
    %c0_34 = arith.constant 0 : index
    %c0_35 = arith.constant 0 : index
    %51 = vector.load %arg5[%c0_32, %c1_33, %c0_34, %c0_35] : memref<1x4x12x8xbf16, #tpu.memory_space<vmem>>, vector<1x1x12x8xbf16>
    %52 = vector.shape_cast %51 : vector<1x1x12x8xbf16> to vector<12x8xbf16>
    %53 = vector.shape_cast %50 : vector<12x8xbf16> to vector<1x1x12x8xbf16>
    tpu.vector_store %arg5[%c0_32, %c1_33, %c0_34, %c0_35], %53 {strides = array<i32>} : memref<1x4x12x8xbf16, #tpu.memory_space<vmem>>, vector<1x1x12x8xbf16>,
    %54 = vector.extract_strided_slice %43 {offsets = [0, 2, 0], sizes = [12, 1, 8], strides = [1, 1, 1]} : vector<12x4x8xbf16> to vector<12x1x8xbf16>
    %55 = vector.shape_cast %54 : vector<12x1x8xbf16> to vector<12x8xbf16>
    %c0_36 = arith.constant 0 : index
    %c2_37 = arith.constant 2 : index
    %c0_38 = arith.constant 0 : index
    %c0_39 = arith.constant 0 : index
    %56 = vector.load %arg5[%c0_36, %c2_37, %c0_38, %c0_39] : memref<1x4x12x8xbf16, #tpu.memory_space<vmem>>, vector<1x1x12x8xbf16>
    %57 = vector.shape_cast %56 : vector<1x1x12x8xbf16> to vector<12x8xbf16>
    %58 = vector.shape_cast %55 : vector<12x8xbf16> to vector<1x1x12x8xbf16>
    tpu.vector_store %arg5[%c0_36, %c2_37, %c0_38, %c0_39], %58 {strides = array<i32>} : memref<1x4x12x8xbf16, #tpu.memory_space<vmem>>, vector<1x1x12x8xbf16>,
    %59 = vector.extract_strided_slice %43 {offsets = [0, 3, 0], sizes = [12, 1, 8], strides = [1, 1, 1]} : vector<12x4x8xbf16> to vector<12x1x8xbf16>
    %60 = vector.shape_cast %59 : vector<12x1x8xbf16> to vector<12x8xbf16>
    %c0_40 = arith.constant 0 : index
    %c3_41 = arith.constant 3 : index
    %c0_42 = arith.constant 0 : index
    %c0_43 = arith.constant 0 : index
    %61 = vector.load %arg5[%c0_40, %c3_41, %c0_42, %c0_43] : memref<1x4x12x8xbf16, #tpu.memory_space<vmem>>, vector<1x1x12x8xbf16>
    %62 = vector.shape_cast %61 : vector<1x1x12x8xbf16> to vector<12x8xbf16>
    %63 = vector.shape_cast %60 : vector<12x8xbf16> to vector<1x1x12x8xbf16>
    tpu.vector_store %arg5[%c0_40, %c3_41, %c0_42, %c0_43], %63 {strides = array<i32>} : memref<1x4x12x8xbf16, #tpu.memory_space<vmem>>, vector<1x1x12x8xbf16>,
    return
  }
  func.func @transform_0(%arg0: i32, %arg1: i32) -> (i32, i32, i32, i32, i32) {
    %c0_i32 = arith.constant 0 : i32
    %c0_i32_0 = arith.constant 0 : i32
    %c0_i32_1 = arith.constant 0 : i32
    %c0_i32_2 = arith.constant 0 : i32
    return %arg0, %arg1, %c0_i32, %c0_i32_0, %c0_i32_1 : i32, i32, i32, i32, i32
  }
  func.func @transform_1(%arg0: i32, %arg1: i32) -> (i32, i32) {
    %c0_i32 = arith.constant 0 : i32
    %c0_i32_0 = arith.constant 0 : i32
    %c0_i32_1 = arith.constant 0 : i32
    return %c0_i32, %c0_i32_0 : i32, i32
  }
  func.func @transform_2(%arg0: i32, %arg1: i32) -> (i32, i32, i32, i32) {
    %c0_i32 = arith.constant 0 : i32
    %c0_i32_0 = arith.constant 0 : i32
    %c0_i32_1 = arith.constant 0 : i32
    return %arg0, %c0_i32, %arg1, %c0_i32_0 : i32, i32, i32, i32
  }
  func.func @transform_3(%arg0: i32, %arg1: i32) -> (i32, i32, i32, i32) {
    %c0_i32 = arith.constant 0 : i32
    %c0_i32_0 = arith.constant 0 : i32
    %c0_i32_1 = arith.constant 0 : i32
    return %arg0, %c0_i32, %arg1, %c0_i32_0 : i32, i32, i32, i32
  }
}

module attributes {stable_mosaic.version = 11 : i64} {
  func.func @kernel(%arg0: i32, %arg1: i32, %arg2: i32, %arg3: i32, %arg4: memref<1x8x32xbf16, #tpu.memory_space<vmem>>, %arg5: memref<32x32xbf16, #tpu.memory_space<vmem>>, %arg6: memref<1x32xf32, #tpu.memory_space<vmem>>, %arg7: memref<1x8x32xbf16, #tpu.memory_space<vmem>>, %arg8: memref<1x8x32xbf16, #tpu.memory_space<vmem>>, %arg9: memref<8x32xf32, #tpu.memory_space<vmem>>) attributes {dimension_semantics = [#tpu.dimension_semantics<parallel>, #tpu.dimension_semantics<parallel>, #tpu.dimension_semantics<parallel>, #tpu.dimension_semantics<arbitrary>], iteration_bounds = array<i64: 2, 1, 1, 1>, scalar_prefetch = 0 : i64, scratch_operands = 1 : i64, tpu.core_type = #tpu.core_type<tc>, window_params = [{transform_indices = @transform_0, window_bounds = array<i64: 1, 8, 32>}, {transform_indices = @transform_1, window_bounds = array<i64: 32, 32>}, {transform_indices = @transform_2, window_bounds = array<i64: 1, 32>}, {transform_indices = @transform_3, window_bounds = array<i64: 1, 8, 32>}, {transform_indices = @transform_4, window_bounds = array<i64: 1, 8, 32>}]} {
    %c0_i32 = arith.constant 0 : i32
    %0 = arith.cmpi eq, %arg3, %c0_i32 : i32
    %1 = arith.extui %0 : i1 to i32
    %c0_i32_0 = arith.constant 0 : i32
    %2 = arith.cmpi ne, %1, %c0_i32_0 : i32
    scf.if %2 {
      %cst_11 = arith.constant 0.000000e+00 : f32
      %13 = vector.broadcast %cst_11 : f32 to vector<8x32xf32>
      %c0_12 = arith.constant 0 : index
      %c0_13 = arith.constant 0 : index
      %14 = vector.load %arg9[%c0_12, %c0_13] : memref<8x32xf32, #tpu.memory_space<vmem>>, vector<8x32xf32>
      tpu.vector_store %arg9[%c0_12, %c0_13], %13 {strides = array<i32>} : memref<8x32xf32, #tpu.memory_space<vmem>>, vector<8x32xf32>,
    } else {
    }
    %c0 = arith.constant 0 : index
    %c0_1 = arith.constant 0 : index
    %c0_2 = arith.constant 0 : index
    %3 = vector.load %arg4[%c0, %c0_1, %c0_2] : memref<1x8x32xbf16, #tpu.memory_space<vmem>>, vector<1x8x32xbf16>
    %4 = vector.shape_cast %3 : vector<1x8x32xbf16> to vector<8x32xbf16>
    %c0_3 = arith.constant 0 : index
    %c0_4 = arith.constant 0 : index
    %5 = vector.load %arg9[%c0_3, %c0_4] : memref<8x32xf32, #tpu.memory_space<vmem>>, vector<8x32xf32>
    %c0_5 = arith.constant 0 : index
    %c0_6 = arith.constant 0 : index
    %6 = vector.load %arg5[%c0_5, %c0_6] : memref<32x32xbf16, #tpu.memory_space<vmem>>, vector<32x32xbf16>
    %cst = arith.constant dense<0.000000e+00> : vector<8x32xf32>
    %7 = tpu.matmul %4, %6, %cst {dimension_numbers = #tpu.dot_dimension_numbers<[1], [0], [0], [1], [0, 0, 1, 1], [], []>} : vector<8x32xbf16>, vector<32x32xbf16>, vector<8x32xf32> -> vector<8x32xf32>
    %8 = arith.addf %5, %7 : vector<8x32xf32>
    %c0_7 = arith.constant 0 : index
    %c0_8 = arith.constant 0 : index
    %9 = vector.load %arg9[%c0_7, %c0_8] : memref<8x32xf32, #tpu.memory_space<vmem>>, vector<8x32xf32>
    tpu.vector_store %arg9[%c0_7, %c0_8], %8 {strides = array<i32>} : memref<8x32xf32, #tpu.memory_space<vmem>>, vector<8x32xf32>,
    %c0_i32_9 = arith.constant 0 : i32
    %10 = arith.cmpi eq, %arg3, %c0_i32_9 : i32
    %11 = arith.extui %10 : i1 to i32
    %c0_i32_10 = arith.constant 0 : i32
    %12 = arith.cmpi ne, %11, %c0_i32_10 : i32
    scf.if %12 {
      %c0_11 = arith.constant 0 : index
      %c0_12 = arith.constant 0 : index
      %13 = vector.load %arg9[%c0_11, %c0_12] : memref<8x32xf32, #tpu.memory_space<vmem>>, vector<8x32xf32>
      %c0_13 = arith.constant 0 : index
      %c0_14 = arith.constant 0 : index
      %14 = vector.load %arg6[%c0_13, %c0_14] : memref<1x32xf32, #tpu.memory_space<vmem>>, vector<1x32xf32>
      %15 = vector.broadcast %14 : vector<1x32xf32> to vector<8x32xf32>
      %16 = arith.addf %13, %15 : vector<8x32xf32>
      %c0_15 = arith.constant 0 : index
      %c0_16 = arith.constant 0 : index
      %c0_17 = arith.constant 0 : index
      %17 = vector.load %arg7[%c0_15, %c0_16, %c0_17] : memref<1x8x32xbf16, #tpu.memory_space<vmem>>, vector<1x8x32xbf16>
      %18 = vector.shape_cast %17 : vector<1x8x32xbf16> to vector<8x32xbf16>
      %19 = arith.extf %18 : vector<8x32xbf16> to vector<8x32xf32>
      %20 = arith.addf %19, %16 : vector<8x32xf32>
      %21 = arith.truncf %20 : vector<8x32xf32> to vector<8x32xbf16>
      %c0_18 = arith.constant 0 : index
      %c0_19 = arith.constant 0 : index
      %c0_20 = arith.constant 0 : index
      %22 = vector.load %arg8[%c0_18, %c0_19, %c0_20] : memref<1x8x32xbf16, #tpu.memory_space<vmem>>, vector<1x8x32xbf16>
      %23 = vector.shape_cast %22 : vector<1x8x32xbf16> to vector<8x32xbf16>
      %24 = vector.shape_cast %21 : vector<8x32xbf16> to vector<1x8x32xbf16>
      tpu.vector_store %arg8[%c0_18, %c0_19, %c0_20], %24 {strides = array<i32>} : memref<1x8x32xbf16, #tpu.memory_space<vmem>>, vector<1x8x32xbf16>,
    } else {
    }
    return
  }
  func.func @transform_0(%arg0: i32, %arg1: i32, %arg2: i32, %arg3: i32) -> (i32, i32, i32) {
    %c0_i32 = arith.constant 0 : i32
    return %arg0, %arg1, %arg3 : i32, i32, i32
  }
  func.func @transform_1(%arg0: i32, %arg1: i32, %arg2: i32, %arg3: i32) -> (i32, i32) {
    %c0_i32 = arith.constant 0 : i32
    return %arg3, %arg2 : i32, i32
  }
  func.func @transform_2(%arg0: i32, %arg1: i32, %arg2: i32, %arg3: i32) -> (i32, i32) {
    %c0_i32 = arith.constant 0 : i32
    %c0_i32_0 = arith.constant 0 : i32
    return %c0_i32, %arg2 : i32, i32
  }
  func.func @transform_3(%arg0: i32, %arg1: i32, %arg2: i32, %arg3: i32) -> (i32, i32, i32) {
    %c0_i32 = arith.constant 0 : i32
    return %arg0, %arg1, %arg2 : i32, i32, i32
  }
  func.func @transform_4(%arg0: i32, %arg1: i32, %arg2: i32, %arg3: i32) -> (i32, i32, i32) {
    %c0_i32 = arith.constant 0 : i32
    return %arg0, %arg1, %arg2 : i32, i32, i32
  }
}

module attributes {stable_mosaic.version = 11 : i64} {
  func.func @kernel(%arg0: i32, %arg1: i32, %arg2: i32, %arg3: i32, %arg4: memref<1x8x32xbf16, #tpu.memory_space<vmem>>, %arg5: memref<32x64xbf16, #tpu.memory_space<vmem>>, %arg6: memref<1x64xf32, #tpu.memory_space<vmem>>, %arg7: memref<1x1x32xf32, #tpu.memory_space<vmem>>, %arg8: memref<1x1x32xf32, #tpu.memory_space<vmem>>, %arg9: memref<1x8x64xbf16, #tpu.memory_space<vmem>>, %arg10: memref<8x64xf32, #tpu.memory_space<vmem>>) attributes {dimension_semantics = [#tpu.dimension_semantics<parallel>, #tpu.dimension_semantics<parallel>, #tpu.dimension_semantics<parallel>, #tpu.dimension_semantics<arbitrary>], iteration_bounds = array<i64: 2, 1, 1, 1>, scalar_prefetch = 0 : i64, scratch_operands = 1 : i64, tpu.core_type = #tpu.core_type<tc>, window_params = [{transform_indices = @transform_0, window_bounds = array<i64: 1, 8, 32>}, {transform_indices = @transform_1, window_bounds = array<i64: 32, 64>}, {transform_indices = @transform_2, window_bounds = array<i64: 1, 64>}, {transform_indices = @transform_3, window_bounds = array<i64: 1, 1, 32>}, {transform_indices = @transform_4, window_bounds = array<i64: 1, 1, 32>}, {transform_indices = @transform_5, window_bounds = array<i64: 1, 8, 64>}]} {
    %c0_i32 = arith.constant 0 : i32
    %0 = arith.cmpi eq, %arg3, %c0_i32 : i32
    %1 = arith.extui %0 : i1 to i32
    %c0_i32_0 = arith.constant 0 : i32
    %2 = arith.cmpi ne, %1, %c0_i32_0 : i32
    scf.if %2 {
      %cst_23 = arith.constant 0.000000e+00 : f32
      %41 = vector.broadcast %cst_23 : f32 to vector<8x64xf32>
      %c0_24 = arith.constant 0 : index
      %c0_25 = arith.constant 0 : index
      %42 = vector.load %arg10[%c0_24, %c0_25] : memref<8x64xf32, #tpu.memory_space<vmem>>, vector<8x64xf32>
      tpu.vector_store %arg10[%c0_24, %c0_25], %41 {strides = array<i32>} : memref<8x64xf32, #tpu.memory_space<vmem>>, vector<8x64xf32>,
    } else {
    }
    %c0 = arith.constant 0 : index
    %c0_1 = arith.constant 0 : index
    %c0_2 = arith.constant 0 : index
    %3 = vector.load %arg4[%c0, %c0_1, %c0_2] : memref<1x8x32xbf16, #tpu.memory_space<vmem>>, vector<1x8x32xbf16>
    %4 = vector.shape_cast %3 : vector<1x8x32xbf16> to vector<8x32xbf16>
    %5 = arith.extf %4 : vector<8x32xbf16> to vector<8x32xf32>
    %cst = arith.constant dense<0.000000e+00> : vector<8xf32>
    %6 = vector.multi_reduction <add>, %5, %cst [1] : vector<8x32xf32> to vector<8xf32>
    %7 = vector.shape_cast %6 : vector<8xf32> to vector<8x1xf32>
    %cst_3 = arith.constant 3.200000e+01 : f32
    %8 = vector.broadcast %cst_3 : f32 to vector<8x1xf32>
    %9 = arith.divf %7, %8 : vector<8x1xf32>
    %10 = vector.broadcast %9 : vector<8x1xf32> to vector<8x32xf32>
    %11 = arith.subf %5, %10 : vector<8x32xf32>
    %12 = arith.mulf %11, %11 : vector<8x32xf32>
    %cst_4 = arith.constant dense<0.000000e+00> : vector<8xf32>
    %13 = vector.multi_reduction <add>, %12, %cst_4 [1] : vector<8x32xf32> to vector<8xf32>
    %14 = vector.shape_cast %13 : vector<8xf32> to vector<8x1xf32>
    %cst_5 = arith.constant 3.200000e+01 : f32
    %15 = vector.broadcast %cst_5 : f32 to vector<8x1xf32>
    %16 = arith.divf %14, %15 : vector<8x1xf32>
    %cst_6 = arith.constant 9.99999997E-7 : f32
    %17 = vector.broadcast %cst_6 : f32 to vector<8x1xf32>
    %18 = arith.addf %16, %17 : vector<8x1xf32>
    %19 = math.rsqrt %18 : vector<8x1xf32>
    %20 = vector.broadcast %19 : vector<8x1xf32> to vector<8x32xf32>
    %21 = arith.mulf %11, %20 : vector<8x32xf32>
    %c0_7 = arith.constant 0 : index
    %c0_8 = arith.constant 0 : index
    %c0_9 = arith.constant 0 : index
    %22 = vector.load %arg8[%c0_7, %c0_8, %c0_9] : memref<1x1x32xf32, #tpu.memory_space<vmem>>, vector<1x1x32xf32>
    %23 = vector.shape_cast %22 : vector<1x1x32xf32> to vector<1x32xf32>
    %cst_10 = arith.constant 1.000000e+00 : f32
    %24 = vector.broadcast %cst_10 : f32 to vector<1x32xf32>
    %25 = arith.addf %24, %23 : vector<1x32xf32>
    %26 = vector.broadcast %25 : vector<1x32xf32> to vector<8x32xf32>
    %27 = arith.mulf %21, %26 : vector<8x32xf32>
    %c0_11 = arith.constant 0 : index
    %c0_12 = arith.constant 0 : index
    %c0_13 = arith.constant 0 : index
    %28 = vector.load %arg7[%c0_11, %c0_12, %c0_13] : memref<1x1x32xf32, #tpu.memory_space<vmem>>, vector<1x1x32xf32>
    %29 = vector.shape_cast %28 : vector<1x1x32xf32> to vector<1x32xf32>
    %30 = vector.broadcast %29 : vector<1x32xf32> to vector<8x32xf32>
    %31 = arith.addf %27, %30 : vector<8x32xf32>
    %32 = arith.truncf %31 : vector<8x32xf32> to vector<8x32xbf16>
    %c0_14 = arith.constant 0 : index
    %c0_15 = arith.constant 0 : index
    %33 = vector.load %arg10[%c0_14, %c0_15] : memref<8x64xf32, #tpu.memory_space<vmem>>, vector<8x64xf32>
    %c0_16 = arith.constant 0 : index
    %c0_17 = arith.constant 0 : index
    %34 = vector.load %arg5[%c0_16, %c0_17] : memref<32x64xbf16, #tpu.memory_space<vmem>>, vector<32x64xbf16>
    %cst_18 = arith.constant dense<0.000000e+00> : vector<8x64xf32>
    %35 = tpu.matmul %32, %34, %cst_18 {dimension_numbers = #tpu.dot_dimension_numbers<[1], [0], [0], [1], [0, 0, 1, 1], [], []>} : vector<8x32xbf16>, vector<32x64xbf16>, vector<8x64xf32> -> vector<8x64xf32>
    %36 = arith.addf %33, %35 : vector<8x64xf32>
    %c0_19 = arith.constant 0 : index
    %c0_20 = arith.constant 0 : index
    %37 = vector.load %arg10[%c0_19, %c0_20] : memref<8x64xf32, #tpu.memory_space<vmem>>, vector<8x64xf32>
    tpu.vector_store %arg10[%c0_19, %c0_20], %36 {strides = array<i32>} : memref<8x64xf32, #tpu.memory_space<vmem>>, vector<8x64xf32>,
    %c0_i32_21 = arith.constant 0 : i32
    %38 = arith.cmpi eq, %arg3, %c0_i32_21 : i32
    %39 = arith.extui %38 : i1 to i32
    %c0_i32_22 = arith.constant 0 : i32
    %40 = arith.cmpi ne, %39, %c0_i32_22 : i32
    scf.if %40 {
      %c0_23 = arith.constant 0 : index
      %c0_24 = arith.constant 0 : index
      %41 = vector.load %arg10[%c0_23, %c0_24] : memref<8x64xf32, #tpu.memory_space<vmem>>, vector<8x64xf32>
      %c0_25 = arith.constant 0 : index
      %c0_26 = arith.constant 0 : index
      %42 = vector.load %arg6[%c0_25, %c0_26] : memref<1x64xf32, #tpu.memory_space<vmem>>, vector<1x64xf32>
      %43 = vector.broadcast %42 : vector<1x64xf32> to vector<8x64xf32>
      %44 = arith.addf %41, %43 : vector<8x64xf32>
      %cst_27 = arith.constant 5.000000e-01 : f32
      %45 = vector.broadcast %cst_27 : f32 to vector<8x64xf32>
      %46 = arith.mulf %45, %44 : vector<8x64xf32>
      %cst_28 = arith.constant 4.471500e-02 : f32
      %47 = vector.broadcast %cst_28 : f32 to vector<8x64xf32>
      %48 = arith.mulf %47, %44 : vector<8x64xf32>
      %49 = arith.mulf %48, %44 : vector<8x64xf32>
      %50 = arith.mulf %49, %44 : vector<8x64xf32>
      %51 = arith.addf %44, %50 : vector<8x64xf32>
      %cst_29 = arith.constant 0.797884583 : f32
      %52 = vector.broadcast %cst_29 : f32 to vector<8x64xf32>
      %53 = arith.mulf %52, %51 : vector<8x64xf32>
      %54 = math.tanh %53 : vector<8x64xf32>
      %cst_30 = arith.constant 1.000000e+00 : f32
      %55 = vector.broadcast %cst_30 : f32 to vector<8x64xf32>
      %56 = arith.addf %55, %54 : vector<8x64xf32>
      %57 = arith.mulf %46, %56 : vector<8x64xf32>
      %58 = arith.truncf %57 : vector<8x64xf32> to vector<8x64xbf16>
      %c0_31 = arith.constant 0 : index
      %c0_32 = arith.constant 0 : index
      %c0_33 = arith.constant 0 : index
      %59 = vector.load %arg9[%c0_31, %c0_32, %c0_33] : memref<1x8x64xbf16, #tpu.memory_space<vmem>>, vector<1x8x64xbf16>
      %60 = vector.shape_cast %59 : vector<1x8x64xbf16> to vector<8x64xbf16>
      %61 = vector.shape_cast %58 : vector<8x64xbf16> to vector<1x8x64xbf16>
      tpu.vector_store %arg9[%c0_31, %c0_32, %c0_33], %61 {strides = array<i32>} : memref<1x8x64xbf16, #tpu.memory_space<vmem>>, vector<1x8x64xbf16>,
    } else {
    }
    return
  }
  func.func @transform_0(%arg0: i32, %arg1: i32, %arg2: i32, %arg3: i32) -> (i32, i32, i32) {
    %c0_i32 = arith.constant 0 : i32
    return %arg0, %arg1, %arg3 : i32, i32, i32
  }
  func.func @transform_1(%arg0: i32, %arg1: i32, %arg2: i32, %arg3: i32) -> (i32, i32) {
    %c0_i32 = arith.constant 0 : i32
    return %arg3, %arg2 : i32, i32
  }
  func.func @transform_2(%arg0: i32, %arg1: i32, %arg2: i32, %arg3: i32) -> (i32, i32) {
    %c0_i32 = arith.constant 0 : i32
    %c0_i32_0 = arith.constant 0 : i32
    return %c0_i32, %arg2 : i32, i32
  }
  func.func @transform_3(%arg0: i32, %arg1: i32, %arg2: i32, %arg3: i32) -> (i32, i32, i32) {
    %c0_i32 = arith.constant 0 : i32
    %c0_i32_0 = arith.constant 0 : i32
    %c0_i32_1 = arith.constant 0 : i32
    return %arg0, %c0_i32, %c0_i32_0 : i32, i32, i32
  }
  func.func @transform_4(%arg0: i32, %arg1: i32, %arg2: i32, %arg3: i32) -> (i32, i32, i32) {
    %c0_i32 = arith.constant 0 : i32
    %c0_i32_0 = arith.constant 0 : i32
    %c0_i32_1 = arith.constant 0 : i32
    return %arg0, %c0_i32, %c0_i32_0 : i32, i32, i32
  }
  func.func @transform_5(%arg0: i32, %arg1: i32, %arg2: i32, %arg3: i32) -> (i32, i32, i32) {
    %c0_i32 = arith.constant 0 : i32
    return %arg0, %arg1, %arg2 : i32, i32, i32
  }
}

module attributes {stable_mosaic.version = 11 : i64} {
  func.func @_flash_attn_kernel(%arg0: i32, %arg1: i32, %arg2: i32, %arg3: i32, %arg4: memref<1x1x8x8xbf16, #tpu.memory_space<vmem>>, %arg5: memref<1x1x12x8xbf16, #tpu.memory_space<vmem>>, %arg6: memref<1x1x12x8xbf16, #tpu.memory_space<vmem>>, %arg7: memref<1x1x8x8xbf16, #tpu.memory_space<vmem>>, %arg8: memref<8x1xf32, #tpu.memory_space<vmem>>, %arg9: memref<8x1xf32, #tpu.memory_space<vmem>>, %arg10: memref<8x8xf32, #tpu.memory_space<vmem>>) attributes {dimension_semantics = [#tpu.dimension_semantics<parallel>, #tpu.dimension_semantics<parallel>, #tpu.dimension_semantics<parallel>, #tpu.dimension_semantics<arbitrary>], iteration_bounds = array<i64: 2, 4, 1, 1>, scalar_prefetch = 0 : i64, scratch_operands = 3 : i64, tpu.core_type = #tpu.core_type<tc>, window_params = [{transform_indices = @transform_0, window_bounds = array<i64: 1, 1, 8, 8>}, {transform_indices = @transform_1, window_bounds = array<i64: 1, 1, 12, 8>}, {transform_indices = @transform_2, window_bounds = array<i64: 1, 1, 12, 8>}, {transform_indices = @transform_3, window_bounds = array<i64: 1, 1, 8, 8>}]} {
    %c0_i32 = arith.constant 0 : i32
    %0 = arith.cmpi eq, %arg3, %c0_i32 : i32
    %1 = arith.extui %0 : i1 to i32
    %c0_i32_0 = arith.constant 0 : i32
    %2 = arith.cmpi ne, %1, %c0_i32_0 : i32
    scf.if %2 {
      %cst_29 = arith.constant 0xFF800000 : f32
      %36 = vector.broadcast %cst_29 : f32 to vector<8x1xf32>
      %c0_30 = arith.constant 0 : index
      %c0_31 = arith.constant 0 : index
      %37 = vector.load %arg8[%c0_30, %c0_31] : memref<8x1xf32, #tpu.memory_space<vmem>>, vector<8x1xf32>
      tpu.vector_store %arg8[%c0_30, %c0_31], %36 {strides = array<i32>} : memref<8x1xf32, #tpu.memory_space<vmem>>, vector<8x1xf32>,
      %cst_32 = arith.constant 0.000000e+00 : f32
      %38 = vector.broadcast %cst_32 : f32 to vector<8x1xf32>
      %c0_33 = arith.constant 0 : index
      %c0_34 = arith.constant 0 : index
      %39 = vector.load %arg9[%c0_33, %c0_34] : memref<8x1xf32, #tpu.memory_space<vmem>>, vector<8x1xf32>
      tpu.vector_store %arg9[%c0_33, %c0_34], %38 {strides = array<i32>} : memref<8x1xf32, #tpu.memory_space<vmem>>, vector<8x1xf32>,
      %cst_35 = arith.constant 0.000000e+00 : f32
      %40 = vector.broadcast %cst_35 : f32 to vector<8x8xf32>
      %c0_36 = arith.constant 0 : index
      %c0_37 = arith.constant 0 : index
      %41 = vector.load %arg10[%c0_36, %c0_37] : memref<8x8xf32, #tpu.memory_space<vmem>>, vector<8x8xf32>
      tpu.vector_store %arg10[%c0_36, %c0_37], %40 {strides = array<i32>} : memref<8x8xf32, #tpu.memory_space<vmem>>, vector<8x8xf32>,
    } else {
    }
    %c0 = arith.constant 0 : index
    %c0_1 = arith.constant 0 : index
    %c0_2 = arith.constant 0 : index
    %c0_3 = arith.constant 0 : index
    %3 = vector.load %arg4[%c0, %c0_1, %c0_2, %c0_3] : memref<1x1x8x8xbf16, #tpu.memory_space<vmem>>, vector<1x1x8x8xbf16>
    %4 = vector.shape_cast %3 : vector<1x1x8x8xbf16> to vector<8x8xbf16>
    %c0_4 = arith.constant 0 : index
    %c0_5 = arith.constant 0 : index
    %c0_6 = arith.constant 0 : index
    %c0_7 = arith.constant 0 : index
    %5 = vector.load %arg5[%c0_4, %c0_5, %c0_6, %c0_7] : memref<1x1x12x8xbf16, #tpu.memory_space<vmem>>, vector<1x1x12x8xbf16>
    %6 = vector.shape_cast %5 : vector<1x1x12x8xbf16> to vector<12x8xbf16>
    %cst = arith.constant dense<0.000000e+00> : vector<8x12xf32>
    %7 = tpu.matmul %4, %6, %cst {dimension_numbers = #tpu.dot_dimension_numbers<[1], [1], [0], [0], [0, 0, 1, 0], [], []>} : vector<8x8xbf16>, vector<12x8xbf16>, vector<8x12xf32> -> vector<8x12xf32>
    %c0_8 = arith.constant 0 : index
    %c0_9 = arith.constant 0 : index
    %8 = vector.load %arg8[%c0_8, %c0_9] : memref<8x1xf32, #tpu.memory_space<vmem>>, vector<8x1xf32>
    %cst_10 = arith.constant dense<0xFF800000> : vector<8xf32>
    %9 = vector.multi_reduction <maximumf>, %7, %cst_10 [1] : vector<8x12xf32> to vector<8xf32>
    %10 = vector.shape_cast %9 : vector<8xf32> to vector<8x1xf32>
    %11 = arith.maximumf %8, %10 : vector<8x1xf32>
    %12 = arith.subf %8, %11 : vector<8x1xf32>
    %13 = math.exp %12 : vector<8x1xf32>
    %14 = vector.broadcast %11 : vector<8x1xf32> to vector<8x12xf32>
    %15 = arith.subf %7, %14 : vector<8x12xf32>
    %16 = math.exp %15 : vector<8x12xf32>
    %c0_11 = arith.constant 0 : index
    %c0_12 = arith.constant 0 : index
    %17 = vector.load %arg9[%c0_11, %c0_12] : memref<8x1xf32, #tpu.memory_space<vmem>>, vector<8x1xf32>
    %18 = arith.mulf %13, %17 : vector<8x1xf32>
    %cst_13 = arith.constant dense<0.000000e+00> : vector<8xf32>
    %19 = vector.multi_reduction <add>, %16, %cst_13 [1] : vector<8x12xf32> to vector<8xf32>
    %20 = vector.shape_cast %19 : vector<8xf32> to vector<8x1xf32>
    %21 = arith.addf %18, %20 : vector<8x1xf32>
    %c0_14 = arith.constant 0 : index
    %c0_15 = arith.constant 0 : index
    %22 = vector.load %arg9[%c0_14, %c0_15] : memref<8x1xf32, #tpu.memory_space<vmem>>, vector<8x1xf32>
    tpu.vector_store %arg9[%c0_14, %c0_15], %21 {strides = array<i32>} : memref<8x1xf32, #tpu.memory_space<vmem>>, vector<8x1xf32>,
    %c0_16 = arith.constant 0 : index
    %c0_17 = arith.constant 0 : index
    %23 = vector.load %arg10[%c0_16, %c0_17] : memref<8x8xf32, #tpu.memory_space<vmem>>, vector<8x8xf32>
    %24 = vector.broadcast %13 : vector<8x1xf32> to vector<8x8xf32>
    %25 = arith.mulf %24, %23 : vector<8x8xf32>
    %26 = arith.truncf %16 : vector<8x12xf32> to vector<8x12xbf16>
    %c0_18 = arith.constant 0 : index
    %c0_19 = arith.constant 0 : index
    %c0_20 = arith.constant 0 : index
    %c0_21 = arith.constant 0 : index
    %27 = vector.load %arg6[%c0_18, %c0_19, %c0_20, %c0_21] : memref<1x1x12x8xbf16, #tpu.memory_space<vmem>>, vector<1x1x12x8xbf16>
    %28 = vector.shape_cast %27 : vector<1x1x12x8xbf16> to vector<12x8xbf16>
    %cst_22 = arith.constant dense<0.000000e+00> : vector<8x8xf32>
    %29 = tpu.matmul %26, %28, %cst_22 {dimension_numbers = #tpu.dot_dimension_numbers<[1], [0], [0], [1], [0, 0, 1, 1], [], []>} : vector<8x12xbf16>, vector<12x8xbf16>, vector<8x8xf32> -> vector<8x8xf32>
    %30 = arith.addf %25, %29 : vector<8x8xf32>
    %c0_23 = arith.constant 0 : index
    %c0_24 = arith.constant 0 : index
    %31 = vector.load %arg10[%c0_23, %c0_24] : memref<8x8xf32, #tpu.memory_space<vmem>>, vector<8x8xf32>
    tpu.vector_store %arg10[%c0_23, %c0_24], %30 {strides = array<i32>} : memref<8x8xf32, #tpu.memory_space<vmem>>, vector<8x8xf32>,
    %c0_25 = arith.constant 0 : index
    %c0_26 = arith.constant 0 : index
    %32 = vector.load %arg8[%c0_25, %c0_26] : memref<8x1xf32, #tpu.memory_space<vmem>>, vector<8x1xf32>
    tpu.vector_store %arg8[%c0_25, %c0_26], %11 {strides = array<i32>} : memref<8x1xf32, #tpu.memory_space<vmem>>, vector<8x1xf32>,
    %c0_i32_27 = arith.constant 0 : i32
    %33 = arith.cmpi eq, %arg3, %c0_i32_27 : i32
    %34 = arith.extui %33 : i1 to i32
    %c0_i32_28 = arith.constant 0 : i32
    %35 = arith.cmpi ne, %34, %c0_i32_28 : i32
    scf.if %35 {
      %c0_29 = arith.constant 0 : index
      %c0_30 = arith.constant 0 : index
      %36 = vector.load %arg10[%c0_29, %c0_30] : memref<8x8xf32, #tpu.memory_space<vmem>>, vector<8x8xf32>
      %c0_31 = arith.constant 0 : index
      %c0_32 = arith.constant 0 : index
      %37 = vector.load %arg9[%c0_31, %c0_32] : memref<8x1xf32, #tpu.memory_space<vmem>>, vector<8x1xf32>
      %38 = vector.broadcast %37 : vector<8x1xf32> to vector<8x8xf32>
      %39 = arith.divf %36, %38 : vector<8x8xf32>
      %40 = arith.truncf %39 : vector<8x8xf32> to vector<8x8xbf16>
      %c0_33 = arith.constant 0 : index
      %c0_34 = arith.constant 0 : index
      %c0_35 = arith.constant 0 : index
      %c0_36 = arith.constant 0 : index
      %41 = vector.load %arg7[%c0_33, %c0_34, %c0_35, %c0_36] : memref<1x1x8x8xbf16, #tpu.memory_space<vmem>>, vector<1x1x8x8xbf16>
      %42 = vector.shape_cast %41 : vector<1x1x8x8xbf16> to vector<8x8xbf16>
      %43 = vector.shape_cast %40 : vector<8x8xbf16> to vector<1x1x8x8xbf16>
      tpu.vector_store %arg7[%c0_33, %c0_34, %c0_35, %c0_36], %43 {strides = array<i32>} : memref<1x1x8x8xbf16, #tpu.memory_space<vmem>>, vector<1x1x8x8xbf16>,
    } else {
    }
    return
  }
  func.func @transform_0(%arg0: i32, %arg1: i32, %arg2: i32, %arg3: i32) -> (i32, i32, i32, i32) {
    %c0_i32 = arith.constant 0 : i32
    %c0_i32_0 = arith.constant 0 : i32
    return %arg0, %arg1, %arg2, %c0_i32 : i32, i32, i32, i32
  }
  func.func @transform_1(%arg0: i32, %arg1: i32, %arg2: i32, %arg3: i32) -> (i32, i32, i32, i32) {
    %c0_i32 = arith.constant 0 : i32
    %c0_i32_0 = arith.constant 0 : i32
    return %arg0, %arg1, %arg3, %c0_i32 : i32, i32, i32, i32
  }
  func.func @transform_2(%arg0: i32, %arg1: i32, %arg2: i32, %arg3: i32) -> (i32, i32, i32, i32) {
    %c0_i32 = arith.constant 0 : i32
    %c0_i32_0 = arith.constant 0 : i32
    return %arg0, %arg1, %arg3, %c0_i32 : i32, i32, i32, i32
  }
  func.func @transform_3(%arg0: i32, %arg1: i32, %arg2: i32, %arg3: i32) -> (i32, i32, i32, i32) {
    %c0_i32 = arith.constant 0 : i32
    %c0_i32_0 = arith.constant 0 : i32
    return %arg0, %arg1, %arg2, %c0_i32 : i32, i32, i32, i32
  }
}

module attributes {stable_mosaic.version = 11 : i64} {
  func.func @kernel(%arg0: i32, %arg1: i32, %arg2: i32, %arg3: i32, %arg4: memref<1x8x64xbf16, #tpu.memory_space<vmem>>, %arg5: memref<64x32xbf16, #tpu.memory_space<vmem>>, %arg6: memref<1x32xf32, #tpu.memory_space<vmem>>, %arg7: memref<1x8x32xbf16, #tpu.memory_space<vmem>>, %arg8: memref<1x1x32xf32, #tpu.memory_space<vmem>>, %arg9: memref<1x8x32xbf16, #tpu.memory_space<vmem>>, %arg10: memref<8x32xf32, #tpu.memory_space<vmem>>) attributes {dimension_semantics = [#tpu.dimension_semantics<parallel>, #tpu.dimension_semantics<parallel>, #tpu.dimension_semantics<parallel>, #tpu.dimension_semantics<arbitrary>], iteration_bounds = array<i64: 2, 1, 1, 1>, scalar_prefetch = 0 : i64, scratch_operands = 1 : i64, tpu.core_type = #tpu.core_type<tc>, window_params = [{transform_indices = @transform_0, window_bounds = array<i64: 1, 8, 64>}, {transform_indices = @transform_1, window_bounds = array<i64: 64, 32>}, {transform_indices = @transform_2, window_bounds = array<i64: 1, 32>}, {transform_indices = @transform_3, window_bounds = array<i64: 1, 8, 32>}, {transform_indices = @transform_4, window_bounds = array<i64: 1, 1, 32>}, {transform_indices = @transform_5, window_bounds = array<i64: 1, 8, 32>}]} {
    %c0_i32 = arith.constant 0 : i32
    %0 = arith.cmpi eq, %arg3, %c0_i32 : i32
    %1 = arith.extui %0 : i1 to i32
    %c0_i32_0 = arith.constant 0 : i32
    %2 = arith.cmpi ne, %1, %c0_i32_0 : i32
    scf.if %2 {
      %cst_11 = arith.constant 0.000000e+00 : f32
      %13 = vector.broadcast %cst_11 : f32 to vector<8x32xf32>
      %c0_12 = arith.constant 0 : index
      %c0_13 = arith.constant 0 : index
      %14 = vector.load %arg10[%c0_12, %c0_13] : memref<8x32xf32, #tpu.memory_space<vmem>>, vector<8x32xf32>
      tpu.vector_store %arg10[%c0_12, %c0_13], %13 {strides = array<i32>} : memref<8x32xf32, #tpu.memory_space<vmem>>, vector<8x32xf32>,
    } else {
    }
    %c0 = arith.constant 0 : index
    %c0_1 = arith.constant 0 : index
    %c0_2 = arith.constant 0 : index
    %3 = vector.load %arg4[%c0, %c0_1, %c0_2] : memref<1x8x64xbf16, #tpu.memory_space<vmem>>, vector<1x8x64xbf16>
    %4 = vector.shape_cast %3 : vector<1x8x64xbf16> to vector<8x64xbf16>
    %c0_3 = arith.constant 0 : index
    %c0_4 = arith.constant 0 : index
    %5 = vector.load %arg10[%c0_3, %c0_4] : memref<8x32xf32, #tpu.memory_space<vmem>>, vector<8x32xf32>
    %c0_5 = arith.constant 0 : index
    %c0_6 = arith.constant 0 : index
    %6 = vector.load %arg5[%c0_5, %c0_6] : memref<64x32xbf16, #tpu.memory_space<vmem>>, vector<64x32xbf16>
    %cst = arith.constant dense<0.000000e+00> : vector<8x32xf32>
    %7 = tpu.matmul %4, %6, %cst {dimension_numbers = #tpu.dot_dimension_numbers<[1], [0], [0], [1], [0, 0, 1, 1], [], []>} : vector<8x64xbf16>, vector<64x32xbf16>, vector<8x32xf32> -> vector<8x32xf32>
    %8 = arith.addf %5, %7 : vector<8x32xf32>
    %c0_7 = arith.constant 0 : index
    %c0_8 = arith.constant 0 : index
    %9 = vector.load %arg10[%c0_7, %c0_8] : memref<8x32xf32, #tpu.memory_space<vmem>>, vector<8x32xf32>
    tpu.vector_store %arg10[%c0_7, %c0_8], %8 {strides = array<i32>} : memref<8x32xf32, #tpu.memory_space<vmem>>, vector<8x32xf32>,
    %c0_i32_9 = arith.constant 0 : i32
    %10 = arith.cmpi eq, %arg3, %c0_i32_9 : i32
    %11 = arith.extui %10 : i1 to i32
    %c0_i32_10 = arith.constant 0 : i32
    %12 = arith.cmpi ne, %11, %c0_i32_10 : i32
    scf.if %12 {
      %c0_11 = arith.constant 0 : index
      %c0_12 = arith.constant 0 : index
      %13 = vector.load %arg10[%c0_11, %c0_12] : memref<8x32xf32, #tpu.memory_space<vmem>>, vector<8x32xf32>
      %c0_13 = arith.constant 0 : index
      %c0_14 = arith.constant 0 : index
      %14 = vector.load %arg6[%c0_13, %c0_14] : memref<1x32xf32, #tpu.memory_space<vmem>>, vector<1x32xf32>
      %15 = vector.broadcast %14 : vector<1x32xf32> to vector<8x32xf32>
      %16 = arith.addf %13, %15 : vector<8x32xf32>
      %c0_15 = arith.constant 0 : index
      %c0_16 = arith.constant 0 : index
      %c0_17 = arith.constant 0 : index
      %17 = vector.load %arg7[%c0_15, %c0_16, %c0_17] : memref<1x8x32xbf16, #tpu.memory_space<vmem>>, vector<1x8x32xbf16>
      %18 = vector.shape_cast %17 : vector<1x8x32xbf16> to vector<8x32xbf16>
      %19 = arith.extf %18 : vector<8x32xbf16> to vector<8x32xf32>
      %c0_18 = arith.constant 0 : index
      %c0_19 = arith.constant 0 : index
      %c0_20 = arith.constant 0 : index
      %20 = vector.load %arg8[%c0_18, %c0_19, %c0_20] : memref<1x1x32xf32, #tpu.memory_space<vmem>>, vector<1x1x32xf32>
      %21 = vector.shape_cast %20 : vector<1x1x32xf32> to vector<1x32xf32>
      %22 = vector.broadcast %21 : vector<1x32xf32> to vector<8x32xf32>
      %23 = arith.mulf %16, %22 : vector<8x32xf32>
      %24 = arith.addf %19, %23 : vector<8x32xf32>
      %25 = arith.truncf %24 : vector<8x32xf32> to vector<8x32xbf16>
      %c0_21 = arith.constant 0 : index
      %c0_22 = arith.constant 0 : index
      %c0_23 = arith.constant 0 : index
      %26 = vector.load %arg9[%c0_21, %c0_22, %c0_23] : memref<1x8x32xbf16, #tpu.memory_space<vmem>>, vector<1x8x32xbf16>
      %27 = vector.shape_cast %26 : vector<1x8x32xbf16> to vector<8x32xbf16>
      %28 = vector.shape_cast %25 : vector<8x32xbf16> to vector<1x8x32xbf16>
      tpu.vector_store %arg9[%c0_21, %c0_22, %c0_23], %28 {strides = array<i32>} : memref<1x8x32xbf16, #tpu.memory_space<vmem>>, vector<1x8x32xbf16>,
    } else {
    }
    return
  }
  func.func @transform_0(%arg0: i32, %arg1: i32, %arg2: i32, %arg3: i32) -> (i32, i32, i32) {
    %c0_i32 = arith.constant 0 : i32
    return %arg0, %arg1, %arg3 : i32, i32, i32
  }
  func.func @transform_1(%arg0: i32, %arg1: i32, %arg2: i32, %arg3: i32) -> (i32, i32) {
    %c0_i32 = arith.constant 0 : i32
    return %arg3, %arg2 : i32, i32
  }
  func.func @transform_2(%arg0: i32, %arg1: i32, %arg2: i32, %arg3: i32) -> (i32, i32) {
    %c0_i32 = arith.constant 0 : i32
    %c0_i32_0 = arith.constant 0 : i32
    return %c0_i32, %arg2 : i32, i32
  }
  func.func @transform_3(%arg0: i32, %arg1: i32, %arg2: i32, %arg3: i32) -> (i32, i32, i32) {
    %c0_i32 = arith.constant 0 : i32
    return %arg0, %arg1, %arg2 : i32, i32, i32
  }
  func.func @transform_4(%arg0: i32, %arg1: i32, %arg2: i32, %arg3: i32) -> (i32, i32, i32) {
    %c0_i32 = arith.constant 0 : i32
    %c0_i32_0 = arith.constant 0 : i32
    return %arg0, %c0_i32, %arg2 : i32, i32, i32
  }
  func.func @transform_5(%arg0: i32, %arg1: i32, %arg2: i32, %arg3: i32) -> (i32, i32, i32) {
    %c0_i32 = arith.constant 0 : i32
    return %arg0, %arg1, %arg2 : i32, i32, i32
  }
}

</mosaic_0001>

<bundles_post_ra>
// kernel: neg.1
= control target key start
LH: loop header
LB: loop body
LE: loop exit
PB: predicated region body
PF: predicated region fallthrough
CT: control target
= control target key end

     0   :  { %s24_s0 = inlined_call_operand.vmem [shape: f32[8,4], index: 0, kind: input, shape index: {}]   ;;  %s25_s1 = inlined_call_operand.vmem [shape: f32[8,4], index: 1, kind: output, shape index: {}]  }
   0x1   :  { %v2_v0 = vld [vmem:[%s24_s0] sm:$0xff] }
   0x2   :  { %v5_v1 = vxor.u32 2147483648, %v2_v0 }
   0x4   :  { %7 = vst [vmem:[%s25_s1] sm:$0xff] %v5_v1 }

// kernel: wan_attention_block.12
= control target key start
LH: loop header
LB: loop body
LE: loop exit
PB: predicated region body
PF: predicated region fallthrough
CT: control target
= control target key end

     0   :  { %s734_s18 = smov 0   ;;  %s736_s19 = smov 0   ;;  %s796_s0 = inlined_call_operand.vmem [shape: bf16[2,8,32], index: 0, kind: input, shape index: {}]   ;;  %s797_s1 = inlined_call_operand.vmem [shape: bf16[32,96], index: 1, kind: input, shape index: {}]   ;;  %s798_s2 = inlined_call_operand.vmem [shape: f32[1,96], index: 2, kind: input, shape index: {}]   ;;  %s799_s3 = inlined_call_operand.vmem [shape: f32[2,1,32], index: 3, kind: input, shape index: {}]   ;;  %s800_s4 = inlined_call_operand.vmem [shape: f32[2,1,32], index: 4, kind: input, shape index: {}]   ;;  %s801_s5 = inlined_call_operand.vmem [shape: bf16[2,8,96], index: 5, kind: output, shape index: {}]  }
   0x1   :  { %s738_s20 = smov 0  }
   0x2 LB: > { %s41_s21 = sadd.s32 1, %s696_s19  ;;  %p627_p0 = scmp.ge.s32.totalorder %s700_s20, 1  ;;  %s700_s20 = sphi %s738_s20, %s15_s20   ;;  %s696_s19 = sphi %s736_s19, %s803_s19   ;;  %s692_s18 = sphi %s734_s18, %s802_s18  }
   0x3   : > { %p43_p1 = scmp.ge.s32.totalorder %s41_s21, 2  ;;  %p266_p2 = scmp.lt.s32.totalorder %s700_s20, 3 }
   0x5   : > { %s805_s21 = smov (%p43_p1, %s41_s21), 0  ;;  %p267_p3 = pnand %p627_p0, %p266_p2 }
   0x6   : > { %p321_p4 = scmp.lt.s32.totalorder (!%p267_p3), %s692_s18, 1 }
   0x7   : > { %270 = sbr.rel (%p267_p3) target bundleno = 536 (0x218), region = 40 }
   0xc   : > { %s807_s18 = smov (!%p321_p4, %s692_s18), 1  ;;  %vm368_vm0 = vcmask 261120   ;;  %vm364_vm1 = vcmask 785408   ;;  %v674_v8 = vld [vmem:[%s797_s1 + $0x8] sm:$0xff]   ;;  %v702_v9 = vmov 0.0   ;;  %vm703_vm2 = vmmov 0  }
   0xd   : > { %s628_s22 = sshll.u32 %s807_s18, 2  ;;  %365 = vst.msk [vmem:[#allocation2] sm:$0xff] %vm364_vm1, %v702_v9  ;;  %640 = vmatprep.subr.bf16.mxu0 %v702_v9  ;;  %644 = vmatprep.mubr.msk.bf16.mxu0 %vm703_vm2, %v702_v9  ;;  %v675_v10 = vld [vmem:[%s797_s1] sm:$0xff]   ;;  %v386_v14 = vlaneseq  ;;  %s348_s7 = scalar_lea.vmem %s800_s4, %s807_s18  ;;  %vm477_vm3 = vcmask 781312  }
   0xe   : > { %s330_s25 = scalar_lea.vmem %s796_s0, %s628_s22  ;;  %641 = vmatpush3.bf16.msra.mxu0 %v674_v8  ;;  %v383_v16 = vld [vmem:[%s348_s7] sm:$0x1]  ;;  %s345_s10 = scalar_lea.vmem %s799_s3, %s807_s18 }
   0xf   : > { %v366_v0 = vld [vmem:[%s330_s25] sm:$0xf]  ;;  %642 = vmatprep.subr.bf16.mxu0 %v702_v9  ;;  %v387_v15 = vshrl.u32 %v386_v14, 7  ;;  %v384_v17 = vadd.f32 1.0, %v383_v16  ;;  %s358_s15 = scalar_lea.vmem %s801_s5, %s628_s22 }
  0x10   : > { %v367_v1 = vunpack.c.l.bf16 %v366_v0  ;;  %v630_v22 = vld [vmem:[%s345_s10] ss:$0 sm:$0xff] }
  0x11   : > { %v388_v18 = vsub.s32 0, %v387_v15  ;;  %v634_v32 = vld [vmem:[%s798_s2] ss:$0 sm:$0xff] }
  0x12   : > { %v369_v2 = vsel %vm368_vm0, %v367_v1, 0.0  ;;  %643 = vmatpush3.bf16.msra.mxu0 %v675_v10 }
  0x13   : > { %370 = vadd.xlane.f32.xlu0 %v369_v2  ;;  %v389_v19 = vrot.slane %v384_v17, %v388_v18 }
  0x14   : > { %v401_v26 = vld [vmem:[#allocation2] sm:$0xff] }
  0x9c   : > { %v371_v3 = vpop.xlane.xlu0 %370 }
  0x9d   : > { %v373_v4 = vmul.f32 0.03125, %v371_v3 }
  0x9f   : > { %v374_v5 = vsub.f32 %v367_v1, %v373_v4 }
  0xa1   : > { %v375_v6 = vmul.f32 %v374_v5, %v374_v5 }
  0xa3   : > { %v376_v7 = vsel %vm368_vm0, %v375_v6, 0.0 }
  0xa4   : > { %377 = vadd.xlane.f32.xlu0 %v376_v7 }
 0x12d   : > { %v378_v11 = vpop.xlane.xlu0 %377 }
 0x12e   : > { %v379_v12 = vmul.f32 0.03125, %v378_v11 }
 0x130   : > { %v380_v13 = vadd.f32 1e-06, %v379_v12 }
 0x132   : > { %676 = vrsqrt.f32 %v380_v13 }
 0x13f   : > { %v677_v20 = vpop.eup %676 }
 0x140   : > { %v382_v21 = vmul.f32 %v677_v20, %v374_v5 }
 0x142   : > { %v391_v23 = vmul.f32 %v389_v19, %v382_v21 }
 0x144   : > { %v399_v24 = vadd.f32 %v630_v22, %v391_v23 }
 0x146   : > { %v400_v25 = vpack.c.bf16 %v399_v24, %v399_v24 }
 0x148   : > { %645 = vmatmul.mubr.msk.bf16.vlgmr.msra.gmra.mxu0 %vm368_vm0, %v400_v25 }
 0x208   : > { %v455_v27 = vpop.f32.mrf.mxu0 }
 0x209   : > { %v461_v28 = vadd.f32 %v455_v27, %v401_v26 }
 0x20a   : > { %v646_v29 = vpop.f32.mrf.mxu0 }
 0x20b   : > { %463 = vst.msk [vmem:[#allocation2] sm:$0xff] %vm364_vm1, %v461_v28 }
 0x20c   : > { %v458_v30 = vpop.f32.mrf.mxu0 }
 0x20e   : > { %v647_v31 = vpop.f32.mrf.mxu0 }
 0x212   : > { %v467_v33 = vld [vmem:[#allocation2] sm:$0xff] }
 0x213   : > { %v475_v34 = vadd.f32 %v634_v32, %v467_v33 }
 0x215   : > { %v476_v35 = vpack.c.bf16 %v475_v34, %v475_v34 }
 0x217   : > { %478 = vst.msk [vmem:[%s358_s15] sm:$0xf] %vm477_vm3, %v476_v35 }
 0x218 PF: > { %s15_s20 = sadd.s32 1, %s700_s20   ;;  %s802_s18 = smov %s696_s19 }
 0x219   : > { %p12_p5 = scmp.ge.s32.totalorder %s15_s20, 4   ;;  %s803_s19 = smov %s805_s21 }
 0x21b   :  { %14 = sbr.rel (!%p12_p5) target bundleno = 2 (0x2), region = 90 }

// kernel: wan_attention_block.14
= control target key start
LH: loop header
LB: loop body
LE: loop exit
PB: predicated region body
PF: predicated region fallthrough
CT: control target
= control target key end

     0   :  { %s772_s12 = smov 0   ;;  %s774_s13 = smov 0   ;;  %s846_s0 = inlined_call_operand.vmem [shape: bf16[2,4,8,8], index: 0, kind: input, shape index: {}]   ;;  %s847_s1 = inlined_call_operand.vmem [shape: bf16[2,4,8,8], index: 1, kind: input, shape index: {}]   ;;  %s848_s2 = inlined_call_operand.vmem [shape: bf16[2,4,8,8], index: 2, kind: input, shape index: {}]   ;;  %s849_s3 = inlined_call_operand.vmem [shape: bf16[2,4,8,8], index: 3, kind: output, shape index: {}]  }
   0x1   :  { %s776_s14 = smov 0   ;;  %s778_s15 = smov 0  }
   0x2   :  { %s780_s16 = smov 0  }
   0x3 LB: > { %s35_s17 = sadd.s32 1, %s738_s14  ;;  %s39_s18 = sadd.s32 1, %s742_s15  ;;  %s746_s16 = sphi %s780_s16, %s13_s16   ;;  %s742_s15 = sphi %s778_s15, %s853_s15   ;;  %s738_s14 = sphi %s776_s14, %s852_s14   ;;  %s734_s13 = sphi %s774_s13, %s851_s13   ;;  %s730_s12 = sphi %s772_s12, %s850_s12  }
   0x4   : > { %p37_p0 = scmp.ge.s32.totalorder %s35_s17, 4  ;;  %p627_p1 = scmp.ge.s32.totalorder %s746_s16, 1 }
   0x5   : > { %p217_p2 = scmp.lt.s32.totalorder %s746_s16, 9 }
   0x6   : > { %s855_s17 = smov (%p37_p0, %s35_s17), 0  ;;  %s857_s18 = smov (!%p37_p0, %s39_s18), %s742_s15 }
   0x7   : > { %p218_p3 = pnand %p627_p1, %p217_p2  ;;  %p41_p4 = scmp.ge.s32.totalorder %s857_s18, 2 }
   0x8   : > { %p275_p5 = scmp.lt.s32.totalorder (!%p218_p3), %s734_s13, 1  ;;  %p277_p6 = scmp.lt.s32.totalorder (!%p218_p3), %s730_s12, 3 }
   0x9   : > { %s859_s18 = smov (%p41_p4, %s857_s18), 0  ;;  %221 = sbr.rel (%p218_p3) target bundleno = 798 (0x31e), region = 32 }
   0xe   : > { %vm327_vm0 = vcmask 64512   ;;  %v748_v0 = vmov 0.0   ;;  %vm749_vm1 = vmmov 0   ;;  %s861_s13 = smov (!%p275_p5, %s734_s13), 1  ;;  %s863_s12 = smov (!%p277_p6, %s730_s12), 3  ;;  %vm324_vm2 = vcmask 7168  }
   0xf   : > { %644 = vmatprep.subr.bf16.mxu0 %v748_v0  ;;  %328 = vst.msk [vmem:[#allocation4] sm:$0xff] %vm327_vm0, %v748_v0  ;;  %646 = vmatprep.mubr.msk.bf16.mxu0 %vm749_vm1, %v748_v0  ;;  %s628_s19 = sshll.u32 %s861_s13, 2  ;;  %v750_v4 = vmov -inf   ;;  %v751_v10 = vmov 0   ;;  %vm414_vm3 = vcmask 1043456   ;;  %vm474_vm4 = vcmask 60416  }
  0x10   : > { %650 = vmatprep.subr.bf16.mxu1 %v748_v0  ;;  %652 = vmatprep.mubr.msk.bf16.mxu1 %vm749_vm1, %v748_v0  ;;  %s283_s20 = sadd.s32 %s628_s19, %s863_s12  ;;  %325 = vst.msk [vmem:[#allocation2] sm:$0xff] %vm324_vm2, %v750_v4  ;;  %326 = vst.msk [vmem:[#allocation3] sm:$0xff] %vm324_vm2, %v748_v0 }
  0x11   : > { %s803_s21 = sshll.u32 %s283_s20, 2  ;;  %700 = vset.pattern.permute.xlu0 %v751_v10  ;;  %701 = vset.pattern.permute.xlu1 %v751_v10 }
  0x12   : > { %s296_s24 = scalar_lea.vmem %s847_s1, %s803_s21  ;;  %s285_s27 = scalar_lea.vmem %s846_s0, %s803_s21 }
  0x13   : > { %v330_v1 = vld [vmem:[%s296_s24] sm:$0xf]  ;;  %s307_s30 = scalar_lea.vmem %s848_s2, %s803_s21  ;;  %s318_s6 = scalar_lea.vmem %s849_s3, %s803_s21 }
  0x14   : > { %v336_v2 = vsel %vm327_vm0, %v330_v1, 0  ;;  %v329_v3 = vld [vmem:[%s285_s27] sm:$0xf] }
  0x15   : > { %645 = vmatpush3.bf16.xpose.msra.mxu0 %v336_v2  ;;  %v410_v15 = vld [vmem:[%s307_s30] sm:$0xf] }
  0x16   : > { %v416_v16 = vsel %vm414_vm3, %v410_v15, 0  ;;  %v402_v35 = vld [vmem:[#allocation4] sm:$0xff] }
  0x17   : > { %v378_v11 = vld [vmem:[#allocation2] sm:$0xff]  ;;  %651 = vmatpush3.bf16.msra.mxu1 %v416_v16  ;;  %v394_v25 = vld [vmem:[#allocation3] sm:$0xff] }
  0x1c   : > { %647 = vmatmul.mubr.msk.bf16.vlgmr.msra.gmra.mxu0 %vm327_vm0, %v329_v3 }
  0xdc   : > { %v372_v5 = vpop.f32.mrf.mxu0 }
  0xdd   : > { %v379_v6 = vsel %vm327_vm0, %v372_v5, -inf }
  0xde   : > { %380 = vmax.xlane.f32.xlu0 %v379_v6  ;;  %v648_v7 = vpop.f32.mrf.mxu0 }
  0xe0   : > { %v375_v8 = vpop.f32.mrf.mxu0 }
  0xe2   : > { %v649_v9 = vpop.f32.mrf.mxu0 }
 0x167   : > { %v381_v12 = vpop.xlane.xlu0 %380 }
 0x168   : > { %v382_v13 = vmax.f32 %v378_v11, %v381_v12 }
 0x16a   : > { %v383_v14 = vsub.f32 %v378_v11, %v382_v13  ;;  %460 = vst.msk [vmem:[#allocation2] sm:$0xff] %vm324_vm2, %v382_v13  ;;  %388 = vperm.xlu0 %700, %v382_v13  }
 0x16c   : > { %v384_v23 = vmul.f32 1.442695, %v383_v14 }
 0x1e5   : > { %v389_v17 = vpop.permute.xlu0 %388 }
 0x1e6   : > { %v391_v18 = vsub.f32 %v372_v5, %v389_v17 }
 0x1e8   : > { %v392_v19 = vmul.f32 1.442695, %v391_v18 }
 0x1ea   : > { %702 = vpow2.f32 %v392_v19 }
 0x1eb   : > { %704 = vpow2.f32 %v384_v23 }
 0x1f7   : > { %v703_v20 = vpop.eup %702 }
 0x1f8   : > { %v396_v21 = vsel %vm327_vm0, %v703_v20, 0.0  ;;  %v409_v22 = vpack.c.bf16 %v703_v20, %v703_v20  ;;  %v705_v24 = vpop.eup %704 }
 0x1f9   : > { %397 = vadd.xlane.f32.xlu1 %v396_v21  ;;  %v395_v26 = vmul.f32 %v705_v24, %v394_v25 }
 0x1fa   : > { %653 = vmatmul.mubr.msk.bf16.vlgmr.msra.gmra.mxu1 %vm327_vm0, %v409_v22 }
 0x282   : > { %v398_v27 = vpop.xlane.xlu1 %397 }
 0x283   : > { %v399_v28 = vadd.f32 %v398_v27, %v395_v26 }
 0x285   : > { %401 = vst.msk [vmem:[#allocation3] sm:$0xff] %vm324_vm2, %v399_v28 }
 0x28c   : > { %v465_v29 = vld [vmem:[#allocation3] sm:$0xff] }
 0x28d   : > { %468 = vperm.xlu1 %701, %v465_v29  }
 0x291   : > { %405 = vperm.xlu1 %701, %v705_v24  }
 0x2ba   : > { %v452_v30 = vpop.f32.mrf.mxu1 }
 0x2bc   : > { %v654_v31 = vpop.f32.mrf.mxu1 }
 0x2be   : > { %v455_v32 = vpop.f32.mrf.mxu1 }
 0x2c0   : > { %v655_v33 = vpop.f32.mrf.mxu1 }
 0x308   : > { %v469_v34 = vpop.permute.xlu1 %468 }
 0x309   : > { %706 = vrcp.f32 %v469_v34 }
 0x30c   : > { %v406_v36 = vpop.permute.xlu1 %405 }
 0x30d   : > { %v408_v37 = vmul.f32 %v406_v36, %v402_v35 }
 0x30f   : > { %v458_v38 = vadd.f32 %v452_v30, %v408_v37 }
 0x311   : > { %459 = vst.msk [vmem:[#allocation4] sm:$0xff] %vm327_vm0, %v458_v38 }
 0x316   : > { %v707_v39 = vpop.eup %706 }
 0x318   : > { %v464_v40 = vld [vmem:[#allocation4] sm:$0xff] }
 0x319   : > { %v472_v41 = vmul.f32 %v707_v39, %v464_v40 }
 0x31b   : > { %v473_v42 = vpack.c.bf16 %v472_v41, %v472_v41 }
 0x31d   : > { %475 = vst.msk [vmem:[%s318_s6] sm:$0xf] %vm474_vm4, %v473_v42 }
 0x31e PF: > { %s13_s16 = sadd.s32 1, %s746_s16   ;;  %s850_s12 = smov %s738_s14 }
 0x31f   : > { %p10_p7 = scmp.ge.s32.totalorder %s13_s16, 10   ;;  %s851_s13 = smov %s742_s15 }
 0x320   : > { %s852_s14 = smov %s855_s17  ;;  %s853_s15 = smov %s859_s18 }
 0x321   :  { %12 = sbr.rel (!%p10_p7) target bundleno = 3 (0x3), region = 76 }

// kernel: wan_attention_block.15
= control target key start
LH: loop header
LB: loop body
LE: loop exit
PB: predicated region body
PF: predicated region fallthrough
CT: control target
= control target key end

     0   :  { %s758_s18 = smov 0   ;;  %s760_s19 = smov 0   ;;  %s806_s0 = inlined_call_operand.vmem [shape: bf16[2,8,32], index: 0, kind: input, shape index: {}]   ;;  %s807_s1 = inlined_call_operand.vmem [shape: bf16[32,32], index: 1, kind: input, shape index: {}]   ;;  %s808_s2 = inlined_call_operand.vmem [shape: f32[1,32], index: 2, kind: input, shape index: {}]   ;;  %s809_s3 = inlined_call_operand.vmem [shape: bf16[2,8,32], index: 3, kind: input, shape index: {}, may-alias: {3,5}]   ;;  %s810_s4 = inlined_call_operand.vmem [shape: f32[2,1,32], index: 4, kind: input, shape index: {}]   ;;  %s811_s5 = inlined_call_operand.vmem [shape: bf16[2,8,32], index: 5, kind: output, shape index: {}, may-alias: {3,5}]  }
   0x1   :  { %s762_s20 = smov 0  }
   0x2 LB: > { %s41_s21 = sadd.s32 1, %s720_s19  ;;  %p652_p0 = scmp.ge.s32.totalorder %s724_s20, 1  ;;  %s724_s20 = sphi %s762_s20, %s15_s20   ;;  %s720_s19 = sphi %s760_s19, %s813_s19   ;;  %s716_s18 = sphi %s758_s18, %s812_s18  }
   0x3   : > { %p43_p1 = scmp.ge.s32.totalorder %s41_s21, 2  ;;  %p282_p2 = scmp.lt.s32.totalorder %s724_s20, 3 }
   0x5   : > { %s815_s21 = smov (%p43_p1, %s41_s21), 0  ;;  %p283_p3 = pnand %p652_p0, %p282_p2 }
   0x6   : > { %p347_p4 = scmp.lt.s32.totalorder (!%p283_p3), %s716_s18, 1 }
   0x7   : > { %286 = sbr.rel (%p283_p3) target bundleno = 233 (0xe9), region = 40 }
   0xc   : > { %v700_v0 = vld [vmem:[%s807_s1 + $0x8] sm:$0xff]   ;;  %v726_v1 = vmov 0.0   ;;  %v701_v2 = vld [vmem:[%s807_s1] sm:$0xff]   ;;  %vm727_vm0 = vmmov 0   ;;  %vm400_vm1 = vcmask 261120   ;;  %s817_s18 = smov (!%p347_p4, %s716_s18), 1 }
   0xd   : > { %666 = vmatprep.subr.bf16.mxu0 %v726_v1  ;;  %670 = vmatprep.mubr.msk.bf16.mxu0 %vm727_vm0, %v726_v1  ;;  %401 = vst.msk [vmem:[#allocation2] sm:$0xff] %vm400_vm1, %v726_v1  ;;  %s653_s26 = sshll.u32 %s817_s18, 2  ;;  %s384_s10 = scalar_lea.vmem %s810_s4, %s817_s18  ;;  %v659_v11 = vld [vmem:[%s808_s2] ss:$0 sm:$0xff]  ;;  %vm490_vm2 = vcmask 257024  }
   0xe   : > { %667 = vmatpush3.bf16.msra.mxu0 %v700_v0  ;;  %s356_s29 = scalar_lea.vmem %s806_s0, %s653_s26  ;;  %s378_s7 = scalar_lea.vmem %s809_s3, %s653_s26  ;;  %v660_v12 = vld [vmem:[%s384_s10] ss:$0 sm:$0xff] }
   0xf   : > { %668 = vmatprep.subr.bf16.mxu0 %v726_v1  ;;  %v402_v3 = vld [vmem:[%s356_s29] sm:$0xf]  ;;  %s394_s15 = scalar_lea.vmem %s811_s5, %s653_s26 }
  0x10   : > { %v478_v10 = vld [vmem:[%s378_s7] sm:$0xf] }
  0x11   : > { %v479_v14 = vunpack.c.l.bf16 %v478_v10 }
  0x12   : > { %669 = vmatpush3.bf16.msra.mxu0 %v701_v2 }
  0x14   : > { %v403_v4 = vld [vmem:[#allocation2] sm:$0xff] }
  0x15   : > { %671 = vmatmul.mubr.msk.bf16.vlgmr.msra.gmra.mxu0 %vm400_vm1, %v402_v3 }
  0xd5   : > { %v458_v5 = vpop.f32.mrf.mxu0 }
  0xd6   : > { %v464_v6 = vadd.f32 %v458_v5, %v403_v4 }
  0xd7   : > { %v672_v7 = vpop.f32.mrf.mxu0 }
  0xd8   : > { %465 = vst.msk [vmem:[#allocation2] sm:$0xff] %vm400_vm1, %v464_v6 }
  0xd9   : > { %v461_v8 = vpop.f32.mrf.mxu0 }
  0xdb   : > { %v673_v9 = vpop.f32.mrf.mxu0 }
  0xdf   : > { %v469_v13 = vld [vmem:[#allocation2] sm:$0xff] }
  0xe0   : > { %v477_v15 = vadd.f32 %v659_v11, %v469_v13 }
  0xe2   : > { %v487_v16 = vmul.f32 %v660_v12, %v477_v15 }
  0xe4   : > { %v488_v17 = vadd.f32 %v487_v16, %v479_v14 }
  0xe6   : > { %v489_v18 = vpack.c.bf16 %v488_v17, %v488_v17 }
  0xe8   : > { %491 = vst.msk [vmem:[%s394_s15] sm:$0xf] %vm490_vm2, %v489_v18 }
  0xe9 PF: > { %s15_s20 = sadd.s32 1, %s724_s20   ;;  %s812_s18 = smov %s720_s19 }
  0xea   : > { %p12_p5 = scmp.ge.s32.totalorder %s15_s20, 4   ;;  %s813_s19 = smov %s815_s21 }
  0xec   :  { %14 = sbr.rel (!%p12_p5) target bundleno = 2 (0x2), region = 90 }

// kernel: wan_attention_block.13
= control target key start
LH: loop header
LB: loop body
LE: loop exit
PB: predicated region body
PF: predicated region fallthrough
CT: control target
= control target key end

     0   :  { %s1876_s24 = smov 0   ;;  %s1878_s25 = smov 0   ;;  %s2446_s0 = inlined_call_operand.vmem [shape: bf16[2,8,3,4,8], index: 0, kind: input, shape index: {}]   ;;  %s2447_s1 = inlined_call_operand.vmem [shape: f32[8,8], index: 1, kind: input, shape index: {}]   ;;  %s2448_s2 = inlined_call_operand.vmem [shape: f32[8,8], index: 2, kind: input, shape index: {}]   ;;  %s2449_s3 = inlined_call_operand.vmem [shape: f32[4,8], index: 3, kind: input, shape index: {}]   ;;  %s2450_s4 = inlined_call_operand.vmem [shape: f32[4,8], index: 4, kind: input, shape index: {}]   ;;  %s2451_s5 = inlined_call_operand.vmem [shape: bf16[2,4,8,8], index: 5, kind: output, shape index: {0}]   ;;  %s2452_s6 = inlined_call_operand.vmem [shape: bf16[2,4,8,8], index: 6, kind: output, shape index: {1}]   ;;  %s2453_s7 = inlined_call_operand.vmem [shape: bf16[2,4,8,8], index: 7, kind: output, shape index: {2}]  }
   0x1   :  { %s1880_s26 = smov 0  }
   0x2 LB: > { %s30_s27 = sadd.s32 1, %s1827_s25  ;;  %p1669_p0 = scmp.ge.s32.totalorder %s1831_s26, 1  ;;  %s1831_s26 = sphi %s1880_s26, %s18_s26   ;;  %s1827_s25 = sphi %s1878_s25, %s2455_s25   ;;  %s1823_s24 = sphi %s1876_s24, %s2454_s24  }
   0x3   : > { %p32_p1 = scmp.ge.s32.totalorder %s30_s27, 2  ;;  %p286_p2 = scmp.lt.s32.totalorder %s1831_s26, 3 }
   0x5   : > { %s2457_s27 = smov (%p32_p1, %s30_s27), 0  ;;  %p287_p3 = pnand %p1669_p0, %p286_p2 }
   0x6   : > { %p351_p4 = scmp.lt.s32.totalorder (!%p287_p3), %s1823_s24, 1  ;;  %s1833_s11 = smov (!%p287_p3), 124  }
   0x7   : > { %290 = sbr.rel (%p287_p3) target bundleno = 399 (0x18f), region = 40  ;;  %s1834_s12 = smov (!%p287_p3), 4  }
   0xc   : > { %s2459_s24 = smov (!%p351_p4, %s1823_s24), 1  ;;  %vm519_vm0 = vcmask 60416   ;;  %vm553_vm1 = vcmask 1043456   ;;  %vm870_vm2 = vcmask 1041409   ;;  %vm873_vm3 = vcmask 1042434  }
   0xd   : > { %s1747_s28 = smul.u32 48, %s2459_s24  ;;  %vm876_vm4 = vcmask 1043459   ;;  %vm879_vm5 = vcmask 1044484   ;;  %vm882_vm6 = vcmask 1045509   ;;  %vm885_vm7 = vcmask 1046534   ;;  %s2189_s15 = sshll.u32 %s2459_s24, 4 }
   0xe   : > { %vm888_vm8 = vcmask 1047559   ;;  %s2199_s18 = scalar_lea.vmem %s2453_s7, %s2189_s15  ;;  %vm708_vm9 = vcmask 31744  }
   0xf   : > { %s1900_s8 = scalar_lea.vmem %s2446_s0, %s1747_s28  ;;  %s376_s28 = scalar_lea.vmem %s2451_s5, %s2189_s15 }
  0x10   : > { %v495_v0 = vld [vmem:[%s1900_s8] sm:$0x3]  ;;  %v497_v1 = vld [vmem:[%s1900_s8 + $0xc] sm:$0x3]  ;;  %v496_v2 = vld [vmem:[%s1900_s8 + $0x6] sm:$0x3] }
  0x11   : > { %v1905_v3 = vunpack.c.l.bf16 %v495_v0  ;;  %v1907_v4 = vunpack.c.l.bf16 %v497_v1  ;;  %v1909_v5 = vunpack.c.l.bf16 %v496_v2  ;;  %v498_v6 = vld [vmem:[%s1900_s8 + $0x12] sm:$0x3]  ;;  %v1688_v7 = vld [vmem:[%s1900_s8 + $0x2] sm:$0x3]  ;;  %v1689_v8 = vld [vmem:[%s1900_s8 + $0x8] sm:$0x3] }
  0x12   : > { %v1914_v9 = vunpack.c.l.bf16 %v498_v6  ;;  %v1916_v10 = vunpack.c.l.bf16 %v1688_v7  ;;  %v1924_v14 = vunpack.c.l.bf16 %v1689_v8  ;;  %v499_v15 = vld [vmem:[%s1900_s8 + $0x18] sm:$0x3]  ;;  %v1690_v17 = vld [vmem:[%s1900_s8 + $0xe] sm:$0x3]  ;;  %v500_v26 = vld [vmem:[%s1900_s8 + $0x1e] sm:$0x3] }
  0x13   : > { %v511_v11 = vmul.f32 %v1905_v3, %v1905_v3  ;;  %v513_v12 = vmul.f32 %v1907_v4, %v1907_v4  ;;  %v512_v13 = vmul.f32 %v1909_v5, %v1909_v5  ;;  %v1934_v21 = vunpack.c.l.bf16 %v499_v15  ;;  %v1691_v27 = vld [vmem:[%s1900_s8 + $0x14] sm:$0x3]  ;;  %v501_v34 = vld [vmem:[%s1900_s8 + $0x24] sm:$0x3]  ;;  %v1692_v35 = vld [vmem:[%s1900_s8 + $0x1a] sm:$0x3] }
  0x14   : > { %v514_v16 = vmul.f32 %v1914_v9, %v1914_v9  ;;  %v964_v20 = vmul.f32 %v1916_v10, %v1916_v10  ;;  %v965_v24 = vmul.f32 %v1924_v14, %v1924_v14  ;;  %v1940_v25 = vunpack.c.l.bf16 %v1690_v17  ;;  %v502_v42 = vld [vmem:[%s1900_s8 + $0x2a] sm:$0x3]  ;;  %v1693_v43 = vld [vmem:[%s1900_s8 + $0x20] sm:$0x3]  ;;  %v1694_v50 = vld [vmem:[%s1900_s8 + $0x26] sm:$0x3] }
  0x15   : > { %v520_v18 = vsel %vm519_vm0, %v511_v11, 0.0  ;;  %v526_v19 = vsel %vm519_vm0, %v513_v12, 0.0  ;;  %v523_v22 = vsel %vm519_vm0, %v512_v13, 0.0  ;;  %v515_v29 = vmul.f32 %v1934_v21, %v1934_v21  ;;  %v1695_v51 = vld [vmem:[%s1900_s8 + $0x2c] sm:$0x3] }
  0x16   : > { %521 = vadd.xlane.f32.xlu0 %v520_v18  ;;  %527 = vadd.xlane.f32.xlu1 %v526_v19  ;;  %v529_v23 = vsel %vm519_vm0, %v514_v16, 0.0  ;;  %v972_v28 = vsel %vm519_vm0, %v964_v20, 0.0  ;;  %v975_v30 = vsel %vm519_vm0, %v965_v24, 0.0  ;;  %v966_v31 = vmul.f32 %v1940_v25, %v1940_v25 }
  0x17   : > { %v1950_v32 = vunpack.c.l.bf16 %v500_v26  ;;  %v1952_v33 = vunpack.c.l.bf16 %v1691_v27  ;;  %v532_v36 = vsel %vm519_vm0, %v515_v29, 0.0  ;;  %v1957_v37 = vunpack.c.l.bf16 %v501_v34 }
  0x18   : > { %v978_v38 = vsel %vm519_vm0, %v966_v31, 0.0  ;;  %v1964_v41 = vunpack.c.l.bf16 %v1692_v35  ;;  %v1968_v44 = vunpack.c.l.bf16 %v502_v42  ;;  %v1970_v45 = vunpack.c.l.bf16 %v1693_v43 }
  0x19   : > { %v516_v39 = vmul.f32 %v1950_v32, %v1950_v32  ;;  %v967_v40 = vmul.f32 %v1952_v33, %v1952_v33  ;;  %v517_v48 = vmul.f32 %v1957_v37, %v1957_v37  ;;  %v1982_v53 = vunpack.c.l.bf16 %v1694_v50 }
  0x1a   : > { %524 = vadd.xlane.f32.xlu0 %v523_v22  ;;  %530 = vadd.xlane.f32.xlu1 %v529_v23  ;;  %v968_v49 = vmul.f32 %v1964_v41, %v1964_v41  ;;  %v518_v52 = vmul.f32 %v1968_v44, %v1968_v44  ;;  %v969_v56 = vmul.f32 %v1970_v45, %v1970_v45  ;;  %v1988_v57 = vunpack.c.l.bf16 %v1695_v51 }
  0x1b   : > { %v535_v46 = vsel %vm519_vm0, %v516_v39, 0.0  ;;  %v981_v47 = vsel %vm519_vm0, %v967_v40, 0.0  ;;  %v538_v54 = vsel %vm519_vm0, %v517_v48, 0.0  ;;  %v970_v60 = vmul.f32 %v1982_v53, %v1982_v53 }
  0x1c   : > { %v984_v55 = vsel %vm519_vm0, %v968_v49, 0.0  ;;  %v541_v58 = vsel %vm519_vm0, %v518_v52, 0.0  ;;  %v987_v59 = vsel %vm519_vm0, %v969_v56, 0.0  ;;  %v971_v61 = vmul.f32 %v1988_v57, %v1988_v57 }
  0x1d   : > { %v990_v62 = vsel %vm519_vm0, %v970_v60, 0.0 }
  0x1e   : > { %973 = vadd.xlane.f32.xlu0 %v972_v28  ;;  %976 = vadd.xlane.f32.xlu1 %v975_v30  ;;  %v993_v63 = vsel %vm519_vm0, %v971_v61, 0.0 }
  0x22   : > { %533 = vadd.xlane.f32.xlu0 %v532_v36  ;;  %979 = vadd.xlane.f32.xlu1 %v978_v38 }
  0x26   : > { %536 = vadd.xlane.f32.xlu0 %v535_v46  ;;  %982 = vadd.xlane.f32.xlu1 %v981_v47 }
  0x2a   : > { %539 = vadd.xlane.f32.xlu0 %v538_v54  ;;  %985 = vadd.xlane.f32.xlu1 %v984_v55 }
  0x2e   : > { %542 = vadd.xlane.f32.xlu0 %v541_v58  ;;  %988 = vadd.xlane.f32.xlu1 %v987_v59 }
  0x32   : > { %991 = vadd.xlane.f32.xlu0 %v990_v62  ;;  %994 = vadd.xlane.f32.xlu1 %v993_v63 }
  0x9f   : > { %v522_v0 = vpop.xlane.xlu0 %521  ;;  %v528_v1 = vpop.xlane.xlu1 %527 }
  0xa0   : > { %v545_v2 = vmul.f32 0.125, %v522_v0  ;;  %v547_v6 = vmul.f32 0.125, %v528_v1 }
  0xa2   : > { %v554_v7 = vsel %vm553_vm1, %v545_v2, 0.0  ;;  %v568_v8 = vsel %vm553_vm1, %v547_v6, 0.0 }
  0xa3   : > { %v555_v11 = vrot.slane %v554_v7, 4  ;;  %v569_v12 = vrot.slane %v568_v8, 4  ;;  %v525_v13 = vpop.xlane.xlu0 %524  ;;  %v531_v15 = vpop.xlane.xlu1 %530 }
  0xa4   : > { %v546_v16 = vmul.f32 0.125, %v525_v13  ;;  %v548_v17 = vmul.f32 0.125, %v531_v15 }
  0xa5   : > { %v556_v18 = vadd.f32 %v555_v11, %v554_v7  ;;  %v570_v19 = vadd.f32 %v569_v12, %v568_v8 }
  0xa6   : > { %v561_v20 = vsel %vm553_vm1, %v546_v16, 0.0  ;;  %v575_v22 = vsel %vm553_vm1, %v548_v17, 0.0 }
  0xa7   : > { %v557_v23 = vrot.slane %v556_v18, 2  ;;  %v571_v24 = vrot.slane %v570_v19, 2  ;;  %v562_v26 = vrot.slane %v561_v20, 4  ;;  %v576_v27 = vrot.slane %v575_v22, 4  ;;  %v974_v28 = vpop.xlane.xlu0 %973  ;;  %v977_v29 = vpop.xlane.xlu1 %976 }
  0xa8   : > { %v996_v30 = vmul.f32 0.125, %v974_v28  ;;  %v997_v31 = vmul.f32 0.125, %v977_v29 }
  0xa9   : > { %v558_v34 = vadd.f32 %v557_v23, %v556_v18  ;;  %v572_v35 = vadd.f32 %v571_v24, %v570_v19  ;;  %v563_v36 = vadd.f32 %v562_v26, %v561_v20  ;;  %v577_v38 = vadd.f32 %v576_v27, %v575_v22 }
  0xaa   : > { %v1004_v39 = vsel %vm553_vm1, %v996_v30, 0.0  ;;  %v1011_v40 = vsel %vm553_vm1, %v997_v31, 0.0 }
  0xab   : > { %v559_v42 = vrot.slane %v558_v34, 1  ;;  %v573_v43 = vrot.slane %v572_v35, 1  ;;  %v564_v46 = vrot.slane %v563_v36, 2  ;;  %v578_v47 = vrot.slane %v577_v38, 2  ;;  %v534_v48 = vpop.xlane.xlu0 %533  ;;  %v980_v49 = vpop.xlane.xlu1 %979 }
  0xac   : > { %v1005_v50 = vrot.slane %v1004_v39, 4  ;;  %v1012_v51 = vrot.slane %v1011_v40, 4  ;;  %v549_v52 = vmul.f32 0.125, %v534_v48  ;;  %v998_v54 = vmul.f32 0.125, %v980_v49 }
  0xad   : > { %v560_v55 = vadd.f32 %v559_v42, %v558_v34  ;;  %v574_v56 = vadd.f32 %v573_v43, %v572_v35  ;;  %v565_v58 = vadd.f32 %v564_v46, %v563_v36  ;;  %v579_v59 = vadd.f32 %v578_v47, %v577_v38 }
  0xae   : > { %v1006_v60 = vadd.f32 %v1005_v50, %v1004_v39  ;;  %v1013_v61 = vadd.f32 %v1012_v51, %v1011_v40  ;;  %v582_v62 = vsel %vm553_vm1, %v549_v52, 0.0  ;;  %v1018_v63 = vsel %vm553_vm1, %v998_v54, 0.0 }
  0xaf   : > { %v611_v0 = vmul.f32 0.25, %v560_v55  ;;  %v613_v1 = vmul.f32 0.25, %v574_v56  ;;  %v566_v2 = vrot.slane %v565_v58, 1  ;;  %v580_v6 = vrot.slane %v579_v59, 1  ;;  %v537_v13 = vpop.xlane.xlu0 %536  ;;  %v983_v31 = vpop.xlane.xlu1 %982 }
  0xb0   : > { %v1007_v7 = vrot.slane %v1006_v60, 2  ;;  %v1014_v8 = vrot.slane %v1013_v61, 2  ;;  %v583_v11 = vrot.slane %v582_v62, 4  ;;  %v1019_v12 = vrot.slane %v1018_v63, 4 }
  0xb1   : > { %v619_v15 = vadd.f32 1e-06, %v611_v0  ;;  %v621_v16 = vadd.f32 1e-06, %v613_v1  ;;  %v567_v17 = vadd.f32 %v566_v2, %v565_v58  ;;  %v581_v18 = vadd.f32 %v580_v6, %v579_v59 }
  0xb2   : > { %v1008_v19 = vadd.f32 %v1007_v7, %v1006_v60  ;;  %v1015_v20 = vadd.f32 %v1014_v8, %v1013_v61  ;;  %v584_v22 = vadd.f32 %v583_v11, %v582_v62  ;;  %v1020_v23 = vadd.f32 %v1019_v12, %v1018_v63 }
  0xb3   : > { %1777 = vrsqrt.f32 %v619_v15  ;;  %v612_v24 = vmul.f32 0.25, %v567_v17  ;;  %v614_v26 = vmul.f32 0.25, %v581_v18  ;;  %v550_v27 = vmul.f32 0.125, %v537_v13  ;;  %v540_v34 = vpop.xlane.xlu0 %539  ;;  %v986_v52 = vpop.xlane.xlu1 %985 }
  0xb4   : > { %v1009_v28 = vrot.slane %v1008_v19, 1  ;;  %v1016_v29 = vrot.slane %v1015_v20, 1  ;;  %v585_v30 = vrot.slane %v584_v22, 2  ;;  %1779 = vrsqrt.f32 %v621_v16 }
  0xb5   : > { %v620_v35 = vadd.f32 1e-06, %v612_v24  ;;  %v1021_v36 = vrot.slane %v1020_v23, 2  ;;  %v589_v38 = vsel %vm553_vm1, %v550_v27, 0.0  ;;  %v622_v39 = vadd.f32 1e-06, %v614_v26 }
  0xb6   : > { %v1010_v40 = vadd.f32 %v1009_v28, %v1008_v19  ;;  %v586_v42 = vadd.f32 %v585_v30, %v584_v22  ;;  %v590_v43 = vrot.slane %v589_v38, 4  ;;  %v999_v47 = vmul.f32 0.125, %v983_v31 }
  0xb7   : > { %1781 = vrsqrt.f32 %v620_v35  ;;  %v1022_v46 = vadd.f32 %v1021_v36, %v1020_v23  ;;  %v551_v48 = vmul.f32 0.125, %v540_v34  ;;  %v1017_v50 = vadd.f32 %v1016_v29, %v1015_v20  ;;  %v543_v59 = vpop.xlane.xlu0 %542  ;;  %v989_v16 = vpop.xlane.xlu1 %988  ;;  %v2014_v29 = vld [vmem:[%s2449_s3] sm:$0xf] }
  0xb8   : > { %v1060_v49 = vmul.f32 0.25, %v1010_v40  ;;  %v587_v51 = vrot.slane %v586_v42, 1  ;;  %v591_v55 = vadd.f32 %v590_v43, %v589_v38  ;;  %v1025_v56 = vsel %vm553_vm1, %v999_v47, 0.0 }
  0xb9   : > { %v1023_v54 = vrot.slane %v1022_v46, 1  ;;  %v596_v58 = vsel %vm553_vm1, %v551_v48, 0.0  ;;  %1783 = vrsqrt.f32 %v622_v39  ;;  %v1026_v62 = vrot.slane %v1025_v56, 4 }
  0xba   : > { %v1068_v60 = vadd.f32 1e-06, %v1060_v49  ;;  %v588_v61 = vadd.f32 %v587_v51, %v586_v42  ;;  %v592_v0 = vrot.slane %v591_v55, 2  ;;  %v597_v1 = vrot.slane %v596_v58, 4 }
  0xbb   : > { %v1024_v63 = vadd.f32 %v1023_v54, %v1022_v46  ;;  %v1000_v2 = vmul.f32 0.125, %v986_v52  ;;  %v1027_v7 = vadd.f32 %v1026_v62, %v1025_v56  ;;  %v552_v8 = vmul.f32 0.125, %v543_v59 }
  0xbc   : > { %1785 = vrsqrt.f32 %v1068_v60  ;;  %v615_v6 = vmul.f32 0.25, %v588_v61  ;;  %v1061_v11 = vmul.f32 0.25, %v1017_v50  ;;  %v593_v13 = vadd.f32 %v592_v0, %v591_v55  ;;  %v995_v0 = vpop.xlane.xlu1 %994 }
  0xbd   : > { %v1062_v12 = vmul.f32 0.25, %v1024_v63  ;;  %v598_v15 = vadd.f32 %v597_v1, %v596_v58  ;;  %v1028_v18 = vrot.slane %v1027_v7, 2  ;;  %v1032_v19 = vsel %vm553_vm1, %v1000_v2, 0.0  ;;  %v992_v63 = vpop.xlane.xlu0 %991 }
  0xbe   : > { %v623_v17 = vadd.f32 1e-06, %v615_v6  ;;  %v603_v20 = vsel %vm553_vm1, %v552_v8, 0.0  ;;  %v594_v22 = vrot.slane %v593_v13, 1  ;;  %v1033_v24 = vrot.slane %v1032_v19, 4 }
  0xbf   : > { %v599_v23 = vrot.slane %v598_v15, 2  ;;  %v1070_v27 = vadd.f32 1e-06, %v1062_v12  ;;  %v1029_v28 = vadd.f32 %v1028_v18, %v1027_v7  ;;  %v604_v30 = vrot.slane %v603_v20, 4 }
  0xc0   : > { %v1778_v26 = vpop.eup %1777  ;;  %v1001_v31 = vmul.f32 0.125, %v989_v16  ;;  %1787 = vrsqrt.f32 %v623_v17  ;;  %v595_v34 = vadd.f32 %v594_v22, %v593_v13  ;;  %v1069_v39 = vadd.f32 1e-06, %v1061_v11 }
  0xc1   : > { %v635_v35 = vmul.f32 %v1778_v26, %v1905_v3  ;;  %v600_v36 = vadd.f32 %v599_v23, %v598_v15  ;;  %v1780_v38 = vpop.eup %1779  ;;  %v1030_v40 = vrot.slane %v1029_v28, 1  ;;  %v1034_v42 = vadd.f32 %v1033_v24, %v1032_v19  ;;  %v2039_v19 = vld [vmem:[%s2450_s4] sm:$0xf] }
  0xc2   : > { %v605_v43 = vadd.f32 %v604_v30, %v603_v20  ;;  %v616_v46 = vmul.f32 0.25, %v595_v34  ;;  %v1039_v49 = vsel %vm553_vm1, %v1001_v31, 0.0  ;;  %1789 = vrsqrt.f32 %v1070_v27 }
  0xc3   : > { %v2018_v47 = vmul.f32 %v2014_v29, %v635_v35  ;;  %v601_v48 = vrot.slane %v600_v36, 1  ;;  %v1031_v51 = vadd.f32 %v1030_v40, %v1029_v28  ;;  %v1035_v52 = vrot.slane %v1034_v42, 2 }
  0xc4   : > { %v1782_v50 = vpop.eup %1781  ;;  %v606_v54 = vrot.slane %v605_v43, 2  ;;  %v624_v55 = vadd.f32 1e-06, %v616_v46  ;;  %v1040_v58 = vrot.slane %v1039_v49, 4  ;;  %v637_v61 = vmul.f32 %v1780_v38, %v1907_v4 }
  0xc5   : > { %660 = vrot.lane.b32.xlu0 %v2018_v47, %s1833_s11  ;;  %v636_v3 = vmul.f32 %v1782_v50, %v1909_v5  ;;  %v602_v56 = vadd.f32 %v601_v48, %v600_v36  ;;  %v1063_v59 = vmul.f32 0.25, %v1031_v51  ;;  %v1036_v60 = vadd.f32 %v1035_v52, %v1034_v42 }
  0xc6   : > { %v607_v62 = vadd.f32 %v606_v54, %v605_v43  ;;  %v1784_v1 = vpop.eup %1783  ;;  %1791 = vrsqrt.f32 %v1069_v39  ;;  %v1041_v6 = vadd.f32 %v1040_v58, %v1039_v49  ;;  %v1002_v13 = vmul.f32 0.125, %v992_v63 }
  0xc7   : > { %v2026_v2 = vmul.f32 %v2014_v29, %v636_v3  ;;  %v1071_v7 = vadd.f32 1e-06, %v1063_v59  ;;  %v617_v8 = vmul.f32 0.25, %v602_v56  ;;  %v1037_v11 = vrot.slane %v1036_v60, 1 }
  0xc8   : > { %v608_v12 = vrot.slane %v607_v62, 1  ;;  %1793 = vrsqrt.f32 %v624_v55  ;;  %v1042_v4 = vrot.slane %v1041_v6, 2  ;;  %v1003_v15 = vmul.f32 0.125, %v995_v0 }
  0xc9   : > { %v1786_v5 = vpop.eup %1785  ;;  %684 = vrot.lane.b32.xlu0 %v2018_v47, %s1834_s12  ;;  %662 = vrot.lane.b32.xlu1 %v2026_v2, %s1833_s11  ;;  %v1038_v16 = vadd.f32 %v1037_v11, %v1036_v60  ;;  %v2033_v17 = vmul.f32 %v2014_v29, %v637_v61  ;;  %v638_v20 = vmul.f32 %v1784_v1, %v1914_v9  ;;  %v1046_v23 = vsel %vm553_vm1, %v1002_v13, 0.0 }
  0xca   : > { %v1084_v18 = vmul.f32 %v1786_v5, %v1916_v10  ;;  %v1043_v22 = vadd.f32 %v1042_v4, %v1041_v6  ;;  %v1053_v24 = vsel %vm553_vm1, %v1003_v15, 0.0  ;;  %1795 = vrsqrt.f32 %v1071_v7 }
  0xcb   : > { %v625_v26 = vadd.f32 1e-06, %v617_v8  ;;  %v609_v27 = vadd.f32 %v608_v12, %v607_v62  ;;  %v1047_v28 = vrot.slane %v1046_v23, 4  ;;  %v1064_v30 = vmul.f32 0.25, %v1038_v16 }
  0xcc   : > { %v2049_v10 = vmul.f32 %v2039_v19, %v1084_v18  ;;  %v1044_v9 = vrot.slane %v1043_v22, 1  ;;  %v1054_v31 = vrot.slane %v1053_v24, 4  ;;  %v2052_v36 = vmul.f32 %v2014_v29, %v638_v20 }
  0xcd   : > { %688 = vrot.lane.b32.xlu0 %v2033_v17, %s1834_s12  ;;  %664 = vrot.lane.b32.xlu1 %v2033_v17, %s1833_s11  ;;  %v1788_v34 = vpop.eup %1787  ;;  %v1048_v35 = vadd.f32 %v1047_v28, %v1046_v23  ;;  %v618_v39 = vmul.f32 0.25, %v609_v27  ;;  %1797 = vrsqrt.f32 %v625_v26  ;;  %v1072_v46 = vadd.f32 1e-06, %v1064_v30 }
  0xce   : > { %v1055_v38 = vadd.f32 %v1054_v31, %v1053_v24  ;;  %v1045_v40 = vadd.f32 %v1044_v9, %v1043_v22  ;;  %v639_v49 = vmul.f32 %v1788_v34, %v1934_v21  ;;  %v1715_v28 = vld.sshfl [vmem:[%s1900_s8 + $0x4] sm:$0x3 pattern:$0x76325410] }
  0xcf   : > { %v1049_v42 = vrot.slane %v1048_v35, 2  ;;  %v1790_v43 = vpop.eup %1789  ;;  %v626_v54 = vadd.f32 1e-06, %v618_v39  ;;  %1799 = vrsqrt.f32 %v1072_v46  ;;  %v2144_v9 = vunpack.c.l.b16 %v1715_v28 }
  0xd0   : > { %v1056_v48 = vrot.slane %v1055_v38, 2  ;;  %v1065_v55 = vmul.f32 0.25, %v1045_v40  ;;  %v2064_v58 = vmul.f32 %v2014_v29, %v639_v49  ;;  %v1086_v59 = vmul.f32 %v1790_v43, %v1940_v25  ;;  %v1716_v30 = vld.sshfl [vmem:[%s1900_s8 + $0xa] sm:$0x3 pattern:$0x76325410] }
  0xd1   : > { %666 = vrot.lane.b32.xlu1 %v2052_v36, %s1833_s11  ;;  %1109 = vrot.lane.b32.xlu0 %v2049_v10, %s1833_s11  ;;  %v1050_v50 = vadd.f32 %v1049_v42, %v1048_v35  ;;  %1801 = vrsqrt.f32 %v626_v54  ;;  %v1718_v31 = vld.sshfl [vmem:[%s1900_s8 + $0x16] sm:$0x3 pattern:$0x76325410]  ;;  %v1398_v35 = vrot.slane %v2144_v9, 1 }
  0xd2   : > { %v1057_v51 = vadd.f32 %v1056_v48, %v1055_v38  ;;  %v1073_v62 = vadd.f32 1e-06, %v1065_v55  ;;  %v2073_v6 = vmul.f32 %v2039_v19, %v1086_v59  ;;  %v1416_v38 = vrot.slane %v2144_v9, 2 }
  0xd3   : > { %v1792_v52 = vpop.eup %1791  ;;  %v1051_v3 = vrot.slane %v1050_v50, 1  ;;  %v1719_v39 = vld.sshfl [vmem:[%s1900_s8 + $0x1c] sm:$0x3 pattern:$0x76325410]  ;;  %v2159_v40 = vunpack.c.l.b16 %v1718_v31 }
  0xd4   : > { %v1058_v56 = vrot.slane %v1057_v51, 1  ;;  %v1085_v61 = vmul.f32 %v1792_v52, %v1924_v14  ;;  %1803 = vrsqrt.f32 %v1073_v62  ;;  %v1720_v46 = vld.sshfl [vmem:[%s1900_s8 + $0x22] sm:$0x3 pattern:$0x76325410]  ;;  %v2164_v48 = vunpack.c.l.b16 %v1719_v39 }
  0xd5   : > { %686 = vrot.lane.b32.xlu1 %v2026_v2, %s1834_s12  ;;  %1133 = vrot.lane.b32.xlu0 %v2049_v10, %s1834_s12  ;;  %v1794_v21 = vpop.eup %1793  ;;  %v1052_v60 = vadd.f32 %v1051_v3, %v1050_v50  ;;  %v1721_v52 = vld.sshfl [vmem:[%s1900_s8 + $0x28] sm:$0x3 pattern:$0x76325410]  ;;  %v1378_v54 = vunpack.c.l.b16 %v1720_v46  ;;  %v1385_v3 = vrot.slane %v2159_v40, 5 }
  0xd6   : > { %v1059_v1 = vadd.f32 %v1058_v56, %v1057_v51  ;;  %v640_v25 = vmul.f32 %v1794_v21, %v1950_v32  ;;  %v2077_v7 = vmul.f32 %v2039_v19, %v1085_v61  ;;  %v1402_v56 = vrot.slane %v2159_v40, 6  ;;  %v1722_v59 = vld.sshfl [vmem:[%s1900_s8 + $0x2e] sm:$0x3 pattern:$0x76325410] }
  0xd7   : > { %v1796_v63 = vpop.eup %1795  ;;  %v1066_v0 = vmul.f32 0.25, %v1052_v60  ;;  %v1379_v21 = vunpack.c.l.b16 %v1721_v52  ;;  %v1387_v61 = vrot.slane %v2164_v48, 4  ;;  %v1424_v31 = vrot.slane %v1378_v54, 5 }
  0xd8   : > { %v1067_v8 = vmul.f32 0.25, %v1059_v1  ;;  %v2084_v11 = vmul.f32 %v2014_v29, %v640_v25  ;;  %v1087_v12 = vmul.f32 %v1796_v63, %v1952_v33  ;;  %v1380_v63 = vunpack.c.l.b16 %v1722_v59 }
  0xd9   : > { %690 = vrot.lane.b32.xlu1 %v2052_v36, %s1834_s12  ;;  %668 = vrot.lane.b32.xlu0 %v2064_v58, %s1833_s11  ;;  %v1074_v14 = vadd.f32 1e-06, %v1066_v0  ;;  %v1389_v1 = vrot.slane %v1378_v54, 3  ;;  %v1426_v39 = vrot.slane %v1379_v21, 4  ;;  %v1442_v59 = vrot.slane %v1378_v54, 6 }
  0xda   : > { %v1798_v5 = vpop.eup %1797  ;;  %v1075_v32 = vadd.f32 1e-06, %v1067_v8  ;;  %v2092_v4 = vmul.f32 %v2039_v19, %v1087_v12  ;;  %v1391_v8 = vrot.slane %v1379_v21, 2  ;;  %v1404_v12 = vrot.slane %v2164_v48, 5 }
  0xdb   : > { %1805 = vrsqrt.f32 %v1074_v14  ;;  %v641_v13 = vmul.f32 %v1798_v5, %v1957_v37  ;;  %v1406_v5 = vrot.slane %v1378_v54, 4  ;;  %v1835_v54 = vmov 1966171168  }
  0xdc   : > { %v1800_v15 = vpop.eup %1799  ;;  %1807 = vrsqrt.f32 %v1075_v32 }
  0xdd   : > { %1111 = vrot.lane.b32.xlu1 %v2077_v7, %s1833_s11  ;;  %1113 = vrot.lane.b32.xlu0 %v2073_v6, %s1833_s11  ;;  %v2100_v33 = vmul.f32 %v2014_v29, %v641_v13  ;;  %v1088_v18 = vmul.f32 %v1800_v15, %v1964_v41  ;;  %v1393_v13 = vrot.slane %v1380_v63, 1  ;;  %v1408_v15 = vrot.slane %v1379_v21, 3 }
  0xde   : > { %v1802_v16 = vpop.eup %1801 }
  0xdf   : > { %v2108_v37 = vmul.f32 %v2039_v19, %v1088_v18  ;;  %v642_v22 = vmul.f32 %v1802_v16, %v1968_v44  ;;  %v1410_v16 = vrot.slane %v1380_v63, 2 }
  0xe1   : > { %1135 = vrot.lane.b32.xlu1 %v2077_v7, %s1834_s12  ;;  %670 = vrot.lane.b32.xlu0 %v2084_v11, %s1833_s11  ;;  %v1804_v20 = vpop.eup %1803  ;;  %v2116_v41 = vmul.f32 %v2014_v29, %v642_v22 }
  0xe2   : > { %v1089_v23 = vmul.f32 %v1804_v20, %v1970_v45 }
  0xe4   : > { %v2124_v44 = vmul.f32 %v2039_v19, %v1089_v23  ;;  %v1420_v23 = vrot.slane %v2159_v40, 7 }
  0xe5   : > { %692 = vrot.lane.b32.xlu1 %v2064_v58, %s1834_s12  ;;  %1115 = vrot.lane.b32.xlu0 %v2092_v4, %s1833_s11 }
  0xe8   : > { %v1806_v24 = vpop.eup %1805 }
  0xe9   : > { %1137 = vrot.lane.b32.xlu1 %v2073_v6, %s1834_s12  ;;  %672 = vrot.lane.b32.xlu0 %v2100_v33, %s1833_s11  ;;  %v1090_v26 = vmul.f32 %v1806_v24, %v1982_v53  ;;  %v1808_v27 = vpop.eup %1807 }
  0xea   : > { %v1091_v29 = vmul.f32 %v1808_v27, %v1988_v57  ;;  %v1717_v57 = vld.sshfl [vmem:[%s1900_s8 + $0x10] sm:$0x3 pattern:$0x76325410]  ;;  %s384_s8 = scalar_lea.vmem %s2452_s6, %s2189_s15 }
  0xeb   : > { %v2132_v45 = vmul.f32 %v2039_v19, %v1090_v26  ;;  %v2154_v34 = vunpack.c.l.b16 %v1717_v57 }
  0xec   : > { %v2140_v53 = vmul.f32 %v2039_v19, %v1091_v29  ;;  %v2151_v19 = vunpack.c.l.b16 %v1716_v30  ;;  %v1422_v29 = vrot.slane %v2164_v48, 6 }
  0xed   : > { %694 = vrot.lane.b32.xlu1 %v2084_v11, %s1834_s12  ;;  %1117 = vrot.lane.b32.xlu0 %v2108_v37, %s1833_s11  ;;  %v1383_v49 = vrot.slane %v2154_v34, 6  ;;  %v1400_v51 = vrot.slane %v2154_v34, 7  ;;  %v1437_v52 = vrot.slane %v2154_v34, 1 }
  0xee   : > { %v1381_v42 = vrot.slane %v2151_v19, 7  ;;  %v1417_v43 = vrot.slane %v2151_v19, 1  ;;  %v1399_v50 = vsel %vm870_vm2, %v2151_v19, %v1398_v35 }
  0xef   : > { %v1401_v62 = vsel %vm873_vm3, %v1400_v51, %v1399_v50  ;;  %v1435_v50 = vrot.slane %v2151_v19, 2 }
  0xf0   : > { %v1382_v55 = vsel %vm870_vm2, %v1381_v42, %v2144_v9  ;;  %v1403_v25 = vsel %vm876_vm4, %v1402_v56, %v1401_v62  ;;  %v1418_v22 = vsel %vm870_vm2, %v1417_v43, %v1416_v38  ;;  %v1428_v42 = vrot.slane %v1380_v63, 3 }
  0xf1   : > { %1139 = vrot.lane.b32.xlu1 %v2092_v4, %s1834_s12  ;;  %674 = vrot.lane.b32.xlu0 %v2116_v41, %s1833_s11  ;;  %v1384_v60 = vsel %vm873_vm3, %v1383_v49, %v1382_v55  ;;  %v1405_v20 = vsel %vm879_vm5, %v1404_v12, %v1403_v25  ;;  %v1419_v27 = vsel %vm873_vm3, %v2154_v34, %v1418_v22  ;;  %v1434_v49 = vrot.slane %v2144_v9, 3 }
  0xf2   : > { %v1386_v0 = vsel %vm876_vm4, %v1385_v3, %v1384_v60  ;;  %v1407_v26 = vsel %vm882_vm6, %v1406_v5, %v1405_v20  ;;  %v1421_v57 = vsel %vm876_vm4, %v1420_v23, %v1419_v27  ;;  %v1440_v55 = vrot.slane %v2164_v48, 7  ;;  %v444_v5 = vld [vmem:[%s2448_s2] sm:$0xff] }
  0xf3   : > { %v1388_v14 = vsel %vm879_vm5, %v1387_v61, %v1386_v0  ;;  %v1409_v30 = vsel %vm885_vm7, %v1408_v15, %v1407_v26  ;;  %v1423_v38 = vsel %vm879_vm5, %v1422_v29, %v1421_v57  ;;  %v1436_v56 = vsel %vm870_vm2, %v1435_v50, %v1434_v49 }
  0xf4   : > { %v1390_v32 = vsel %vm882_vm6, %v1389_v1, %v1388_v14  ;;  %v1411_v35 = vsel %vm888_vm8, %v1410_v16, %v1409_v30  ;;  %v1425_v46 = vsel %vm882_vm6, %v1424_v31, %v1423_v38  ;;  %v1438_v61 = vsel %vm873_vm3, %v1437_v52, %v1436_v56 }
  0xf5   : > { %696 = vrot.lane.b32.xlu1 %v2100_v33, %s1834_s12  ;;  %1119 = vrot.lane.b32.xlu0 %v2124_v44, %s1833_s11  ;;  %v1392_v18 = vsel %vm885_vm7, %v1391_v8, %v1390_v32  ;;  %v1412_v43 = vpack.c.b16 %v1411_v35, %v1411_v35  ;;  %v1427_v51 = vsel %vm885_vm7, %v1426_v39, %v1425_v46  ;;  %v1444_v9 = vrot.slane %v1379_v21, 5 }
  0xf6   : > { %v1394_v24 = vsel %vm888_vm8, %v1393_v13, %v1392_v18  ;;  %v1429_v3 = vsel %vm888_vm8, %v1428_v42, %v1427_v51  ;;  %v1439_v19 = vsel %vm876_vm4, %v2159_v40, %v1438_v61  ;;  %v1446_v62 = vrot.slane %v1380_v63, 4  ;;  %v393_v63 = vld [vmem:[%s2447_s1] sm:$0xff] }
  0xf7   : > { %v1395_v28 = vpack.c.b16 %v1394_v24, %v1394_v24  ;;  %1723 = vst.msk [vmem:[%s2199_s18 + $0x4] sm:$0xf] %vm519_vm0, %v1412_v43  ;;  %v1430_v60 = vpack.c.b16 %v1429_v3, %v1429_v3  ;;  %v1441_v34 = vsel %vm879_vm5, %v1440_v55, %v1439_v19  ;;  %v397_v14 = vunpack.c.l.s4 %v1835_v54 }
  0xf8   : > { %v1443_v48 = vsel %vm882_vm6, %v1442_v59, %v1441_v34  ;;  %v399_v21 = vlaneseq }
  0xf9   : > { %1141 = vrot.lane.b32.xlu1 %v2108_v37, %s1834_s12  ;;  %1121 = vrot.lane.b32.xlu0 %v2132_v45, %s1833_s11  ;;  %1397 = vst.msk [vmem:[%s2199_s18] sm:$0xf] %vm519_vm0, %v1395_v28  ;;  %1724 = vst.msk [vmem:[%s2199_s18 + $0x8] sm:$0xf] %vm519_vm0, %v1430_v60  ;;  %v1445_v0 = vsel %vm885_vm7, %v1444_v9, %v1443_v48  ;;  %v398_v8 = vunpack.c.0.s8 %v397_v14  ;;  %v395_v60 = vcombine.high %v393_v63, %v393_v63 }
  0xfa   : > { %v1447_v1 = vsel %vm888_vm8, %v1446_v62, %v1445_v0  ;;  %v400_v12 = vshrl.u32 %v399_v21, 7 }
  0xfb   : > { %v1448_v25 = vpack.c.b16 %v1447_v1, %v1447_v1 }
  0xfc   : > { %v2235_v40 = vsub.s32 %v398_v8, %v400_v12  ;;  %v2247_v20 = vsub.s32 0, %v400_v12 }
  0xfd   : > { %698 = vrot.lane.b32.xlu1 %v2116_v41, %s1834_s12  ;;  %1123 = vrot.lane.b32.xlu0 %v2140_v53, %s1833_s11  ;;  %1725 = vst.msk [vmem:[%s2199_s18 + $0xc] sm:$0xf] %vm519_vm0, %v1448_v25 }
  0xfe   : > { %v402_v32 = vrot.slane %v393_v63, %v2235_v40  ;;  %v453_v13 = vrot.slane %v444_v5, %v2235_v40 }
 0x100   : > { %v418_v15 = vrot.slane %v402_v32, %v2235_v40  ;;  %v469_v16 = vrot.slane %v453_v13, %v2235_v40  ;;  %v410_v30 = vcombine.high %v402_v32, %v402_v32  ;;  %v461_v38 = vcombine.high %v453_v13, %v453_v13 }
 0x101   : > { %1143 = vrot.lane.b32.xlu1 %v2124_v44, %s1834_s12 }
 0x102   : > { %v768_v22 = vrot.slane %v469_v16, %v2247_v20  ;;  %v440_v23 = vcombine.high %v418_v15, %v418_v15  ;;  %v491_v24 = vcombine.high %v469_v16, %v469_v16  ;;  %v720_v27 = vrot.slane %v418_v15, %v2247_v20 }
 0x103   : > { %v432_v49 = vrot.slane %v410_v30, %v2235_v40  ;;  %v483_v55 = vrot.slane %v461_v38, %v2235_v40 }
 0x104   : > { %v2253_v31 = vrot.slane %v440_v23, %v2247_v20  ;;  %v2256_v35 = vrot.slane %v491_v24, %v2247_v20  ;;  %v757_v39 = vmul.f32 %v720_v27, %v2018_v47  ;;  %v446_v47 = vcombine.high %v444_v5, %v444_v5 }
 0x105   : > { %1145 = vrot.lane.b32.xlu1 %v2132_v45, %s1834_s12  ;;  %v442_v61 = vcombine.high %v432_v49, %v432_v49  ;;  %v724_v19 = vrot.slane %v432_v49, %v2247_v20  ;;  %v772_v62 = vrot.slane %v483_v55, %v2247_v20  ;;  %v493_v34 = vcombine.high %v483_v55, %v483_v55 }
 0x106   : > { %v759_v51 = vmul.f32 %v2253_v31, %v2033_v17  ;;  %v409_v17 = vrot.slane %v395_v60, %v2235_v40  ;;  %v460_v21 = vrot.slane %v446_v47, %v2235_v40  ;;  %v1165_v24 = vmul.f32 %v2049_v10, %v720_v27 }
 0x107   : > { %v2271_v14 = vrot.slane %v442_v61, %v2247_v20  ;;  %v758_v12 = vmul.f32 %v724_v19, %v2026_v2  ;;  %v2276_v5 = vrot.slane %v493_v34, %v2247_v20  ;;  %v1166_v27 = vmul.f32 %v2077_v7, %v724_v19 }
 0x108   : > { %v2279_v23 = vrot.slane %v409_v17, %v2235_v40  ;;  %v411_v2 = vcombine.high %v409_v17, %v409_v17 }
 0x109   : > { %1147 = vrot.lane.b32.xlu1 %v2140_v53, %s1834_s12 }
 0x10a   : > { %v2291_v10 = vrot.slane %v2279_v23, %v2247_v20 }
 0x137   : > { %v661_v18 = vpop.permute.xlu0 %660 }
 0x13b   : > { %v663_v26 = vpop.permute.xlu1 %662  ;;  %v685_v29 = vpop.permute.xlu0 %684 }
 0x13c   : > { %v709_v28 = vsel %vm708_vm9, %v661_v18, %v685_v29  ;;  %v2284_v29 = vrot.slane %v460_v21, %v2235_v40 }
 0x13d   : > { %v805_v57 = vmul.f32 %v768_v22, %v709_v28 }
 0x13f   : > { %v665_v42 = vpop.permute.xlu1 %664  ;;  %v689_v43 = vpop.permute.xlu0 %688  ;;  %v813_v50 = vadd.f32 %v805_v57, %v757_v39  ;;  %v760_v57 = vmul.f32 %v2271_v14, %v2052_v36  ;;  %v2299_v36 = vrot.slane %v411_v2, %v2235_v40 }
 0x140   : > { %v711_v46 = vsel %vm708_vm9, %v665_v42, %v689_v43 }
 0x141   : > { %v807_v52 = vmul.f32 %v2256_v35, %v711_v46  ;;  %v821_v9 = vmul.f32 0.35355338, %v813_v50  ;;  %v2296_v50 = vrot.slane %v2284_v29, %v2247_v20 }
 0x143   : > { %v815_v3 = vadd.f32 %v807_v52, %v759_v51  ;;  %v667_v56 = vpop.permute.xlu1 %666  ;;  %v1110_v59 = vpop.permute.xlu0 %1109  ;;  %v1731_v8 = vpack.c.bf16 %v821_v9, %v821_v9  ;;  %v462_v51 = vcombine.high %v460_v21, %v460_v21 }
 0x145   : > { %v823_v48 = vmul.f32 0.35355338, %v815_v3  ;;  %v861_v28 = vunpack.c.l.b16 %v1731_v8 }
 0x147   : > { %v687_v0 = vpop.permute.xlu1 %686  ;;  %v1134_v1 = vpop.permute.xlu0 %1133  ;;  %v1733_v32 = vpack.c.bf16 %v823_v48, %v823_v48  ;;  %v893_v52 = vrot.slane %v861_v28, 1  ;;  %v911_v55 = vrot.slane %v861_v28, 2 }
 0x148   : > { %v710_v25 = vsel %vm708_vm9, %v663_v26, %v687_v0  ;;  %v1157_v54 = vsel %vm708_vm9, %v1110_v59, %v1134_v1  ;;  %v929_v59 = vrot.slane %v861_v28, 3 }
 0x149   : > { %v806_v63 = vmul.f32 %v772_v62, %v710_v25  ;;  %v1173_v13 = vmul.f32 %v1157_v54, %v768_v22  ;;  %v863_v38 = vunpack.c.l.b16 %v1733_v32 }
 0x14b   : > { %v814_v15 = vadd.f32 %v806_v63, %v758_v12  ;;  %v691_v16 = vpop.permute.xlu1 %690  ;;  %v669_v18 = vpop.permute.xlu0 %668  ;;  %v1181_v39 = vadd.f32 %v1173_v13, %v1165_v24  ;;  %v872_v60 = vrot.slane %v863_v38, 6  ;;  %v895_v61 = vrot.slane %v863_v38, 7 }
 0x14c   : > { %v712_v26 = vsel %vm708_vm9, %v667_v56, %v691_v16  ;;  %v932_v1 = vrot.slane %v863_v38, 1 }
 0x14d   : > { %v822_v30 = vmul.f32 0.35355338, %v814_v15  ;;  %v808_v22 = vmul.f32 %v2276_v5, %v712_v26  ;;  %v1739_v47 = vpack.c.bf16 %v1181_v39, %v1181_v39 }
 0x14f   : > { %v1732_v42 = vpack.c.bf16 %v822_v30, %v822_v30  ;;  %v816_v43 = vadd.f32 %v808_v22, %v760_v57  ;;  %v1112_v46 = vpop.permute.xlu1 %1111  ;;  %v1114_v49 = vpop.permute.xlu0 %1113  ;;  %v1221_v24 = vunpack.c.l.b16 %v1739_v47  ;;  %v2311_v57 = vrot.slane %v462_v51, %v2235_v40 }
 0x151   : > { %v862_v3 = vunpack.c.l.b16 %v1732_v42  ;;  %v824_v56 = vmul.f32 0.35355338, %v816_v43 }
 0x153   : > { %v869_v9 = vrot.slane %v862_v3, 7  ;;  %v894_v34 = vsel %vm870_vm2, %v862_v3, %v893_v52  ;;  %v912_v7 = vrot.slane %v862_v3, 1  ;;  %v930_v19 = vrot.slane %v862_v3, 2  ;;  %v1136_v48 = vpop.permute.xlu1 %1135  ;;  %v671_v0 = vpop.permute.xlu0 %670 }
 0x154   : > { %v896_v17 = vsel %vm873_vm3, %v895_v61, %v894_v34  ;;  %v1734_v25 = vpack.c.bf16 %v824_v56, %v824_v56  ;;  %v1158_v54 = vsel %vm708_vm9, %v1112_v46, %v1136_v48  ;;  %v2319_v46 = vrot.slane %v2299_v36, %v2247_v20 }
 0x155   : > { %v871_v21 = vsel %vm870_vm2, %v869_v9, %v861_v28  ;;  %v913_v8 = vsel %vm870_vm2, %v912_v7, %v911_v55  ;;  %v931_v12 = vsel %vm870_vm2, %v930_v19, %v929_v59  ;;  %v1174_v63 = vmul.f32 %v1158_v54, %v772_v62 }
 0x156   : > { %v864_v32 = vunpack.c.l.b16 %v1734_v25  ;;  %v874_v13 = vsel %vm873_vm3, %v872_v60, %v871_v21  ;;  %v914_v15 = vsel %vm873_vm3, %v863_v38, %v913_v8  ;;  %v933_v16 = vsel %vm873_vm3, %v932_v1, %v931_v12 }
 0x157   : > { %v1182_v26 = vadd.f32 %v1174_v63, %v1166_v27  ;;  %v693_v2 = vpop.permute.xlu1 %692  ;;  %v1116_v30 = vpop.permute.xlu0 %1115  ;;  %v761_v38 = vmul.f32 %v2291_v10, %v2064_v58  ;;  %v1246_v55 = vrot.slane %v1221_v24, 1  ;;  %v441_v58 = vcombine.high %v2279_v23, %v2279_v23 }
 0x158   : > { %v875_v28 = vrot.slane %v864_v32, 5  ;;  %v897_v22 = vrot.slane %v864_v32, 6  ;;  %v915_v39 = vrot.slane %v864_v32, 7  ;;  %v934_v42 = vsel %vm876_vm4, %v864_v32, %v933_v16 }
 0x159   : > { %v1740_v62 = vpack.c.bf16 %v1182_v26, %v1182_v26  ;;  %v713_v43 = vsel %vm708_vm9, %v669_v18, %v693_v2  ;;  %v2327_v18 = vrot.slane %v2311_v57, %v2247_v20  ;;  %v1264_v59 = vrot.slane %v1221_v24, 2 }
 0x15a   : > { %v877_v27 = vsel %vm876_vm4, %v875_v28, %v874_v13  ;;  %v898_v40 = vsel %vm876_vm4, %v897_v22, %v896_v17  ;;  %v916_v51 = vsel %vm876_vm4, %v915_v39, %v914_v15  ;;  %v809_v52 = vmul.f32 %v2296_v50, %v713_v43 }
 0x15b   : > { %v1222_v3 = vunpack.c.l.b16 %v1740_v62  ;;  %v1138_v56 = vpop.permute.xlu1 %1137  ;;  %v1282_v60 = vrot.slane %v1221_v24, 3  ;;  %v673_v48 = vpop.permute.xlu0 %672  ;;  %v1167_v17 = vmul.f32 %v2073_v6, %v2253_v31  ;;  %v762_v13 = vmul.f32 %v2319_v46, %v2084_v11 }
 0x15c   : > { %v817_v61 = vadd.f32 %v809_v52, %v761_v38  ;;  %v1159_v47 = vsel %vm708_vm9, %v1114_v49, %v1138_v56  ;;  %v2340_v49 = vrot.slane %v441_v58, %v2247_v20  ;;  %v492_v31 = vcombine.high %v2284_v29, %v2284_v29 }
 0x15d   : > { %v1229_v9 = vrot.slane %v1222_v3, 7  ;;  %v1247_v34 = vsel %vm870_vm2, %v1222_v3, %v1246_v55  ;;  %v1265_v7 = vrot.slane %v1222_v3, 1  ;;  %v1283_v19 = vrot.slane %v1222_v3, 2 }
 0x15e   : > { %v825_v1 = vmul.f32 0.35355338, %v817_v61  ;;  %v1175_v25 = vmul.f32 %v1159_v47, %v2256_v35  ;;  %v763_v28 = vmul.f32 %v2340_v49, %v2100_v33  ;;  %v2354_v29 = vrot.slane %v492_v31, %v2247_v20 }
 0x15f   : > { %v1230_v54 = vsel %vm870_vm2, %v1229_v9, %v1221_v24  ;;  %v1266_v23 = vsel %vm870_vm2, %v1265_v7, %v1264_v59  ;;  %v695_v21 = vpop.permute.xlu1 %694  ;;  %v1284_v8 = vsel %vm870_vm2, %v1283_v19, %v1282_v60  ;;  %v1168_v24 = vmul.f32 %v2092_v4, %v2271_v14  ;;  %v1118_v2 = vpop.permute.xlu0 %1117 }
 0x160   : > { %v1735_v12 = vpack.c.bf16 %v825_v1, %v825_v1  ;;  %v1183_v63 = vadd.f32 %v1175_v25, %v1167_v17  ;;  %v714_v32 = vsel %vm708_vm9, %v671_v0, %v695_v21 }
 0x161   : > { %v810_v6 = vmul.f32 %v2327_v18, %v714_v32 }
 0x162   : > { %v865_v35 = vunpack.c.l.b16 %v1735_v12  ;;  %v1741_v15 = vpack.c.bf16 %v1183_v63, %v1183_v63 }
 0x163   : > { %v818_v16 = vadd.f32 %v810_v6, %v762_v13  ;;  %v1140_v26 = vpop.permute.xlu1 %1139  ;;  %v675_v9 = vpop.permute.xlu0 %674 }
 0x164   : > { %v878_v0 = vrot.slane %v865_v35, 4  ;;  %v899_v22 = vrot.slane %v865_v35, 5  ;;  %v917_v39 = vrot.slane %v865_v35, 6  ;;  %v935_v11 = vrot.slane %v865_v35, 7 }
 0x165   : > { %v1223_v62 = vunpack.c.l.b16 %v1741_v15  ;;  %v826_v43 = vmul.f32 0.35355338, %v818_v16  ;;  %v1160_v38 = vsel %vm708_vm9, %v1116_v30, %v1140_v26 }
 0x166   : > { %v880_v52 = vsel %vm879_vm5, %v878_v0, %v877_v27  ;;  %v900_v4 = vsel %vm879_vm5, %v899_v22, %v898_v40  ;;  %v918_v14 = vsel %vm879_vm5, %v917_v39, %v916_v51  ;;  %v936_v55 = vsel %vm879_vm5, %v935_v11, %v934_v42 }
 0x167   : > { %v1231_v33 = vrot.slane %v1223_v62, 6  ;;  %v1248_v3 = vrot.slane %v1223_v62, 7  ;;  %v1267_v56 = vsel %vm873_vm3, %v1223_v62, %v1266_v23  ;;  %v1285_v58 = vrot.slane %v1223_v62, 1  ;;  %v697_v59 = vpop.permute.xlu1 %696  ;;  %v1120_v35 = vpop.permute.xlu0 %1119 }
 0x168   : > { %v1736_v60 = vpack.c.bf16 %v826_v43, %v826_v43  ;;  %v1176_v30 = vmul.f32 %v1160_v38, %v2276_v5  ;;  %v715_v61 = vsel %vm708_vm9, %v673_v48, %v697_v59  ;;  %v494_v27 = vcombine.high %v2311_v57, %v2311_v57 }
 0x169   : > { %v1232_v40 = vsel %vm873_vm3, %v1231_v33, %v1230_v54  ;;  %v1249_v51 = vsel %vm873_vm3, %v1248_v3, %v1247_v34  ;;  %v1286_v42 = vsel %vm873_vm3, %v1285_v58, %v1284_v8  ;;  %v811_v47 = vmul.f32 %v2354_v29, %v715_v61 }
 0x16a   : > { %v866_v7 = vunpack.c.l.b16 %v1736_v60  ;;  %v1184_v19 = vadd.f32 %v1176_v30, %v1168_v24  ;;  %v443_v5 = vcombine.high %v2299_v36, %v2299_v36  ;;  %v796_v8 = vrot.slane %v494_v27, %v2247_v20 }
 0x16b   : > { %v819_v1 = vadd.f32 %v811_v47, %v763_v28  ;;  %v1142_v17 = vpop.permute.xlu1 %1141  ;;  %v1169_v24 = vmul.f32 %v2108_v37, %v2291_v10  ;;  %v1122_v3 = vpop.permute.xlu0 %1121 }
 0x16c   : > { %v881_v48 = vrot.slane %v866_v7, 3  ;;  %v901_v25 = vrot.slane %v866_v7, 4  ;;  %v919_v23 = vrot.slane %v866_v7, 5  ;;  %v937_v57 = vrot.slane %v866_v7, 6 }
 0x16d   : > { %v1742_v21 = vpack.c.bf16 %v1184_v19, %v1184_v19  ;;  %v827_v54 = vmul.f32 0.35355338, %v819_v1  ;;  %v1161_v34 = vsel %vm708_vm9, %v1118_v2, %v1142_v17  ;;  %v748_v15 = vrot.slane %v443_v5, %v2247_v20 }
 0x16e   : > { %v883_v12 = vsel %vm882_vm6, %v881_v48, %v880_v52  ;;  %v902_v63 = vsel %vm882_vm6, %v901_v25, %v900_v4  ;;  %v920_v32 = vsel %vm882_vm6, %v919_v23, %v918_v14  ;;  %v938_v13 = vsel %vm882_vm6, %v937_v57, %v936_v55 }
 0x16f   : > { %v1224_v6 = vunpack.c.l.b16 %v1742_v21  ;;  %v1737_v36 = vpack.c.bf16 %v827_v54, %v827_v54  ;;  %v1177_v31 = vmul.f32 %v1161_v34, %v2296_v50  ;;  %v699_v16 = vpop.permute.xlu1 %698  ;;  %v764_v38 = vmul.f32 %v748_v15, %v2116_v41 }
 0x170   : > { %v716_v26 = vsel %vm708_vm9, %v675_v9, %v699_v16  ;;  %v1171_v5 = vmul.f32 %v2132_v45, %v2340_v49  ;;  %v1172_v45 = vmul.f32 %v2140_v53, %v748_v15 }
 0x171   : > { %v1233_v2 = vrot.slane %v1224_v6, 5  ;;  %v1250_v28 = vrot.slane %v1224_v6, 6  ;;  %v1268_v0 = vrot.slane %v1224_v6, 7  ;;  %v1287_v22 = vsel %vm876_vm4, %v1224_v6, %v1286_v42 }
 0x172   : > { %v867_v39 = vunpack.c.l.b16 %v1737_v36  ;;  %v1185_v11 = vadd.f32 %v1177_v31, %v1169_v24  ;;  %v812_v62 = vmul.f32 %v796_v8, %v716_v26 }
 0x173   : > { %v1234_v43 = vsel %vm876_vm4, %v1233_v2, %v1232_v40  ;;  %v1251_v50 = vsel %vm876_vm4, %v1250_v28, %v1249_v51  ;;  %v1269_v20 = vsel %vm876_vm4, %v1268_v0, %v1267_v56  ;;  %v1144_v52 = vpop.permute.xlu1 %1143  ;;  %v1170_v51 = vmul.f32 %v2124_v44, %v2319_v46  ;;  %v1124_v46 = vpop.permute.xlu0 %1123 }
 0x174   : > { %v884_v37 = vrot.slane %v867_v39, 2  ;;  %v903_v10 = vrot.slane %v867_v39, 3  ;;  %v921_v4 = vrot.slane %v867_v39, 4  ;;  %v939_v14 = vrot.slane %v867_v39, 5 }
 0x175   : > { %v1743_v55 = vpack.c.bf16 %v1185_v11, %v1185_v11  ;;  %v820_v33 = vadd.f32 %v812_v62, %v764_v38  ;;  %v1162_v58 = vsel %vm708_vm9, %v1120_v35, %v1144_v52 }
 0x176   : > { %v886_v59 = vsel %vm885_vm7, %v884_v37, %v883_v12  ;;  %v904_v60 = vsel %vm885_vm7, %v903_v10, %v902_v63  ;;  %v922_v30 = vsel %vm885_vm7, %v921_v4, %v920_v32  ;;  %v940_v56 = vsel %vm885_vm7, %v939_v14, %v938_v13 }
 0x177   : > { %v1225_v61 = vunpack.c.l.b16 %v1743_v55  ;;  %v828_v41 = vmul.f32 0.35355338, %v820_v33  ;;  %v1178_v27 = vmul.f32 %v1162_v58, %v2327_v18  ;;  %v1146_v40 = vpop.permute.xlu1 %1145 }
 0x178   : > { %v1163_v42 = vsel %vm708_vm9, %v1122_v3, %v1146_v40 }
 0x179   : > { %v1235_v47 = vrot.slane %v1225_v61, 4  ;;  %v1252_v9 = vrot.slane %v1225_v61, 5  ;;  %v1270_v7 = vrot.slane %v1225_v61, 6  ;;  %v1288_v19 = vrot.slane %v1225_v61, 7 }
 0x17a   : > { %v1738_v1 = vpack.c.bf16 %v828_v41, %v828_v41  ;;  %v1186_v17 = vadd.f32 %v1178_v27, %v1170_v51  ;;  %v1179_v48 = vmul.f32 %v1163_v42, %v2354_v29 }
 0x17b   : > { %v1236_v25 = vsel %vm879_vm5, %v1235_v47, %v1234_v43  ;;  %v1253_v18 = vsel %vm879_vm5, %v1252_v9, %v1251_v50  ;;  %v1271_v23 = vsel %vm879_vm5, %v1270_v7, %v1269_v20  ;;  %v1289_v44 = vsel %vm879_vm5, %v1288_v19, %v1287_v22  ;;  %v1148_v57 = vpop.permute.xlu1 %1147 }
 0x17c   : > { %v868_v21 = vunpack.c.l.b16 %v1738_v1  ;;  %v1744_v54 = vpack.c.bf16 %v1186_v17, %v1186_v17  ;;  %v1187_v34 = vadd.f32 %v1179_v48, %v1171_v5  ;;  %v1164_v12 = vsel %vm708_vm9, %v1124_v46, %v1148_v57 }
 0x17d   : > { %v1180_v49 = vmul.f32 %v1164_v12, %v796_v8 }
 0x17e   : > { %v887_v29 = vrot.slane %v868_v21, 1  ;;  %v905_v63 = vrot.slane %v868_v21, 2  ;;  %v923_v32 = vrot.slane %v868_v21, 3  ;;  %v941_v13 = vrot.slane %v868_v21, 4 }
 0x17f   : > { %v1226_v6 = vunpack.c.l.b16 %v1744_v54  ;;  %v1745_v36 = vpack.c.bf16 %v1187_v34, %v1187_v34  ;;  %v1188_v31 = vadd.f32 %v1180_v49, %v1172_v45 }
 0x180   : > { %v889_v35 = vsel %vm888_vm8, %v887_v29, %v886_v59  ;;  %v906_v16 = vsel %vm888_vm8, %v905_v63, %v904_v60  ;;  %v924_v24 = vsel %vm888_vm8, %v923_v32, %v922_v30  ;;  %v942_v53 = vsel %vm888_vm8, %v941_v13, %v940_v56 }
 0x181   : > { %v890_v8 = vpack.c.b16 %v889_v35, %v889_v35  ;;  %v907_v15 = vpack.c.b16 %v906_v16, %v906_v16  ;;  %v925_v26 = vpack.c.b16 %v924_v24, %v924_v24  ;;  %v943_v2 = vpack.c.b16 %v942_v53, %v942_v53 }
 0x182   : > { %v1237_v28 = vrot.slane %v1226_v6, 3  ;;  %v1254_v0 = vrot.slane %v1226_v6, 4  ;;  %v1272_v22 = vrot.slane %v1226_v6, 5  ;;  %v1290_v39 = vrot.slane %v1226_v6, 6 }
 0x183   : > { %892 = vst.msk [vmem:[%s376_s28] sm:$0xf] %vm519_vm0, %v890_v8  ;;  %1685 = vst.msk [vmem:[%s376_s28 + $0x4] sm:$0xf] %vm519_vm0, %v907_v15  ;;  %v1227_v11 = vunpack.c.l.b16 %v1745_v36  ;;  %v1746_v62 = vpack.c.bf16 %v1188_v31, %v1188_v31 }
 0x184   : > { %1686 = vst.msk [vmem:[%s376_s28 + $0x8] sm:$0xf] %vm519_vm0, %v925_v26  ;;  %1687 = vst.msk [vmem:[%s376_s28 + $0xc] sm:$0xf] %vm519_vm0, %v943_v2  ;;  %v1238_v43 = vsel %vm882_vm6, %v1237_v28, %v1236_v25  ;;  %v1255_v50 = vsel %vm882_vm6, %v1254_v0, %v1253_v18  ;;  %v1273_v20 = vsel %vm882_vm6, %v1272_v22, %v1271_v23 }
 0x185   : > { %v1291_v38 = vsel %vm882_vm6, %v1290_v39, %v1289_v44  ;;  %v1239_v52 = vrot.slane %v1227_v11, 2  ;;  %v1256_v37 = vrot.slane %v1227_v11, 3  ;;  %v1274_v10 = vrot.slane %v1227_v11, 4 }
 0x186   : > { %v1292_v4 = vrot.slane %v1227_v11, 5  ;;  %v1228_v14 = vunpack.c.l.b16 %v1746_v62 }
 0x187   : > { %v1240_v55 = vsel %vm885_vm7, %v1239_v52, %v1238_v43  ;;  %v1257_v33 = vsel %vm885_vm7, %v1256_v37, %v1255_v50  ;;  %v1275_v3 = vsel %vm885_vm7, %v1274_v10, %v1273_v20 }
 0x188   : > { %v1293_v58 = vsel %vm885_vm7, %v1292_v4, %v1291_v38  ;;  %v1241_v59 = vrot.slane %v1228_v14, 1  ;;  %v1258_v60 = vrot.slane %v1228_v14, 2  ;;  %v1276_v30 = vrot.slane %v1228_v14, 3 }
 0x189   : > { %v1294_v56 = vrot.slane %v1228_v14, 4 }
 0x18a   : > { %v1242_v61 = vsel %vm888_vm8, %v1241_v59, %v1240_v55  ;;  %v1259_v41 = vsel %vm888_vm8, %v1258_v60, %v1257_v33  ;;  %v1277_v27 = vsel %vm888_vm8, %v1276_v30, %v1275_v3 }
 0x18b   : > { %v1295_v40 = vsel %vm888_vm8, %v1294_v56, %v1293_v58  ;;  %v1243_v51 = vpack.c.b16 %v1242_v61, %v1242_v61  ;;  %v1260_v42 = vpack.c.b16 %v1259_v41, %v1259_v41  ;;  %v1278_v47 = vpack.c.b16 %v1277_v27, %v1277_v27 }
 0x18c   : > { %v1296_v9 = vpack.c.b16 %v1295_v40, %v1295_v40 }
 0x18d   : > { %1245 = vst.msk [vmem:[%s384_s8] sm:$0xf] %vm519_vm0, %v1243_v51  ;;  %1704 = vst.msk [vmem:[%s384_s8 + $0x4] sm:$0xf] %vm519_vm0, %v1260_v42 }
 0x18e   : > { %1705 = vst.msk [vmem:[%s384_s8 + $0x8] sm:$0xf] %vm519_vm0, %v1278_v47  ;;  %1706 = vst.msk [vmem:[%s384_s8 + $0xc] sm:$0xf] %vm519_vm0, %v1296_v9 }
 0x18f PF: > { %s18_s26 = sadd.s32 1, %s1831_s26   ;;  %s2454_s24 = smov %s1827_s25 }
 0x190   : > { %p15_p5 = scmp.ge.s32.totalorder %s18_s26, 4   ;;  %s2455_s25 = smov %s2457_s27 }
 0x192   :  { %17 = sbr.rel (!%p15_p5) target bundleno = 2 (0x2), region = 111 }

// kernel: wan_attention_block.16
= control target key start
LH: loop header
LB: loop body
LE: loop exit
PB: predicated region body
PF: predicated region fallthrough
CT: control target
= control target key end

     0   :  { %s687_s18 = smov 0   ;;  %s689_s19 = smov 0   ;;  %s747_s0 = inlined_call_operand.vmem [shape: bf16[2,8,32], index: 0, kind: input, shape index: {}]   ;;  %s748_s1 = inlined_call_operand.vmem [shape: bf16[32,32], index: 1, kind: input, shape index: {}]   ;;  %s749_s2 = inlined_call_operand.vmem [shape: f32[1,32], index: 2, kind: input, shape index: {}]   ;;  %s750_s3 = inlined_call_operand.vmem [shape: f32[1,32], index: 3, kind: input, shape index: {}]   ;;  %s751_s4 = inlined_call_operand.vmem [shape: f32[1,32], index: 4, kind: input, shape index: {}]   ;;  %s752_s5 = inlined_call_operand.vmem [shape: bf16[2,8,32], index: 5, kind: output, shape index: {}]  }
   0x1   :  { %s691_s20 = smov 0  }
   0x2 LB: > { %s41_s21 = sadd.s32 1, %s649_s19  ;;  %p579_p0 = scmp.ge.s32.totalorder %s653_s20, 1  ;;  %s653_s20 = sphi %s691_s20, %s15_s20   ;;  %s649_s19 = sphi %s689_s19, %s754_s19   ;;  %s645_s18 = sphi %s687_s18, %s753_s18  }
   0x3   : > { %p43_p1 = scmp.ge.s32.totalorder %s41_s21, 2  ;;  %p250_p2 = scmp.lt.s32.totalorder %s653_s20, 3 }
   0x5   : > { %s756_s21 = smov (%p43_p1, %s41_s21), 0  ;;  %p251_p3 = pnand %p579_p0, %p250_p2 }
   0x6   : > { %p299_p4 = scmp.lt.s32.totalorder (!%p251_p3), %s645_s18, 1 }
   0x7   : > { %254 = sbr.rel (%p251_p3) target bundleno = 536 (0x218), region = 40 }
   0xc   : > { %s758_s18 = smov (!%p299_p4, %s645_s18), 1  ;;  %vm336_vm0 = vcmask 261120   ;;  %v627_v8 = vld [vmem:[%s748_s1 + $0x8] sm:$0xff]   ;;  %v655_v9 = vmov 0.0   ;;  %vm656_vm1 = vmmov 0   ;;  %v628_v10 = vld [vmem:[%s748_s1] sm:$0xff]  }
   0xd   : > { %s580_s22 = sshll.u32 %s758_s18, 2  ;;  %337 = vst.msk [vmem:[#allocation2] sm:$0xff] %vm336_vm0, %v655_v9  ;;  %593 = vmatprep.subr.bf16.mxu0 %v655_v9  ;;  %597 = vmatprep.mubr.msk.bf16.mxu0 %vm656_vm1, %v655_v9  ;;  %v582_v15 = vld [vmem:[%s750_s3] ss:$0 sm:$0xff]  ;;  %vm447_vm2 = vcmask 257024  }
   0xe   : > { %s308_s25 = scalar_lea.vmem %s747_s0, %s580_s22  ;;  %594 = vmatpush3.bf16.msra.mxu0 %v627_v8  ;;  %v583_v17 = vld [vmem:[%s751_s4] ss:$0 sm:$0xff]  ;;  %s330_s13 = scalar_lea.vmem %s752_s5, %s580_s22 }
   0xf   : > { %v338_v0 = vld [vmem:[%s308_s25] sm:$0xf]  ;;  %595 = vmatprep.subr.bf16.mxu0 %v655_v9 }
  0x10   : > { %v339_v1 = vunpack.c.l.bf16 %v338_v0  ;;  %v587_v27 = vld [vmem:[%s749_s2] ss:$0 sm:$0xff] }
  0x12   : > { %v341_v2 = vsel %vm336_vm0, %v339_v1, 0.0  ;;  %596 = vmatpush3.bf16.msra.mxu0 %v628_v10 }
  0x13   : > { %342 = vadd.xlane.f32.xlu0 %v341_v2 }
  0x14   : > { %v372_v21 = vld [vmem:[#allocation2] sm:$0xff] }
  0x9c   : > { %v343_v3 = vpop.xlane.xlu0 %342 }
  0x9d   : > { %v345_v4 = vmul.f32 0.03125, %v343_v3 }
  0x9f   : > { %v346_v5 = vsub.f32 %v339_v1, %v345_v4 }
  0xa1   : > { %v347_v6 = vmul.f32 %v346_v5, %v346_v5 }
  0xa3   : > { %v348_v7 = vsel %vm336_vm0, %v347_v6, 0.0 }
  0xa4   : > { %349 = vadd.xlane.f32.xlu0 %v348_v7 }
 0x12d   : > { %v350_v11 = vpop.xlane.xlu0 %349 }
 0x12e   : > { %v351_v12 = vmul.f32 0.03125, %v350_v11 }
 0x130   : > { %v352_v13 = vadd.f32 1e-06, %v351_v12 }
 0x132   : > { %629 = vrsqrt.f32 %v352_v13 }
 0x13f   : > { %v630_v14 = vpop.eup %629 }
 0x140   : > { %v354_v16 = vmul.f32 %v630_v14, %v346_v5 }
 0x142   : > { %v362_v18 = vmul.f32 %v582_v15, %v354_v16 }
 0x144   : > { %v370_v19 = vadd.f32 %v583_v17, %v362_v18 }
 0x146   : > { %v371_v20 = vpack.c.bf16 %v370_v19, %v370_v19 }
 0x148   : > { %598 = vmatmul.mubr.msk.bf16.vlgmr.msra.gmra.mxu0 %vm336_vm0, %v371_v20 }
 0x208   : > { %v426_v22 = vpop.f32.mrf.mxu0 }
 0x209   : > { %v432_v23 = vadd.f32 %v426_v22, %v372_v21 }
 0x20a   : > { %v599_v24 = vpop.f32.mrf.mxu0 }
 0x20b   : > { %433 = vst.msk [vmem:[#allocation2] sm:$0xff] %vm336_vm0, %v432_v23 }
 0x20c   : > { %v429_v25 = vpop.f32.mrf.mxu0 }
 0x20e   : > { %v600_v26 = vpop.f32.mrf.mxu0 }
 0x212   : > { %v437_v28 = vld [vmem:[#allocation2] sm:$0xff] }
 0x213   : > { %v445_v29 = vadd.f32 %v587_v27, %v437_v28 }
 0x215   : > { %v446_v30 = vpack.c.bf16 %v445_v29, %v445_v29 }
 0x217   : > { %448 = vst.msk [vmem:[%s330_s13] sm:$0xf] %vm447_vm2, %v446_v30 }
 0x218 PF: > { %s15_s20 = sadd.s32 1, %s653_s20   ;;  %s753_s18 = smov %s649_s19 }
 0x219   : > { %p12_p5 = scmp.ge.s32.totalorder %s15_s20, 4   ;;  %s754_s19 = smov %s756_s21 }
 0x21b   :  { %14 = sbr.rel (!%p12_p5) target bundleno = 2 (0x2), region = 84 }

// kernel: wan_attention_block.18
= control target key start
LH: loop header
LB: loop body
LE: loop exit
PB: predicated region body
PF: predicated region fallthrough
CT: control target
= control target key end

     0   :  { %s657_s9 = smov 0   ;;  %s659_s10 = smov 0   ;;  %s788_s0 = inlined_call_operand.vmem [shape: bf16[2,8,1,4,8], index: 0, kind: input, shape index: {}]   ;;  %s789_s1 = inlined_call_operand.vmem [shape: f32[4,8], index: 1, kind: input, shape index: {}]   ;;  %s790_s2 = inlined_call_operand.vmem [shape: bf16[2,4,8,8], index: 2, kind: output, shape index: {}]  }
   0x1   :  { %s661_s11 = smov 0  }
   0x2 LB: > { %s24_s12 = sadd.s32 1, %s636_s10  ;;  %p550_p0 = scmp.ge.s32.totalorder %s640_s11, 1  ;;  %s640_s11 = sphi %s661_s11, %s12_s11   ;;  %s636_s10 = sphi %s659_s10, %s792_s10   ;;  %s632_s9 = sphi %s657_s9, %s791_s9  }
   0x3   : > { %p26_p1 = scmp.ge.s32.totalorder %s24_s12, 2  ;;  %p133_p2 = scmp.lt.s32.totalorder %s640_s11, 3 }
   0x5   : > { %s794_s12 = smov (%p26_p1, %s24_s12), 0  ;;  %p134_p3 = pnand %p550_p0, %p133_p2 }
   0x6   : > { %p163_p4 = scmp.lt.s32.totalorder (!%p134_p3), %s632_s9, 1 }
   0x7   : > { %137 = sbr.rel (%p134_p3) target bundleno = 227 (0xe3), region = 28 }
   0xc   : > { %s796_s9 = smov (!%p163_p4, %s632_s9), 1  ;;  %vm204_vm0 = vcmask 60416   ;;  %vm238_vm1 = vcmask 1043456   ;;  %vm386_vm2 = vcmask 1041409   ;;  %vm389_vm3 = vcmask 1042434  }
   0xd   : > { %s568_s13 = sshll.u32 %s796_s9, 4  ;;  %vm392_vm4 = vcmask 1043459   ;;  %vm395_vm5 = vcmask 1044484   ;;  %vm398_vm6 = vcmask 1045509   ;;  %vm401_vm7 = vcmask 1046534  }
   0xe   : > { %s170_s16 = scalar_lea.vmem %s788_s0, %s568_s13  ;;  %vm404_vm8 = vcmask 1047559   ;;  %s179_s21 = scalar_lea.vmem %s790_s2, %s568_s13 }
   0xf   : > { %v182_v0 = vld [vmem:[%s170_s16 + $0x4] sm:$0x3]  ;;  %v180_v1 = vld [vmem:[%s170_s16] sm:$0x3]  ;;  %v183_v2 = vld [vmem:[%s170_s16 + $0x6] sm:$0x3] }
  0x10   : > { %v683_v3 = vunpack.c.l.bf16 %v182_v0  ;;  %v685_v4 = vunpack.c.l.bf16 %v180_v1  ;;  %v687_v5 = vunpack.c.l.bf16 %v183_v2  ;;  %v181_v6 = vld [vmem:[%s170_s16 + $0x2] sm:$0x3]  ;;  %v185_v7 = vld [vmem:[%s170_s16 + $0xa] sm:$0x3]  ;;  %v184_v8 = vld [vmem:[%s170_s16 + $0x8] sm:$0x3] }
  0x11   : > { %v689_v9 = vunpack.c.l.bf16 %v181_v6  ;;  %v691_v10 = vunpack.c.l.bf16 %v185_v7  ;;  %v699_v14 = vunpack.c.l.bf16 %v184_v8  ;;  %v187_v15 = vld [vmem:[%s170_s16 + $0xe] sm:$0x3]  ;;  %v186_v17 = vld [vmem:[%s170_s16 + $0xc] sm:$0x3] }
  0x12   : > { %v198_v11 = vmul.f32 %v683_v3, %v683_v3  ;;  %v196_v12 = vmul.f32 %v685_v4, %v685_v4  ;;  %v199_v13 = vmul.f32 %v687_v5, %v687_v5  ;;  %v707_v21 = vunpack.c.l.bf16 %v187_v15 }
  0x13   : > { %v197_v16 = vmul.f32 %v689_v9, %v689_v9  ;;  %v201_v20 = vmul.f32 %v691_v10, %v691_v10  ;;  %v200_v24 = vmul.f32 %v699_v14, %v699_v14  ;;  %v713_v25 = vunpack.c.l.bf16 %v186_v17 }
  0x14   : > { %v211_v18 = vsel %vm204_vm0, %v198_v11, 0.0  ;;  %v205_v19 = vsel %vm204_vm0, %v196_v12, 0.0  ;;  %v214_v22 = vsel %vm204_vm0, %v199_v13, 0.0  ;;  %v203_v28 = vmul.f32 %v707_v21, %v707_v21 }
  0x15   : > { %212 = vadd.xlane.f32.xlu1 %v211_v18  ;;  %206 = vadd.xlane.f32.xlu0 %v205_v19  ;;  %v208_v23 = vsel %vm204_vm0, %v197_v16, 0.0  ;;  %v220_v26 = vsel %vm204_vm0, %v201_v20, 0.0  ;;  %v217_v27 = vsel %vm204_vm0, %v200_v24, 0.0  ;;  %v202_v29 = vmul.f32 %v713_v25, %v713_v25 }
  0x16   : > { %v226_v30 = vsel %vm204_vm0, %v203_v28, 0.0 }
  0x17   : > { %v223_v31 = vsel %vm204_vm0, %v202_v29, 0.0 }
  0x19   : > { %215 = vadd.xlane.f32.xlu1 %v214_v22  ;;  %209 = vadd.xlane.f32.xlu0 %v208_v23 }
  0x1d   : > { %221 = vadd.xlane.f32.xlu1 %v220_v26  ;;  %218 = vadd.xlane.f32.xlu0 %v217_v27 }
  0x21   : > { %227 = vadd.xlane.f32.xlu1 %v226_v30  ;;  %224 = vadd.xlane.f32.xlu0 %v223_v31 }
  0x9e   : > { %v213_v32 = vpop.xlane.xlu1 %212  ;;  %v207_v33 = vpop.xlane.xlu0 %206 }
  0x9f   : > { %v232_v34 = vmul.f32 0.125, %v213_v32  ;;  %v230_v35 = vmul.f32 0.125, %v207_v33 }
  0xa1   : > { %v253_v36 = vsel %vm238_vm1, %v232_v34, 0.0  ;;  %v239_v37 = vsel %vm238_vm1, %v230_v35, 0.0 }
  0xa2   : > { %v254_v38 = vrot.slane %v253_v36, 4  ;;  %v240_v39 = vrot.slane %v239_v37, 4  ;;  %v216_v40 = vpop.xlane.xlu1 %215  ;;  %v210_v41 = vpop.xlane.xlu0 %209 }
  0xa3   : > { %v233_v42 = vmul.f32 0.125, %v216_v40  ;;  %v231_v43 = vmul.f32 0.125, %v210_v41 }
  0xa4   : > { %v255_v44 = vadd.f32 %v254_v38, %v253_v36  ;;  %v241_v45 = vadd.f32 %v240_v39, %v239_v37 }
  0xa5   : > { %v260_v46 = vsel %vm238_vm1, %v233_v42, 0.0  ;;  %v246_v47 = vsel %vm238_vm1, %v231_v43, 0.0 }
  0xa6   : > { %v256_v48 = vrot.slane %v255_v44, 2  ;;  %v242_v49 = vrot.slane %v241_v45, 2  ;;  %v261_v50 = vrot.slane %v260_v46, 4  ;;  %v247_v51 = vrot.slane %v246_v47, 4  ;;  %v222_v52 = vpop.xlane.xlu1 %221  ;;  %v219_v53 = vpop.xlane.xlu0 %218 }
  0xa7   : > { %v235_v54 = vmul.f32 0.125, %v222_v52  ;;  %v234_v55 = vmul.f32 0.125, %v219_v53 }
  0xa8   : > { %v257_v56 = vadd.f32 %v256_v48, %v255_v44  ;;  %v243_v57 = vadd.f32 %v242_v49, %v241_v45  ;;  %v262_v58 = vadd.f32 %v261_v50, %v260_v46  ;;  %v248_v59 = vadd.f32 %v247_v51, %v246_v47 }
  0xa9   : > { %v274_v60 = vsel %vm238_vm1, %v235_v54, 0.0  ;;  %v267_v61 = vsel %vm238_vm1, %v234_v55, 0.0 }
  0xaa   : > { %v258_v62 = vrot.slane %v257_v56, 1  ;;  %v244_v63 = vrot.slane %v243_v57, 1  ;;  %v263_v0 = vrot.slane %v262_v58, 2  ;;  %v249_v1 = vrot.slane %v248_v59, 2  ;;  %v228_v2 = vpop.xlane.xlu1 %227  ;;  %v225_v6 = vpop.xlane.xlu0 %224 }
  0xab   : > { %v275_v7 = vrot.slane %v274_v60, 4  ;;  %v268_v8 = vrot.slane %v267_v61, 4  ;;  %v237_v11 = vmul.f32 0.125, %v228_v2  ;;  %v236_v12 = vmul.f32 0.125, %v225_v6 }
  0xac   : > { %v259_v13 = vadd.f32 %v258_v62, %v257_v56  ;;  %v245_v15 = vadd.f32 %v244_v63, %v243_v57  ;;  %v264_v16 = vadd.f32 %v263_v0, %v262_v58  ;;  %v250_v17 = vadd.f32 %v249_v1, %v248_v59  ;;  %v328_v1 = vld [vmem:[%s789_s1] sm:$0xf] }
  0xad   : > { %v276_v18 = vadd.f32 %v275_v7, %v274_v60  ;;  %v269_v19 = vadd.f32 %v268_v8, %v267_v61  ;;  %v288_v20 = vsel %vm238_vm1, %v237_v11, 0.0  ;;  %v281_v22 = vsel %vm238_vm1, %v236_v12, 0.0 }
  0xae   : > { %v298_v23 = vmul.f32 0.25, %v259_v13  ;;  %v296_v24 = vmul.f32 0.25, %v245_v15  ;;  %v265_v26 = vrot.slane %v264_v16, 1  ;;  %v251_v27 = vrot.slane %v250_v17, 1 }
  0xaf   : > { %v277_v28 = vrot.slane %v276_v18, 2  ;;  %v270_v29 = vrot.slane %v269_v19, 2  ;;  %v289_v30 = vrot.slane %v288_v20, 4  ;;  %v282_v31 = vrot.slane %v281_v22, 4 }
  0xb0   : > { %v306_v32 = vadd.f32 1e-06, %v298_v23  ;;  %v304_v33 = vadd.f32 1e-06, %v296_v24  ;;  %v266_v34 = vadd.f32 %v265_v26, %v264_v16  ;;  %v252_v35 = vadd.f32 %v251_v27, %v250_v17 }
  0xb1   : > { %v278_v36 = vadd.f32 %v277_v28, %v276_v18  ;;  %v271_v37 = vadd.f32 %v270_v29, %v269_v19  ;;  %v290_v38 = vadd.f32 %v289_v30, %v288_v20  ;;  %v283_v39 = vadd.f32 %v282_v31, %v281_v22 }
  0xb2   : > { %602 = vrsqrt.f32 %v306_v32  ;;  %v299_v40 = vmul.f32 0.25, %v266_v34  ;;  %v297_v41 = vmul.f32 0.25, %v252_v35 }
  0xb3   : > { %604 = vrsqrt.f32 %v304_v33  ;;  %v279_v42 = vrot.slane %v278_v36, 1  ;;  %v272_v43 = vrot.slane %v271_v37, 1  ;;  %v291_v44 = vrot.slane %v290_v38, 2 }
  0xb4   : > { %v307_v45 = vadd.f32 1e-06, %v299_v40  ;;  %v305_v46 = vadd.f32 1e-06, %v297_v41  ;;  %v284_v47 = vrot.slane %v283_v39, 2 }
  0xb5   : > { %v280_v48 = vadd.f32 %v279_v42, %v278_v36  ;;  %v273_v49 = vadd.f32 %v272_v43, %v271_v37  ;;  %v292_v50 = vadd.f32 %v291_v44, %v290_v38 }
  0xb6   : > { %606 = vrsqrt.f32 %v307_v45  ;;  %v285_v51 = vadd.f32 %v284_v47, %v283_v39 }
  0xb7   : > { %608 = vrsqrt.f32 %v305_v46  ;;  %v301_v52 = vmul.f32 0.25, %v280_v48  ;;  %v300_v53 = vmul.f32 0.25, %v273_v49  ;;  %v293_v54 = vrot.slane %v292_v50, 1 }
  0xb8   : > { %v286_v55 = vrot.slane %v285_v51, 1 }
  0xb9   : > { %v309_v56 = vadd.f32 1e-06, %v301_v52  ;;  %v308_v57 = vadd.f32 1e-06, %v300_v53  ;;  %v294_v58 = vadd.f32 %v293_v54, %v292_v50 }
  0xba   : > { %v287_v59 = vadd.f32 %v286_v55, %v285_v51 }
  0xbb   : > { %610 = vrsqrt.f32 %v309_v56  ;;  %v303_v60 = vmul.f32 0.25, %v294_v58 }
  0xbc   : > { %612 = vrsqrt.f32 %v308_v57  ;;  %v302_v62 = vmul.f32 0.25, %v287_v59 }
  0xbd   : > { %v311_v61 = vadd.f32 1e-06, %v303_v60 }
  0xbe   : > { %v310_v6 = vadd.f32 1e-06, %v302_v62 }
  0xbf   : > { %v603_v63 = vpop.eup %602  ;;  %614 = vrsqrt.f32 %v311_v61 }
  0xc0   : > { %v605_v0 = vpop.eup %604  ;;  %v322_v7 = vmul.f32 %v603_v63, %v683_v3  ;;  %616 = vrsqrt.f32 %v310_v6 }
  0xc1   : > { %v320_v2 = vmul.f32 %v605_v0, %v685_v4 }
  0xc2   : > { %v331_v16 = vmul.f32 %v328_v1, %v322_v7 }
  0xc3   : > { %v607_v8 = vpop.eup %606  ;;  %v329_v12 = vmul.f32 %v328_v1, %v320_v2 }
  0xc4   : > { %v609_v11 = vpop.eup %608  ;;  %v323_v13 = vmul.f32 %v607_v8, %v687_v5  ;;  %v339_v24 = vmul.f32 0.35355338, %v331_v16 }
  0xc5   : > { %v321_v15 = vmul.f32 %v609_v11, %v689_v9  ;;  %v337_v19 = vmul.f32 0.35355338, %v329_v12 }
  0xc6   : > { %v332_v22 = vmul.f32 %v328_v1, %v323_v13  ;;  %v572_v9 = vpack.c.bf16 %v339_v24, %v339_v24 }
  0xc7   : > { %v330_v17 = vmul.f32 %v328_v1, %v321_v15  ;;  %v570_v27 = vpack.c.bf16 %v337_v19, %v337_v19 }
  0xc8   : > { %v611_v18 = vpop.eup %610  ;;  %v340_v29 = vmul.f32 0.35355338, %v332_v22  ;;  %v379_v37 = vunpack.c.l.b16 %v572_v9 }
  0xc9   : > { %v613_v20 = vpop.eup %612  ;;  %v338_v23 = vmul.f32 0.35355338, %v330_v17  ;;  %v325_v4 = vmul.f32 %v611_v18, %v691_v10  ;;  %v377_v32 = vunpack.c.l.b16 %v570_v27 }
  0xca   : > { %v324_v28 = vmul.f32 %v613_v20, %v699_v14  ;;  %v573_v34 = vpack.c.bf16 %v340_v29, %v340_v29  ;;  %v388_v46 = vrot.slane %v379_v37, 6  ;;  %v411_v54 = vrot.slane %v379_v37, 7 }
  0xcb   : > { %v571_v26 = vpack.c.bf16 %v338_v23, %v338_v23  ;;  %v334_v31 = vmul.f32 %v328_v1, %v325_v4  ;;  %v427_v42 = vrot.slane %v377_v32, 2  ;;  %v445_v14 = vrot.slane %v377_v32, 3 }
  0xcc   : > { %v615_v3 = vpop.eup %614  ;;  %v333_v33 = vmul.f32 %v328_v1, %v324_v28  ;;  %v409_v47 = vrot.slane %v377_v32, 1  ;;  %v448_v55 = vrot.slane %v379_v37, 1 }
  0xcd   : > { %v327_v5 = vmul.f32 %v615_v3, %v707_v21  ;;  %v378_v30 = vunpack.c.l.b16 %v571_v26  ;;  %v617_v36 = vpop.eup %616  ;;  %v342_v39 = vmul.f32 0.35355338, %v334_v31  ;;  %v380_v21 = vunpack.c.l.b16 %v573_v34 }
  0xce   : > { %v341_v41 = vmul.f32 0.35355338, %v333_v33  ;;  %v326_v45 = vmul.f32 %v617_v36, %v713_v25 }
  0xcf   : > { %v336_v35 = vmul.f32 %v328_v1, %v327_v5  ;;  %v385_v38 = vrot.slane %v378_v30, 7  ;;  %v428_v10 = vrot.slane %v378_v30, 1  ;;  %v446_v40 = vrot.slane %v378_v30, 2 }
  0xd0   : > { %v574_v43 = vpack.c.bf16 %v341_v41, %v341_v41  ;;  %v575_v49 = vpack.c.bf16 %v342_v39, %v342_v39  ;;  %v335_v53 = vmul.f32 %v328_v1, %v326_v45  ;;  %v410_v56 = vsel %vm386_vm2, %v378_v30, %v409_v47 }
  0xd1   : > { %v344_v44 = vmul.f32 0.35355338, %v336_v35  ;;  %v387_v48 = vsel %vm386_vm2, %v385_v38, %v377_v32  ;;  %v429_v50 = vsel %vm386_vm2, %v428_v10, %v427_v42  ;;  %v447_v51 = vsel %vm386_vm2, %v446_v40, %v445_v14 }
  0xd2   : > { %v381_v52 = vunpack.c.l.b16 %v574_v43  ;;  %v391_v57 = vrot.slane %v380_v21, 5  ;;  %v413_v58 = vrot.slane %v380_v21, 6  ;;  %v390_v25 = vsel %vm389_vm3, %v388_v46, %v387_v48 }
  0xd3   : > { %v577_v59 = vpack.c.bf16 %v344_v44, %v344_v44  ;;  %v430_v60 = vsel %vm389_vm3, %v379_v37, %v429_v50  ;;  %v449_v61 = vsel %vm389_vm3, %v448_v55, %v447_v51  ;;  %v382_v62 = vunpack.c.l.b16 %v575_v49 }
  0xd4   : > { %v343_v63 = vmul.f32 0.35355338, %v335_v53  ;;  %v431_v0 = vrot.slane %v380_v21, 7  ;;  %v412_v2 = vsel %vm389_vm3, %v411_v54, %v410_v56  ;;  %v394_v1 = vrot.slane %v381_v52, 4 }
  0xd5   : > { %v393_v6 = vsel %vm392_vm4, %v391_v57, %v390_v25  ;;  %v415_v7 = vrot.slane %v381_v52, 5  ;;  %v433_v8 = vrot.slane %v381_v52, 6  ;;  %v451_v11 = vrot.slane %v381_v52, 7 }
  0xd6   : > { %v432_v12 = vsel %vm392_vm4, %v431_v0, %v430_v60  ;;  %v450_v13 = vsel %vm392_vm4, %v380_v21, %v449_v61  ;;  %v384_v15 = vunpack.c.l.b16 %v577_v59  ;;  %v414_v16 = vsel %vm392_vm4, %v413_v58, %v412_v2 }
  0xd7   : > { %v397_v17 = vrot.slane %v382_v62, 3  ;;  %v576_v18 = vpack.c.bf16 %v343_v63, %v343_v63  ;;  %v417_v19 = vrot.slane %v382_v62, 4  ;;  %v435_v20 = vrot.slane %v382_v62, 5 }
  0xd8   : > { %v453_v22 = vrot.slane %v382_v62, 6  ;;  %v396_v23 = vsel %vm395_vm5, %v394_v1, %v393_v6  ;;  %v416_v24 = vsel %vm395_vm5, %v415_v7, %v414_v16  ;;  %v434_v4 = vsel %vm395_vm5, %v433_v8, %v432_v12 }
  0xd9   : > { %v452_v26 = vsel %vm395_vm5, %v451_v11, %v450_v13  ;;  %v383_v3 = vunpack.c.l.b16 %v576_v18  ;;  %v403_v27 = vrot.slane %v384_v15, 1  ;;  %v421_v28 = vrot.slane %v384_v15, 2 }
  0xda   : > { %v439_v29 = vrot.slane %v384_v15, 3  ;;  %v457_v5 = vrot.slane %v384_v15, 4  ;;  %v399_v33 = vsel %vm398_vm6, %v397_v17, %v396_v23  ;;  %v418_v34 = vsel %vm398_vm6, %v417_v19, %v416_v24 }
  0xdb   : > { %v400_v9 = vrot.slane %v383_v3, 2  ;;  %v419_v30 = vrot.slane %v383_v3, 3  ;;  %v437_v31 = vrot.slane %v383_v3, 4  ;;  %v455_v32 = vrot.slane %v383_v3, 5 }
  0xdc   : > { %v436_v35 = vsel %vm398_vm6, %v435_v20, %v434_v4  ;;  %v454_v36 = vsel %vm398_vm6, %v453_v22, %v452_v26 }
  0xdd   : > { %v402_v37 = vsel %vm401_vm7, %v400_v9, %v399_v33  ;;  %v420_v38 = vsel %vm401_vm7, %v419_v30, %v418_v34  ;;  %v438_v39 = vsel %vm401_vm7, %v437_v31, %v436_v35  ;;  %v456_v10 = vsel %vm401_vm7, %v455_v32, %v454_v36 }
  0xde   : > { %v405_v40 = vsel %vm404_vm8, %v403_v27, %v402_v37  ;;  %v422_v41 = vsel %vm404_vm8, %v421_v28, %v420_v38  ;;  %v440_v42 = vsel %vm404_vm8, %v439_v29, %v438_v39  ;;  %v458_v14 = vsel %vm404_vm8, %v457_v5, %v456_v10 }
  0xdf   : > { %v406_v21 = vpack.c.b16 %v405_v40, %v405_v40  ;;  %v423_v43 = vpack.c.b16 %v422_v41, %v422_v41  ;;  %v441_v44 = vpack.c.b16 %v440_v42, %v440_v42  ;;  %v459_v45 = vpack.c.b16 %v458_v14, %v458_v14 }
  0xe1   : > { %408 = vst.msk [vmem:[%s179_s21] sm:$0xf] %vm204_vm0, %v406_v21  ;;  %563 = vst.msk [vmem:[%s179_s21 + $0x4] sm:$0xf] %vm204_vm0, %v423_v43 }
  0xe2   : > { %564 = vst.msk [vmem:[%s179_s21 + $0x8] sm:$0xf] %vm204_vm0, %v441_v44  ;;  %565 = vst.msk [vmem:[%s179_s21 + $0xc] sm:$0xf] %vm204_vm0, %v459_v45 }
  0xe3 PF: > { %s12_s11 = sadd.s32 1, %s640_s11   ;;  %s791_s9 = smov %s636_s10 }
  0xe4   : > { %p9_p5 = scmp.ge.s32.totalorder %s12_s11, 4   ;;  %s792_s10 = smov %s794_s12 }
  0xe6   :  { %11 = sbr.rel (!%p9_p5) target bundleno = 2 (0x2), region = 61 }

// kernel: wan_attention_block.17
= control target key start
LH: loop header
LB: loop body
LE: loop exit
PB: predicated region body
PF: predicated region fallthrough
CT: control target
= control target key end

     0   :  { %s646_s12 = smov 0   ;;  %s648_s13 = smov 0   ;;  %s693_s0 = inlined_call_operand.vmem [shape: bf16[2,12,32], index: 0, kind: input, shape index: {}]   ;;  %s694_s1 = inlined_call_operand.vmem [shape: bf16[32,64], index: 1, kind: input, shape index: {}]   ;;  %s695_s2 = inlined_call_operand.vmem [shape: f32[1,64], index: 2, kind: input, shape index: {}]   ;;  %s696_s3 = inlined_call_operand.vmem [shape: bf16[2,12,64], index: 3, kind: output, shape index: {}]  }
   0x1   :  { %s650_s14 = smov 0  }
   0x2 LB: > { %s39_s15 = sadd.s32 1, %s618_s13  ;;  %p542_p0 = scmp.ge.s32.totalorder %s622_s14, 1  ;;  %s622_s14 = sphi %s650_s14, %s13_s14   ;;  %s618_s13 = sphi %s648_s13, %s698_s13   ;;  %s614_s12 = sphi %s646_s12, %s697_s12  }
   0x3   : > { %p41_p1 = scmp.ge.s32.totalorder %s39_s15, 2  ;;  %p203_p2 = scmp.lt.s32.totalorder %s622_s14, 3 }
   0x5   : > { %s700_s15 = smov (%p41_p1, %s39_s15), 0  ;;  %p204_p3 = pnand %p542_p0, %p203_p2 }
   0x6   : > { %p253_p4 = scmp.lt.s32.totalorder (!%p204_p3), %s614_s12, 1 }
   0x7   : > { %207 = sbr.rel (%p204_p3) target bundleno = 233 (0xe9), region = 32 }
   0xc   : > { %v597_v0 = vld [vmem:[%s694_s1 + $0x8] sm:$0xff]   ;;  %v624_v1 = vmov 0.0   ;;  %v598_v2 = vld [vmem:[%s694_s1] sm:$0xff]   ;;  %vm625_vm0 = vmmov 0   ;;  %vm295_vm1 = vcmask 523264   ;;  %s702_s12 = smov (!%p253_p4, %s614_s12), 1 }
   0xd   : > { %563 = vmatprep.subr.bf16.mxu0 %v624_v1  ;;  %567 = vmatprep.mubr.msk.bf16.mxu0 %vm625_vm0, %v624_v1  ;;  %296 = vst.msk [vmem:[#allocation2] sm:$0xff] %vm295_vm1, %v624_v1  ;;  %s556_s20 = sshll.u32 %s702_s12, 3  ;;  %vm324_vm2 = vcmask 261120   ;;  %vm297_vm3 = vcmask 519168   ;;  %v551_v12 = vld [vmem:[%s695_s2] ss:$0 sm:$0xff] }
   0xe   : > { %564 = vmatpush3.bf16.msra.mxu0 %v597_v0  ;;  %s263_s23 = scalar_lea.vmem %s693_s0, %s556_s20  ;;  %298 = vst.msk [vmem:[#allocation2 + $0x8] sm:$0xf] %vm297_vm3, %v624_v1  ;;  %s288_s28 = scalar_lea.vmem %s696_s3, %s556_s20  ;;  %vm398_vm4 = vcmask 517120  }
   0xf   : > { %565 = vmatprep.subr.bf16.mxu0 %v624_v1  ;;  %v599_v3 = vld [vmem:[%s263_s23] sm:$0x3f]  }
  0x12   : > { %566 = vmatpush3.bf16.msra.mxu0 %v598_v2 }
  0x14   : > { %v301_v4 = vld [vmem:[#allocation2] sm:$0xff] }
  0x15   : > { %568 = vmatmul.mubr.msk.bf16.vlgmr.msra.gmra.mxu0 %vm324_vm2, %v599_v3  ;;  %v302_v8 = vld [vmem:[#allocation2 + $0x8] sm:$0xf] }
  0xd5   : > { %v362_v5 = vpop.f32.mrf.mxu0 }
  0xd6   : > { %v369_v6 = vadd.f32 %v362_v5, %v301_v4 }
  0xd7   : > { %v569_v7 = vpop.f32.mrf.mxu0 }
  0xd8   : > { %372 = vst.msk [vmem:[#allocation2] sm:$0xff] %vm295_vm1, %v369_v6 }
  0xd9   : > { %v365_v9 = vpop.f32.mrf.mxu0 }
  0xda   : > { %v370_v10 = vadd.f32 %v365_v9, %v302_v8 }
  0xdb   : > { %v570_v11 = vpop.f32.mrf.mxu0 }
  0xdc   : > { %374 = vst.msk [vmem:[#allocation2 + $0x8] sm:$0xf] %vm297_vm3, %v370_v10 }
  0xdf   : > { %v378_v13 = vld [vmem:[#allocation2] sm:$0xff] }
  0xe0   : > { %v387_v14 = vadd.f32 %v551_v12, %v378_v13 }
  0xe2   : > { %v558_v15 = vpack.c.bf16 %v387_v14, %v387_v14 }
  0xe3   : > { %v379_v16 = vld [vmem:[#allocation2 + $0x8] sm:$0xf] }
  0xe4   : > { %v388_v17 = vadd.f32 %v551_v12, %v379_v16  ;;  %397 = vst.msk [vmem:[%s288_s28] sm:$0xf] %vm297_vm3, %v558_v15 }
  0xe6   : > { %v559_v18 = vpack.c.bf16 %v388_v17, %v388_v17 }
  0xe8   : > { %399 = vst.msk [vmem:[%s288_s28 + $0x4] sm:$0x3] %vm398_vm4, %v559_v18 }
  0xe9 PF: > { %s13_s14 = sadd.s32 1, %s622_s14   ;;  %s697_s12 = smov %s618_s13 }
  0xea   : > { %p10_p5 = scmp.ge.s32.totalorder %s13_s14, 4   ;;  %s698_s13 = smov %s700_s15 }
  0xec   :  { %12 = sbr.rel (!%p10_p5) target bundleno = 2 (0x2), region = 76 }

// kernel: wan_attention_block.21
= control target key start
LH: loop header
LB: loop body
LE: loop exit
PB: predicated region body
PF: predicated region fallthrough
CT: control target
= control target key end

     0   :  { %s680_s15 = smov 0   ;;  %s682_s16 = smov 0   ;;  %s725_s0 = inlined_call_operand.vmem [shape: bf16[2,8,32], index: 0, kind: input, shape index: {}]   ;;  %s726_s1 = inlined_call_operand.vmem [shape: bf16[32,32], index: 1, kind: input, shape index: {}]   ;;  %s727_s2 = inlined_call_operand.vmem [shape: f32[1,32], index: 2, kind: input, shape index: {}]   ;;  %s728_s3 = inlined_call_operand.vmem [shape: bf16[2,8,32], index: 3, kind: input, shape index: {}, may-alias: {3,4}]   ;;  %s729_s4 = inlined_call_operand.vmem [shape: bf16[2,8,32], index: 4, kind: output, shape index: {}, may-alias: {3,4}]  }
   0x1   :  { %s684_s17 = smov 0  }
   0x2 LB: > { %s40_s18 = sadd.s32 1, %s647_s16  ;;  %p580_p0 = scmp.ge.s32.totalorder %s651_s17, 1  ;;  %s651_s17 = sphi %s684_s17, %s14_s17   ;;  %s647_s16 = sphi %s682_s16, %s731_s16   ;;  %s643_s15 = sphi %s680_s15, %s730_s15  }
   0x3   : > { %p42_p1 = scmp.ge.s32.totalorder %s40_s18, 2  ;;  %p244_p2 = scmp.lt.s32.totalorder %s651_s17, 3 }
   0x5   : > { %s733_s18 = smov (%p42_p1, %s40_s18), 0  ;;  %p245_p3 = pnand %p580_p0, %p244_p2 }
   0x6   : > { %p301_p4 = scmp.lt.s32.totalorder (!%p245_p3), %s643_s15, 1 }
   0x7   : > { %248 = sbr.rel (%p245_p3) target bundleno = 231 (0xe7), region = 36 }
   0xc   : > { %v627_v0 = vld [vmem:[%s726_s1 + $0x8] sm:$0xff]   ;;  %v653_v1 = vmov 0.0   ;;  %v628_v2 = vld [vmem:[%s726_s1] sm:$0xff]   ;;  %vm654_vm0 = vmmov 0   ;;  %vm348_vm1 = vcmask 261120   ;;  %s735_s15 = smov (!%p301_p4, %s643_s15), 1 }
   0xd   : > { %593 = vmatprep.subr.bf16.mxu0 %v653_v1  ;;  %597 = vmatprep.mubr.msk.bf16.mxu0 %vm654_vm0, %v653_v1  ;;  %349 = vst.msk [vmem:[#allocation2] sm:$0xff] %vm348_vm1, %v653_v1  ;;  %s581_s23 = sshll.u32 %s735_s15, 2  ;;  %v587_v11 = vld [vmem:[%s727_s2] ss:$0 sm:$0xff]  ;;  %vm430_vm2 = vcmask 257024  }
   0xe   : > { %594 = vmatpush3.bf16.msra.mxu0 %v627_v0  ;;  %s310_s26 = scalar_lea.vmem %s725_s0, %s581_s23  ;;  %s332_s29 = scalar_lea.vmem %s728_s3, %s581_s23 }
   0xf   : > { %595 = vmatprep.subr.bf16.mxu0 %v653_v1  ;;  %v350_v3 = vld [vmem:[%s310_s26] sm:$0xf]  ;;  %s342_s8 = scalar_lea.vmem %s729_s4, %s581_s23 }
  0x10   : > { %v426_v9 = vld [vmem:[%s332_s29] sm:$0xf] }
  0x11   : > { %v427_v12 = vunpack.c.l.bf16 %v426_v9 }
  0x12   : > { %596 = vmatpush3.bf16.msra.mxu0 %v628_v2 }
  0x14   : > { %v351_v4 = vld [vmem:[#allocation2] sm:$0xff] }
  0x15   : > { %598 = vmatmul.mubr.msk.bf16.vlgmr.msra.gmra.mxu0 %vm348_vm1, %v350_v3 }
  0xd5   : > { %v406_v5 = vpop.f32.mrf.mxu0 }
  0xd6   : > { %v412_v6 = vadd.f32 %v406_v5, %v351_v4 }
  0xd7   : > { %v599_v7 = vpop.f32.mrf.mxu0 }
  0xd8   : > { %413 = vst.msk [vmem:[#allocation2] sm:$0xff] %vm348_vm1, %v412_v6 }
  0xd9   : > { %v409_v8 = vpop.f32.mrf.mxu0 }
  0xdb   : > { %v600_v10 = vpop.f32.mrf.mxu0 }
  0xdf   : > { %v417_v13 = vld [vmem:[#allocation2] sm:$0xff] }
  0xe0   : > { %v425_v14 = vadd.f32 %v587_v11, %v417_v13 }
  0xe2   : > { %v428_v15 = vadd.f32 %v427_v12, %v425_v14 }
  0xe4   : > { %v429_v16 = vpack.c.bf16 %v428_v15, %v428_v15 }
  0xe6   : > { %431 = vst.msk [vmem:[%s342_s8] sm:$0xf] %vm430_vm2, %v429_v16 }
  0xe7 PF: > { %s14_s17 = sadd.s32 1, %s651_s17   ;;  %s730_s15 = smov %s647_s16 }
  0xe8   : > { %p11_p5 = scmp.ge.s32.totalorder %s14_s17, 4   ;;  %s731_s16 = smov %s733_s18 }
  0xea   :  { %13 = sbr.rel (!%p11_p5) target bundleno = 2 (0x2), region = 83 }

// kernel: wan_attention_block.22
= control target key start
LH: loop header
LB: loop body
LE: loop exit
PB: predicated region body
PF: predicated region fallthrough
CT: control target
= control target key end

     0   :  { %s745_s18 = smov 0   ;;  %s747_s19 = smov 0   ;;  %s807_s0 = inlined_call_operand.vmem [shape: bf16[2,8,32], index: 0, kind: input, shape index: {}]   ;;  %s808_s1 = inlined_call_operand.vmem [shape: bf16[32,64], index: 1, kind: input, shape index: {}]   ;;  %s809_s2 = inlined_call_operand.vmem [shape: f32[1,64], index: 2, kind: input, shape index: {}]   ;;  %s810_s3 = inlined_call_operand.vmem [shape: f32[2,1,32], index: 3, kind: input, shape index: {}]   ;;  %s811_s4 = inlined_call_operand.vmem [shape: f32[2,1,32], index: 4, kind: input, shape index: {}]   ;;  %s812_s5 = inlined_call_operand.vmem [shape: bf16[2,8,64], index: 5, kind: output, shape index: {}]  }
   0x1   :  { %s749_s20 = smov 0  }
   0x2 LB: > { %s41_s21 = sadd.s32 1, %s707_s19  ;;  %p636_p0 = scmp.ge.s32.totalorder %s711_s20, 1  ;;  %s711_s20 = sphi %s749_s20, %s15_s20   ;;  %s707_s19 = sphi %s747_s19, %s814_s19   ;;  %s703_s18 = sphi %s745_s18, %s813_s18  }
   0x3   : > { %p43_p1 = scmp.ge.s32.totalorder %s41_s21, 2  ;;  %p266_p2 = scmp.lt.s32.totalorder %s711_s20, 3 }
   0x5   : > { %s816_s21 = smov (%p43_p1, %s41_s21), 0  ;;  %p267_p3 = pnand %p636_p0, %p266_p2 }
   0x6   : > { %p321_p4 = scmp.lt.s32.totalorder (!%p267_p3), %s703_s18, 1 }
   0x7   : > { %270 = sbr.rel (%p267_p3) target bundleno = 564 (0x234), region = 40 }
   0xc   : > { %s818_s18 = smov (!%p321_p4, %s703_s18), 1  ;;  %vm368_vm0 = vcmask 261120   ;;  %vm364_vm1 = vcmask 523264   ;;  %v683_v8 = vld [vmem:[%s808_s1 + $0x8] sm:$0xff]   ;;  %v713_v9 = vmov 0.0   ;;  %vm714_vm2 = vmmov 0  }
   0xd   : > { %s637_s22 = sshll.u32 %s818_s18, 2  ;;  %365 = vst.msk [vmem:[#allocation2] sm:$0xff] %vm364_vm1, %v713_v9  ;;  %649 = vmatprep.subr.bf16.mxu0 %v713_v9  ;;  %653 = vmatprep.mubr.msk.bf16.mxu0 %vm714_vm2, %v713_v9  ;;  %v684_v10 = vld [vmem:[%s808_s1] sm:$0xff]   ;;  %v386_v14 = vlaneseq  ;;  %s348_s7 = scalar_lea.vmem %s811_s4, %s818_s18  ;;  %vm486_vm3 = vcmask 519168  }
   0xe   : > { %s330_s25 = scalar_lea.vmem %s807_s0, %s637_s22  ;;  %650 = vmatpush3.bf16.msra.mxu0 %v683_v8  ;;  %v383_v16 = vld [vmem:[%s348_s7] sm:$0x1]  ;;  %s345_s10 = scalar_lea.vmem %s810_s3, %s818_s18 }
   0xf   : > { %v366_v0 = vld [vmem:[%s330_s25] sm:$0xf]  ;;  %651 = vmatprep.subr.bf16.mxu0 %v713_v9  ;;  %v387_v15 = vshrl.u32 %v386_v14, 7  ;;  %v384_v17 = vadd.f32 1.0, %v383_v16  ;;  %s358_s15 = scalar_lea.vmem %s812_s5, %s637_s22 }
  0x10   : > { %v367_v1 = vunpack.c.l.bf16 %v366_v0  ;;  %v639_v22 = vld [vmem:[%s345_s10] ss:$0 sm:$0xff] }
  0x11   : > { %v388_v18 = vsub.s32 0, %v387_v15  ;;  %v643_v32 = vld [vmem:[%s809_s2] ss:$0 sm:$0xff] }
  0x12   : > { %v369_v2 = vsel %vm368_vm0, %v367_v1, 0.0  ;;  %652 = vmatpush3.bf16.msra.mxu0 %v684_v10 }
  0x13   : > { %370 = vadd.xlane.f32.xlu0 %v369_v2  ;;  %v389_v19 = vrot.slane %v384_v17, %v388_v18 }
  0x14   : > { %v401_v26 = vld [vmem:[#allocation2] sm:$0xff] }
  0x9c   : > { %v371_v3 = vpop.xlane.xlu0 %370 }
  0x9d   : > { %v373_v4 = vmul.f32 0.03125, %v371_v3 }
  0x9f   : > { %v374_v5 = vsub.f32 %v367_v1, %v373_v4 }
  0xa1   : > { %v375_v6 = vmul.f32 %v374_v5, %v374_v5 }
  0xa3   : > { %v376_v7 = vsel %vm368_vm0, %v375_v6, 0.0 }
  0xa4   : > { %377 = vadd.xlane.f32.xlu0 %v376_v7 }
 0x12d   : > { %v378_v11 = vpop.xlane.xlu0 %377 }
 0x12e   : > { %v379_v12 = vmul.f32 0.03125, %v378_v11 }
 0x130   : > { %v380_v13 = vadd.f32 1e-06, %v379_v12 }
 0x132   : > { %685 = vrsqrt.f32 %v380_v13 }
 0x13f   : > { %v686_v20 = vpop.eup %685 }
 0x140   : > { %v382_v21 = vmul.f32 %v686_v20, %v374_v5 }
 0x142   : > { %v391_v23 = vmul.f32 %v389_v19, %v382_v21 }
 0x144   : > { %v399_v24 = vadd.f32 %v639_v22, %v391_v23 }
 0x146   : > { %v400_v25 = vpack.c.bf16 %v399_v24, %v399_v24 }
 0x148   : > { %654 = vmatmul.mubr.msk.bf16.vlgmr.msra.gmra.mxu0 %vm368_vm0, %v400_v25 }
 0x208   : > { %v455_v27 = vpop.f32.mrf.mxu0 }
 0x209   : > { %v461_v28 = vadd.f32 %v455_v27, %v401_v26 }
 0x20a   : > { %v655_v29 = vpop.f32.mrf.mxu0 }
 0x20b   : > { %463 = vst.msk [vmem:[#allocation2] sm:$0xff] %vm364_vm1, %v461_v28 }
 0x20c   : > { %v458_v30 = vpop.f32.mrf.mxu0 }
 0x20e   : > { %v656_v31 = vpop.f32.mrf.mxu0 }
 0x212   : > { %v467_v33 = vld [vmem:[#allocation2] sm:$0xff] }
 0x213   : > { %v475_v34 = vadd.f32 %v643_v32, %v467_v33 }
 0x215   : > { %v477_v35 = vmul.f32 0.044715, %v475_v34  ;;  %v476_v41 = vmul.f32 0.5, %v475_v34 }
 0x217   : > { %v478_v36 = vmul.f32 %v477_v35, %v475_v34 }
 0x219   : > { %v479_v37 = vmul.f32 %v478_v36, %v475_v34 }
 0x21b   : > { %v480_v38 = vadd.f32 %v479_v37, %v475_v34 }
 0x21d   : > { %v481_v39 = vmul.f32 0.7978846, %v480_v38 }
 0x21f   : > { %687 = vtanh.f32 %v481_v39 }
 0x22c   : > { %v688_v40 = vpop.eup %687 }
 0x22d   : > { %v483_v42 = vadd.f32 1.0, %v688_v40 }
 0x22f   : > { %v484_v43 = vmul.f32 %v483_v42, %v476_v41 }
 0x231   : > { %v485_v44 = vpack.c.bf16 %v484_v43, %v484_v43 }
 0x233   : > { %487 = vst.msk [vmem:[%s358_s15] sm:$0xf] %vm486_vm3, %v485_v44 }
 0x234 PF: > { %s15_s20 = sadd.s32 1, %s711_s20   ;;  %s813_s18 = smov %s707_s19 }
 0x235   : > { %p12_p5 = scmp.ge.s32.totalorder %s15_s20, 4   ;;  %s814_s19 = smov %s816_s21 }
 0x237   :  { %14 = sbr.rel (!%p12_p5) target bundleno = 2 (0x2), region = 90 }

// kernel: wan_attention_block.19
= control target key start
LH: loop header
LB: loop body
LE: loop exit
PB: predicated region body
PF: predicated region fallthrough
CT: control target
= control target key end

     0   :  { %s1180_s12 = smov 0   ;;  %s1182_s13 = smov 0   ;;  %s1475_s0 = inlined_call_operand.vmem [shape: bf16[2,12,2,4,8], index: 0, kind: input, shape index: {}]   ;;  %s1476_s1 = inlined_call_operand.vmem [shape: f32[4,8], index: 1, kind: input, shape index: {}]   ;;  %s1477_s2 = inlined_call_operand.vmem [shape: bf16[2,4,12,8], index: 2, kind: output, shape index: {0}]   ;;  %s1478_s3 = inlined_call_operand.vmem [shape: bf16[2,4,12,8], index: 3, kind: output, shape index: {1}]  }
   0x1   :  { %s1184_s14 = smov 0  }
   0x2 LB: > { %s26_s15 = sadd.s32 1, %s1154_s13  ;;  %p1017_p0 = scmp.ge.s32.totalorder %s1158_s14, 1  ;;  %s1158_s14 = sphi %s1184_s14, %s14_s14   ;;  %s1154_s13 = sphi %s1182_s13, %s1480_s13   ;;  %s1150_s12 = sphi %s1180_s12, %s1479_s12  }
   0x3   : > { %p28_p1 = scmp.ge.s32.totalorder %s26_s15, 2  ;;  %p164_p2 = scmp.lt.s32.totalorder %s1158_s14, 3 }
   0x5   : > { %s1482_s15 = smov (%p28_p1, %s26_s15), 0  ;;  %p165_p3 = pnand %p1017_p0, %p164_p2 }
   0x6   : > { %p207_p4 = scmp.lt.s32.totalorder (!%p165_p3), %s1150_s12, 1 }
   0x7   : > { %168 = sbr.rel (%p165_p3) target bundleno = 238 (0xee), region = 28 }
   0xc   : > { %s1484_s12 = smov (!%p207_p4, %s1150_s12), 1  ;;  %vm273_vm0 = vcmask 60416   ;;  %vm531_vm1 = vcmask 1041409   ;;  %vm534_vm2 = vcmask 1042434   ;;  %vm537_vm3 = vcmask 1043459  }
   0xd   : > { %s1087_s16 = smul.u32 48, %s1484_s12  ;;  %vm540_vm4 = vcmask 1044484   ;;  %vm543_vm5 = vcmask 1045509   ;;  %vm546_vm6 = vcmask 1046534   ;;  %s1073_s20 = sshll.u32 %s1484_s12, 5  ;;  %vm562_vm7 = vcmask 58368  }
   0xe   : > { %s1323_s23 = scalar_lea.vmem %s1478_s3, %s1073_s20  ;;  %vm549_vm8 = vcmask 1047559   ;;  %vm323_vm9 = vcmask 1043456   ;;  %s1426_s28 = scalar_lea.vmem %s1477_s2, %s1073_s20 }
   0xf   : > { %s1204_s19 = scalar_lea.vmem %s1475_s0, %s1087_s16 }
  0x10   : > { %v239_v0 = vld [vmem:[%s1204_s19 + $0x8] sm:$0x3]  ;;  %v237_v1 = vld [vmem:[%s1204_s19] sm:$0x3]  ;;  %v240_v2 = vld [vmem:[%s1204_s19 + $0xc] sm:$0x3] }
  0x11   : > { %v1209_v3 = vunpack.c.l.bf16 %v239_v0  ;;  %v1211_v4 = vunpack.c.l.bf16 %v237_v1  ;;  %v1213_v5 = vunpack.c.l.bf16 %v240_v2  ;;  %v238_v6 = vld [vmem:[%s1204_s19 + $0x4] sm:$0x3]  ;;  %v242_v7 = vld [vmem:[%s1204_s19 + $0x14] sm:$0x3]  ;;  %v241_v8 = vld [vmem:[%s1204_s19 + $0x10] sm:$0x3] }
  0x12   : > { %v1218_v9 = vunpack.c.l.bf16 %v238_v6  ;;  %v1220_v10 = vunpack.c.l.bf16 %v242_v7  ;;  %v1228_v14 = vunpack.c.l.bf16 %v241_v8  ;;  %v246_v15 = vld [vmem:[%s1204_s19 + $0x24] sm:$0x3]  ;;  %v245_v17 = vld [vmem:[%s1204_s19 + $0x20] sm:$0x3]  ;;  %v247_v26 = vld [vmem:[%s1204_s19 + $0x28] sm:$0x3] }
  0x13   : > { %v263_v11 = vmul.f32 %v1209_v3, %v1209_v3  ;;  %v261_v12 = vmul.f32 %v1211_v4, %v1211_v4  ;;  %v264_v13 = vmul.f32 %v1213_v5, %v1213_v5  ;;  %v1238_v21 = vunpack.c.l.bf16 %v246_v15  ;;  %v243_v27 = vld [vmem:[%s1204_s19 + $0x18] sm:$0x3]  ;;  %v248_v34 = vld [vmem:[%s1204_s19 + $0x2c] sm:$0x3]  ;;  %v244_v35 = vld [vmem:[%s1204_s19 + $0x1c] sm:$0x3] }
  0x14   : > { %v262_v16 = vmul.f32 %v1218_v9, %v1218_v9  ;;  %v266_v20 = vmul.f32 %v1220_v10, %v1220_v10  ;;  %v265_v24 = vmul.f32 %v1228_v14, %v1228_v14  ;;  %v1244_v25 = vunpack.c.l.bf16 %v245_v17  ;;  %v1053_v48 = vld.sshfl [vmem:[%s1204_s19 + $0x2] sm:$0x3 pattern:$0x76325410] }
  0x15   : > { %v280_v18 = vsel %vm273_vm0, %v263_v11, 0.0  ;;  %v274_v19 = vsel %vm273_vm0, %v261_v12, 0.0  ;;  %v283_v22 = vsel %vm273_vm0, %v264_v13, 0.0  ;;  %v270_v29 = vmul.f32 %v1238_v21, %v1238_v21 }
  0x16   : > { %281 = vadd.xlane.f32.xlu1 %v280_v18  ;;  %275 = vadd.xlane.f32.xlu0 %v274_v19  ;;  %v277_v23 = vsel %vm273_vm0, %v262_v16, 0.0  ;;  %v289_v28 = vsel %vm273_vm0, %v266_v20, 0.0  ;;  %v286_v30 = vsel %vm273_vm0, %v265_v24, 0.0  ;;  %v269_v31 = vmul.f32 %v1244_v25, %v1244_v25 }
  0x17   : > { %v1254_v32 = vunpack.c.l.bf16 %v247_v26  ;;  %v1256_v33 = vunpack.c.l.bf16 %v243_v27  ;;  %v301_v36 = vsel %vm273_vm0, %v270_v29, 0.0  ;;  %v1261_v37 = vunpack.c.l.bf16 %v248_v34  ;;  %v1054_v49 = vld.sshfl [vmem:[%s1204_s19 + $0x6] sm:$0x3 pattern:$0x76325410] }
  0x18   : > { %v298_v38 = vsel %vm273_vm0, %v269_v31, 0.0  ;;  %v1268_v41 = vunpack.c.l.bf16 %v244_v35  ;;  %v754_v50 = vunpack.c.l.b16 %v1053_v48  ;;  %v1055_v51 = vld.sshfl [vmem:[%s1204_s19 + $0xa] sm:$0x3 pattern:$0x76325410]  ;;  %v755_v52 = vunpack.c.l.b16 %v1054_v49 }
  0x19   : > { %v271_v39 = vmul.f32 %v1254_v32, %v1254_v32  ;;  %v267_v40 = vmul.f32 %v1256_v33, %v1256_v33  ;;  %v272_v44 = vmul.f32 %v1261_v37, %v1261_v37  ;;  %v1056_v53 = vld.sshfl [vmem:[%s1204_s19 + $0xe] sm:$0x3 pattern:$0x76325410]  ;;  %v756_v54 = vunpack.c.l.b16 %v1055_v51 }
  0x1a   : > { %284 = vadd.xlane.f32.xlu1 %v283_v22  ;;  %278 = vadd.xlane.f32.xlu0 %v277_v23  ;;  %v268_v45 = vmul.f32 %v1268_v41, %v1268_v41  ;;  %v792_v55 = vrot.slane %v754_v50, 1  ;;  %v819_v56 = vrot.slane %v754_v50, 2  ;;  %v1057_v57 = vld.sshfl [vmem:[%s1204_s19 + $0x12] sm:$0x3 pattern:$0x76325410]  ;;  %v757_v58 = vunpack.c.l.b16 %v1056_v53 }
  0x1b   : > { %v304_v42 = vsel %vm273_vm0, %v271_v39, 0.0  ;;  %v292_v43 = vsel %vm273_vm0, %v267_v40, 0.0  ;;  %v307_v46 = vsel %vm273_vm0, %v272_v44, 0.0  ;;  %v766_v59 = vrot.slane %v755_v52, 7 }
  0x1c   : > { %v295_v47 = vsel %vm273_vm0, %v268_v45, 0.0  ;;  %v820_v60 = vrot.slane %v755_v52, 1  ;;  %v768_v61 = vrot.slane %v756_v54, 6  ;;  %v794_v62 = vrot.slane %v756_v54, 7 }
  0x1d   : > { %v767_v63 = vsel %vm531_vm1, %v766_v59, %v754_v50  ;;  %v793_v0 = vsel %vm531_vm1, %v755_v52, %v792_v55  ;;  %v758_v1 = vunpack.c.l.b16 %v1057_v57  ;;  %v770_v6 = vrot.slane %v757_v58, 5  ;;  %v1061_v39 = vld.sshfl [vmem:[%s1204_s19 + $0x22] sm:$0x3 pattern:$0x76325410] }
  0x1e   : > { %290 = vadd.xlane.f32.xlu1 %v289_v28  ;;  %287 = vadd.xlane.f32.xlu0 %v286_v30  ;;  %v821_v2 = vsel %vm531_vm1, %v820_v60, %v819_v56  ;;  %v796_v7 = vrot.slane %v757_v58, 6  ;;  %v769_v8 = vsel %vm534_vm2, %v768_v61, %v767_v63  ;;  %v795_v11 = vsel %vm534_vm2, %v794_v62, %v793_v0  ;;  %v1058_v28 = vld.sshfl [vmem:[%s1204_s19 + $0x16] sm:$0x3 pattern:$0x76325410] }
  0x1f   : > { %v823_v12 = vrot.slane %v757_v58, 7  ;;  %v846_v13 = vrot.slane %v754_v50, 3  ;;  %v822_v15 = vsel %vm534_vm2, %v756_v54, %v821_v2  ;;  %v847_v16 = vrot.slane %v755_v52, 2 }
  0x20   : > { %v849_v17 = vrot.slane %v756_v54, 1  ;;  %v772_v18 = vrot.slane %v758_v1, 4  ;;  %v798_v19 = vrot.slane %v758_v1, 5  ;;  %v771_v20 = vsel %vm537_vm3, %v770_v6, %v769_v8 }
  0x21   : > { %v797_v22 = vsel %vm537_vm3, %v796_v7, %v795_v11  ;;  %v825_v23 = vrot.slane %v758_v1, 6  ;;  %v848_v24 = vsel %vm531_vm1, %v847_v16, %v846_v13  ;;  %v824_v26 = vsel %vm537_vm3, %v823_v12, %v822_v15  ;;  %v1059_v30 = vld.sshfl [vmem:[%s1204_s19 + $0x1a] sm:$0x3 pattern:$0x76325410] }
  0x22   : > { %302 = vadd.xlane.f32.xlu1 %v301_v36  ;;  %299 = vadd.xlane.f32.xlu0 %v298_v38  ;;  %v850_v27 = vsel %vm534_vm2, %v849_v17, %v848_v24  ;;  %v852_v29 = vrot.slane %v758_v1, 7  ;;  %v759_v31 = vunpack.c.l.b16 %v1058_v28  ;;  %v773_v34 = vsel %vm540_vm4, %v772_v18, %v771_v20  ;;  %v1062_v51 = vld.sshfl [vmem:[%s1204_s19 + $0x26] sm:$0x3 pattern:$0x76325410] }
  0x23   : > { %v799_v35 = vsel %vm540_vm4, %v798_v19, %v797_v22  ;;  %v851_v36 = vsel %vm537_vm3, %v757_v58, %v850_v27  ;;  %v760_v38 = vunpack.c.l.b16 %v1059_v30  ;;  %v826_v40 = vsel %vm540_vm4, %v825_v23, %v824_v26  ;;  %v1063_v54 = vld.sshfl [vmem:[%s1204_s19 + $0x2a] sm:$0x3 pattern:$0x76325410] }
  0x24   : > { %v827_v44 = vrot.slane %v759_v31, 5  ;;  %v853_v48 = vsel %vm540_vm4, %v852_v29, %v851_v36  ;;  %v1064_v56 = vld.sshfl [vmem:[%s1204_s19 + $0x2e] sm:$0x3 pattern:$0x76325410]  ;;  %v762_v57 = vunpack.c.l.b16 %v1061_v39  ;;  %v763_v58 = vunpack.c.l.b16 %v1062_v51 }
  0x25   : > { %v776_v45 = vrot.slane %v760_v38, 2  ;;  %v829_v52 = vrot.slane %v760_v38, 4  ;;  %v856_v53 = vrot.slane %v760_v38, 5  ;;  %v764_v59 = vunpack.c.l.b16 %v1063_v54 }
  0x26   : > { %305 = vadd.xlane.f32.xlu1 %v304_v42  ;;  %293 = vadd.xlane.f32.xlu0 %v292_v43  ;;  %v774_v42 = vrot.slane %v759_v31, 3  ;;  %v800_v43 = vrot.slane %v759_v31, 4  ;;  %v828_v55 = vsel %vm543_vm5, %v827_v44, %v826_v40  ;;  %v765_v63 = vunpack.c.l.b16 %v1064_v56  ;;  %v1060_v23 = vld.sshfl [vmem:[%s1204_s19 + $0x1e] sm:$0x3 pattern:$0x76325410] }
  0x27   : > { %v780_v0 = vrot.slane %v763_v58, 7  ;;  %v782_v1 = vrot.slane %v764_v59, 6  ;;  %v806_v2 = vrot.slane %v762_v57, 1  ;;  %v808_v6 = vrot.slane %v764_v59, 7 }
  0x28   : > { %v775_v49 = vsel %vm543_vm5, %v774_v42, %v773_v34  ;;  %v801_v50 = vsel %vm543_vm5, %v800_v43, %v799_v35  ;;  %v784_v7 = vrot.slane %v765_v63, 5  ;;  %v810_v8 = vrot.slane %v765_v63, 6 }
  0x29   : > { %v777_v60 = vsel %vm546_vm6, %v776_v45, %v775_v49  ;;  %v833_v11 = vrot.slane %v762_v57, 2  ;;  %v834_v12 = vrot.slane %v763_v58, 1  ;;  %v781_v13 = vsel %vm531_vm1, %v780_v0, %v762_v57 }
  0x2a   : > { %308 = vadd.xlane.f32.xlu1 %v307_v46  ;;  %296 = vadd.xlane.f32.xlu0 %v295_v47  ;;  %v802_v46 = vrot.slane %v760_v38, 3  ;;  %v854_v47 = vrot.slane %v759_v31, 6  ;;  %v807_v15 = vsel %vm531_vm1, %v763_v58, %v806_v2  ;;  %v837_v16 = vrot.slane %v765_v63, 7 }
  0x2b   : > { %v860_v17 = vrot.slane %v762_v57, 3  ;;  %v783_v18 = vsel %vm534_vm2, %v782_v1, %v781_v13  ;;  %v809_v19 = vsel %vm534_vm2, %v808_v6, %v807_v15  ;;  %v835_v20 = vsel %vm531_vm1, %v834_v12, %v833_v11 }
  0x2c   : > { %v803_v61 = vsel %vm546_vm6, %v802_v46, %v801_v50  ;;  %v855_v62 = vsel %vm543_vm5, %v854_v47, %v853_v48  ;;  %v861_v22 = vrot.slane %v763_v58, 2  ;;  %v785_v24 = vsel %vm537_vm3, %v784_v7, %v783_v18 }
  0x2d   : > { %v811_v26 = vsel %vm537_vm3, %v810_v8, %v809_v19  ;;  %v836_v27 = vsel %vm534_vm2, %v764_v59, %v835_v20  ;;  %v863_v28 = vrot.slane %v764_v59, 1  ;;  %v787_v29 = vpack.c.b16 %v785_v24, %v785_v24 }
  0x2e   : > { %v813_v30 = vpack.c.b16 %v811_v26, %v811_v26  ;;  %v838_v31 = vsel %vm537_vm3, %v837_v16, %v836_v27  ;;  %v862_v34 = vsel %vm531_vm1, %v861_v22, %v860_v17  ;;  %v761_v38 = vunpack.c.l.b16 %v1060_v23 }
  0x2f   : > { %v840_v35 = vpack.c.b16 %v838_v31, %v838_v31  ;;  %v864_v36 = vsel %vm534_vm2, %v863_v28, %v862_v34  ;;  %v830_v39 = vsel %vm546_vm6, %v829_v52, %v828_v55  ;;  %v857_v40 = vsel %vm546_vm6, %v856_v53, %v855_v62  ;;  %791 = vst.msk [vmem:[%s1323_s23 + $0x4] sm:$0x3] %vm562_vm7, %v787_v29 }
  0x30   : > { %1066 = vst.msk [vmem:[%s1323_s23 + $0xc] sm:$0x3] %vm562_vm7, %v813_v30  ;;  %v865_v42 = vsel %vm537_vm3, %v765_v63, %v864_v36  ;;  %v778_v44 = vrot.slane %v761_v38, 1  ;;  %v804_v45 = vrot.slane %v761_v38, 2  ;;  %v831_v46 = vrot.slane %v761_v38, 3 }
  0x31   : > { %1068 = vst.msk [vmem:[%s1323_s23 + $0x14] sm:$0x3] %vm562_vm7, %v840_v35  ;;  %v867_v43 = vpack.c.b16 %v865_v42, %v865_v42  ;;  %v858_v47 = vrot.slane %v761_v38, 4 }
  0x32   : > { %v779_v48 = vsel %vm549_vm8, %v778_v44, %v777_v60  ;;  %v805_v49 = vsel %vm549_vm8, %v804_v45, %v803_v61  ;;  %v832_v50 = vsel %vm549_vm8, %v831_v46, %v830_v39 }
  0x33   : > { %1070 = vst.msk [vmem:[%s1323_s23 + $0x1c] sm:$0x3] %vm562_vm7, %v867_v43  ;;  %v786_v51 = vpack.c.b16 %v779_v48, %v779_v48  ;;  %v812_v52 = vpack.c.b16 %v805_v49, %v805_v49  ;;  %v839_v53 = vpack.c.b16 %v832_v50, %v832_v50  ;;  %v859_v54 = vsel %vm549_vm8, %v858_v47, %v857_v40 }
  0x34   : > { %v866_v55 = vpack.c.b16 %v859_v54, %v859_v54 }
  0x35   : > { %790 = vst.msk [vmem:[%s1323_s23] sm:$0xf] %vm273_vm0, %v786_v51  ;;  %1065 = vst.msk [vmem:[%s1323_s23 + $0x8] sm:$0xf] %vm273_vm0, %v812_v52 }
  0x36   : > { %1067 = vst.msk [vmem:[%s1323_s23 + $0x10] sm:$0xf] %vm273_vm0, %v839_v53  ;;  %1069 = vst.msk [vmem:[%s1323_s23 + $0x18] sm:$0xf] %vm273_vm0, %v866_v55 }
  0x9f   : > { %v282_v56 = vpop.xlane.xlu1 %281  ;;  %v276_v57 = vpop.xlane.xlu0 %275 }
  0xa0   : > { %v313_v58 = vmul.f32 0.125, %v282_v56  ;;  %v311_v59 = vmul.f32 0.125, %v276_v57 }
  0xa2   : > { %v338_v60 = vsel %vm323_vm9, %v313_v58, 0.0  ;;  %v324_v61 = vsel %vm323_vm9, %v311_v59, 0.0 }
  0xa3   : > { %v339_v62 = vrot.slane %v338_v60, 4  ;;  %v325_v63 = vrot.slane %v324_v61, 4  ;;  %v285_v0 = vpop.xlane.xlu1 %284  ;;  %v279_v1 = vpop.xlane.xlu0 %278 }
  0xa4   : > { %v314_v2 = vmul.f32 0.125, %v285_v0  ;;  %v312_v6 = vmul.f32 0.125, %v279_v1 }
  0xa5   : > { %v340_v7 = vadd.f32 %v339_v62, %v338_v60  ;;  %v326_v8 = vadd.f32 %v325_v63, %v324_v61 }
  0xa6   : > { %v345_v11 = vsel %vm323_vm9, %v314_v2, 0.0  ;;  %v331_v12 = vsel %vm323_vm9, %v312_v6, 0.0 }
  0xa7   : > { %v341_v13 = vrot.slane %v340_v7, 2  ;;  %v327_v15 = vrot.slane %v326_v8, 2  ;;  %v346_v16 = vrot.slane %v345_v11, 4  ;;  %v332_v17 = vrot.slane %v331_v12, 4  ;;  %v291_v18 = vpop.xlane.xlu1 %290  ;;  %v288_v19 = vpop.xlane.xlu0 %287 }
  0xa8   : > { %v316_v20 = vmul.f32 0.125, %v291_v18  ;;  %v315_v22 = vmul.f32 0.125, %v288_v19 }
  0xa9   : > { %v342_v23 = vadd.f32 %v341_v13, %v340_v7  ;;  %v328_v24 = vadd.f32 %v327_v15, %v326_v8  ;;  %v347_v26 = vadd.f32 %v346_v16, %v345_v11  ;;  %v333_v27 = vadd.f32 %v332_v17, %v331_v12 }
  0xaa   : > { %v359_v28 = vsel %vm323_vm9, %v316_v20, 0.0  ;;  %v352_v29 = vsel %vm323_vm9, %v315_v22, 0.0 }
  0xab   : > { %v343_v30 = vrot.slane %v342_v23, 1  ;;  %v329_v31 = vrot.slane %v328_v24, 1  ;;  %v348_v34 = vrot.slane %v347_v26, 2  ;;  %v334_v35 = vrot.slane %v333_v27, 2  ;;  %v303_v36 = vpop.xlane.xlu1 %302  ;;  %v300_v38 = vpop.xlane.xlu0 %299 }
  0xac   : > { %v360_v39 = vrot.slane %v359_v28, 4  ;;  %v353_v40 = vrot.slane %v352_v29, 4  ;;  %v320_v42 = vmul.f32 0.125, %v303_v36  ;;  %v319_v43 = vmul.f32 0.125, %v300_v38 }
  0xad   : > { %v344_v44 = vadd.f32 %v343_v30, %v342_v23  ;;  %v330_v45 = vadd.f32 %v329_v31, %v328_v24  ;;  %v349_v46 = vadd.f32 %v348_v34, %v347_v26  ;;  %v335_v47 = vadd.f32 %v334_v35, %v333_v27 }
  0xae   : > { %v361_v48 = vadd.f32 %v360_v39, %v359_v28  ;;  %v354_v49 = vadd.f32 %v353_v40, %v352_v29  ;;  %v387_v50 = vsel %vm323_vm9, %v320_v42, 0.0  ;;  %v380_v51 = vsel %vm323_vm9, %v319_v43, 0.0 }
  0xaf   : > { %v411_v52 = vmul.f32 0.25, %v344_v44  ;;  %v409_v53 = vmul.f32 0.25, %v330_v45  ;;  %v350_v54 = vrot.slane %v349_v46, 1  ;;  %v336_v55 = vrot.slane %v335_v47, 1  ;;  %v306_v56 = vpop.xlane.xlu1 %305  ;;  %v294_v7 = vpop.xlane.xlu0 %293 }
  0xb0   : > { %v362_v57 = vrot.slane %v361_v48, 2  ;;  %v355_v58 = vrot.slane %v354_v49, 2  ;;  %v388_v59 = vrot.slane %v387_v50, 4  ;;  %v381_v60 = vrot.slane %v380_v51, 4 }
  0xb1   : > { %v421_v61 = vadd.f32 1e-06, %v409_v53  ;;  %v351_v62 = vadd.f32 %v350_v54, %v349_v46  ;;  %v337_v63 = vadd.f32 %v336_v55, %v335_v47  ;;  %v423_v8 = vadd.f32 1e-06, %v411_v52 }
  0xb2   : > { %v363_v0 = vadd.f32 %v362_v57, %v361_v48  ;;  %v356_v1 = vadd.f32 %v355_v58, %v354_v49  ;;  %v389_v2 = vadd.f32 %v388_v59, %v387_v50  ;;  %v382_v6 = vadd.f32 %v381_v60, %v380_v51 }
  0xb3   : > { %v410_v11 = vmul.f32 0.25, %v337_v63  ;;  %v321_v12 = vmul.f32 0.125, %v306_v56  ;;  %v412_v13 = vmul.f32 0.25, %v351_v62  ;;  %v309_v18 = vpop.xlane.xlu1 %308  ;;  %1112 = vrsqrt.f32 %v421_v61  ;;  %v297_v36 = vpop.xlane.xlu0 %296 }
  0xb4   : > { %v364_v15 = vrot.slane %v363_v0, 1  ;;  %v357_v16 = vrot.slane %v356_v1, 1  ;;  %v390_v17 = vrot.slane %v389_v2, 2  ;;  %v383_v20 = vrot.slane %v382_v6, 2 }
  0xb5   : > { %v422_v19 = vadd.f32 1e-06, %v410_v11  ;;  %v394_v22 = vsel %vm323_vm9, %v321_v12, 0.0  ;;  %1114 = vrsqrt.f32 %v423_v8  ;;  %v317_v29 = vmul.f32 0.125, %v294_v7 }
  0xb6   : > { %v365_v23 = vadd.f32 %v364_v15, %v363_v0  ;;  %v358_v24 = vadd.f32 %v357_v16, %v356_v1  ;;  %v391_v26 = vadd.f32 %v390_v17, %v389_v2  ;;  %v395_v27 = vrot.slane %v394_v22, 4 }
  0xb7   : > { %v384_v28 = vadd.f32 %v383_v20, %v382_v6  ;;  %v322_v30 = vmul.f32 0.125, %v309_v18  ;;  %v424_v31 = vadd.f32 1e-06, %v412_v13  ;;  %1116 = vrsqrt.f32 %v422_v19 }
  0xb8   : > { %v414_v34 = vmul.f32 0.25, %v365_v23  ;;  %v392_v35 = vrot.slane %v391_v26, 1  ;;  %v396_v39 = vadd.f32 %v395_v27, %v394_v22  ;;  %v366_v40 = vsel %vm323_vm9, %v317_v29, 0.0  ;;  %v1370_v22 = vld [vmem:[%s1476_s1] sm:$0xf] }
  0xb9   : > { %v385_v38 = vrot.slane %v384_v28, 1  ;;  %v401_v42 = vsel %vm323_vm9, %v322_v30, 0.0  ;;  %v413_v43 = vmul.f32 0.25, %v358_v24  ;;  %v367_v45 = vrot.slane %v366_v40, 4 }
  0xba   : > { %v393_v44 = vadd.f32 %v392_v35, %v391_v26  ;;  %v397_v47 = vrot.slane %v396_v39, 2  ;;  %v402_v48 = vrot.slane %v401_v42, 4  ;;  %v318_v49 = vmul.f32 0.125, %v297_v36 }
  0xbb   : > { %v386_v46 = vadd.f32 %v385_v38, %v384_v28  ;;  %1118 = vrsqrt.f32 %v424_v31  ;;  %v368_v51 = vadd.f32 %v367_v45, %v366_v40  ;;  %v426_v52 = vadd.f32 1e-06, %v414_v34 }
  0xbc   : > { %v418_v50 = vmul.f32 0.25, %v393_v44  ;;  %v398_v54 = vadd.f32 %v397_v47, %v396_v39  ;;  %v403_v55 = vadd.f32 %v402_v48, %v401_v42  ;;  %v425_v56 = vadd.f32 1e-06, %v413_v43 }
  0xbd   : > { %v417_v53 = vmul.f32 0.25, %v386_v46  ;;  %v369_v57 = vrot.slane %v368_v51, 2  ;;  %v373_v58 = vsel %vm323_vm9, %v318_v49, 0.0  ;;  %1120 = vrsqrt.f32 %v426_v52 }
  0xbe   : > { %v430_v59 = vadd.f32 1e-06, %v418_v50  ;;  %v399_v60 = vrot.slane %v398_v54, 1  ;;  %v404_v61 = vrot.slane %v403_v55, 2  ;;  %v374_v62 = vrot.slane %v373_v58, 4 }
  0xbf   : > { %v429_v63 = vadd.f32 1e-06, %v417_v53  ;;  %v370_v0 = vadd.f32 %v369_v57, %v368_v51  ;;  %1122 = vrsqrt.f32 %v425_v56 }
  0xc0   : > { %v400_v1 = vadd.f32 %v399_v60, %v398_v54  ;;  %v405_v2 = vadd.f32 %v404_v61, %v403_v55  ;;  %v1113_v6 = vpop.eup %1112  ;;  %v375_v8 = vadd.f32 %v374_v62, %v373_v58  ;;  %1124 = vrsqrt.f32 %v430_v59 }
  0xc1   : > { %v371_v7 = vrot.slane %v370_v0, 1  ;;  %1126 = vrsqrt.f32 %v429_v63  ;;  %v445_v19 = vmul.f32 %v1113_v6, %v1211_v4 }
  0xc2   : > { %v419_v11 = vmul.f32 0.25, %v400_v1  ;;  %v1115_v12 = vpop.eup %1114  ;;  %v406_v15 = vrot.slane %v405_v2, 1  ;;  %v376_v18 = vrot.slane %v375_v8, 2 }
  0xc3   : > { %v372_v13 = vadd.f32 %v371_v7, %v370_v0  ;;  %v447_v27 = vmul.f32 %v1115_v12, %v1209_v3  ;;  %v458_v29 = vmul.f32 %v1370_v22, %v445_v19 }
  0xc4   : > { %v1117_v16 = vpop.eup %1116  ;;  %v431_v17 = vadd.f32 1e-06, %v419_v11  ;;  %v407_v24 = vadd.f32 %v406_v15, %v405_v2  ;;  %v377_v28 = vadd.f32 %v376_v18, %v375_v8 }
  0xc5   : > { %v415_v20 = vmul.f32 0.25, %v372_v13  ;;  %v446_v23 = vmul.f32 %v1117_v16, %v1218_v9  ;;  %v460_v34 = vmul.f32 %v1370_v22, %v447_v27  ;;  %v1075_v39 = vpack.c.bf16 %v458_v29, %v458_v29 }
  0xc6   : > { %1128 = vrsqrt.f32 %v431_v17  ;;  %v420_v4 = vmul.f32 0.25, %v407_v24  ;;  %v378_v36 = vrot.slane %v377_v28, 1 }
  0xc7   : > { %v427_v30 = vadd.f32 1e-06, %v415_v20  ;;  %v459_v31 = vmul.f32 %v1370_v22, %v446_v23  ;;  %v1077_v44 = vpack.c.bf16 %v460_v34, %v460_v34  ;;  %v518_v47 = vunpack.c.l.b16 %v1075_v39 }
  0xc8   : > { %v1119_v26 = vpop.eup %1118  ;;  %v432_v43 = vadd.f32 1e-06, %v420_v4  ;;  %v379_v46 = vadd.f32 %v378_v36, %v377_v28 }
  0xc9   : > { %v448_v35 = vmul.f32 %v1119_v26, %v1213_v5  ;;  %1130 = vrsqrt.f32 %v427_v30  ;;  %v1076_v40 = vpack.c.bf16 %v459_v31, %v459_v31  ;;  %v520_v53 = vunpack.c.l.b16 %v1077_v44 }
  0xca   : > { %v1121_v38 = vpop.eup %1120  ;;  %1132 = vrsqrt.f32 %v432_v43  ;;  %v416_v56 = vmul.f32 0.25, %v379_v46  ;;  %v564_v57 = vrot.slane %v518_v47, 1  ;;  %v591_v0 = vrot.slane %v518_v47, 2 }
  0xcb   : > { %v461_v45 = vmul.f32 %v1370_v22, %v448_v35  ;;  %v450_v48 = vmul.f32 %v1121_v38, %v1220_v10  ;;  %v519_v49 = vunpack.c.l.b16 %v1076_v40  ;;  %v533_v63 = vrot.slane %v520_v53, 6 }
  0xcc   : > { %v1123_v9 = vpop.eup %1122  ;;  %v428_v62 = vadd.f32 1e-06, %v416_v56  ;;  %v618_v2 = vrot.slane %v518_v47, 3  ;;  %v621_v19 = vrot.slane %v520_v53, 1 }
  0xcd   : > { %v1125_v42 = vpop.eup %1124  ;;  %v449_v51 = vmul.f32 %v1123_v9, %v1228_v14  ;;  %v1078_v54 = vpack.c.bf16 %v461_v45, %v461_v45  ;;  %v463_v58 = vmul.f32 %v1370_v22, %v450_v48  ;;  %v530_v59 = vrot.slane %v519_v49, 7 }
  0xce   : > { %v1127_v3 = vpop.eup %1126  ;;  %v454_v50 = vmul.f32 %v1125_v42, %v1238_v21  ;;  %v592_v60 = vrot.slane %v519_v49, 1  ;;  %v619_v61 = vrot.slane %v519_v49, 2  ;;  %v565_v6 = vsel %vm531_vm1, %v519_v49, %v564_v57 }
  0xcf   : > { %v453_v52 = vmul.f32 %v1127_v3, %v1244_v25  ;;  %v462_v14 = vmul.f32 %v1370_v22, %v449_v51  ;;  %v521_v1 = vunpack.c.l.b16 %v1078_v54  ;;  %v1080_v7 = vpack.c.bf16 %v463_v58, %v463_v58 }
  0xd0   : > { %v467_v10 = vmul.f32 %v1370_v22, %v454_v50  ;;  %v532_v11 = vsel %vm531_vm1, %v530_v59, %v518_v47  ;;  %v593_v12 = vsel %vm531_vm1, %v592_v60, %v591_v0  ;;  %v620_v16 = vsel %vm531_vm1, %v619_v61, %v618_v2 }
  0xd1   : > { %v466_v21 = vmul.f32 %v1370_v22, %v453_v52  ;;  %v1079_v17 = vpack.c.bf16 %v462_v14, %v462_v14  ;;  %1134 = vrsqrt.f32 %v428_v62  ;;  %v536_v20 = vrot.slane %v521_v1, 5 }
  0xd2   : > { %v1084_v13 = vpack.c.bf16 %v467_v10, %v467_v10  ;;  %v568_v23 = vrot.slane %v521_v1, 6  ;;  %v535_v24 = vsel %vm534_vm2, %v533_v63, %v532_v11  ;;  %v1395_v27 = vunpack.c.l.b16 %v1080_v7 }
  0xd3   : > { %v1129_v5 = vpop.eup %1128  ;;  %v1083_v15 = vpack.c.bf16 %v466_v21, %v466_v21  ;;  %v594_v29 = vsel %vm534_vm2, %v520_v53, %v593_v12  ;;  %v622_v30 = vsel %vm534_vm2, %v621_v19, %v620_v16  ;;  %v595_v34 = vrot.slane %v521_v1, 7 }
  0xd4   : > { %v455_v55 = vmul.f32 %v1129_v5, %v1254_v32  ;;  %v566_v32 = vrot.slane %v520_v53, 7  ;;  %v527_v31 = vunpack.c.l.b16 %v1084_v13  ;;  %v522_v35 = vunpack.c.l.b16 %v1079_v17 }
  0xd5   : > { %v526_v4 = vunpack.c.l.b16 %v1083_v15  ;;  %v538_v9 = vsel %vm537_vm3, %v536_v20, %v535_v24  ;;  %v542_v40 = vrot.slane %v1395_v27, 3  ;;  %v596_v42 = vsel %vm537_vm3, %v595_v34, %v594_v29 }
  0xd6   : > { %v468_v25 = vmul.f32 %v1370_v22, %v455_v55  ;;  %v1131_v8 = vpop.eup %1130  ;;  %v567_v26 = vsel %vm534_vm2, %v566_v32, %v565_v6  ;;  %v572_v3 = vrot.slane %v1395_v27, 4  ;;  %v633_v44 = vrot.slane %v527_v31, 2 }
  0xd7   : > { %v451_v28 = vmul.f32 %v1131_v8, %v1256_v33  ;;  %v1133_v38 = vpop.eup %1132  ;;  %v569_v39 = vsel %vm537_vm3, %v568_v23, %v567_v26  ;;  %v623_v33 = vsel %vm537_vm3, %v521_v1, %v622_v30  ;;  %v632_v45 = vrot.slane %v526_v4, 3 }
  0xd8   : > { %v1085_v18 = vpack.c.bf16 %v468_v25, %v468_v25  ;;  %v456_v46 = vmul.f32 %v1133_v38, %v1261_v37  ;;  %v539_v47 = vrot.slane %v522_v35, 4  ;;  %v570_v48 = vrot.slane %v522_v35, 5 }
  0xd9   : > { %v464_v43 = vmul.f32 %v1370_v22, %v451_v28  ;;  %v597_v49 = vrot.slane %v522_v35, 6  ;;  %v551_v5 = vrot.slane %v527_v31, 7  ;;  %v606_v51 = vrot.slane %v527_v31, 1 }
  0xda   : > { %v528_v36 = vunpack.c.l.b16 %v1085_v18  ;;  %v605_v52 = vrot.slane %v526_v4, 2  ;;  %v469_v53 = vmul.f32 %v1370_v22, %v456_v46  ;;  %v599_v54 = vrot.slane %v1395_v27, 5 }
  0xdb   : > { %v578_v55 = vrot.slane %v526_v4, 1  ;;  %v1081_v57 = vpack.c.bf16 %v464_v43, %v464_v43  ;;  %v626_v58 = vrot.slane %v1395_v27, 6  ;;  %v624_v59 = vrot.slane %v522_v35, 7 }
  0xdc   : > { %v635_v50 = vrot.slane %v528_v36, 1  ;;  %v553_v56 = vrot.slane %v528_v36, 6  ;;  %v1086_v60 = vpack.c.bf16 %v469_v53, %v469_v53  ;;  %v634_v37 = vsel %vm531_vm1, %v633_v44, %v632_v45 }
  0xdd   : > { %v541_v10 = vsel %vm540_vm4, %v539_v47, %v538_v9  ;;  %v571_v21 = vsel %vm540_vm4, %v570_v48, %v569_v39  ;;  %v580_v61 = vrot.slane %v528_v36, 7  ;;  %v598_v62 = vsel %vm540_vm4, %v597_v49, %v596_v42 }
  0xde   : > { %v636_v14 = vsel %vm534_vm2, %v635_v50, %v634_v37  ;;  %v1135_v25 = vpop.eup %1134  ;;  %v552_v63 = vsel %vm531_vm1, %v551_v5, %v526_v4  ;;  %v607_v0 = vsel %vm531_vm1, %v606_v51, %v605_v52  ;;  %v529_v1 = vunpack.c.l.b16 %v1086_v60 }
  0xdf   : > { %v579_v32 = vsel %vm531_vm1, %v527_v31, %v578_v55  ;;  %v554_v2 = vsel %vm534_vm2, %v553_v56, %v552_v63  ;;  %v524_v6 = vunpack.c.l.b16 %v1081_v57  ;;  %v452_v7 = vmul.f32 %v1135_v25, %v1268_v41 }
  0xe0   : > { %v555_v8 = vrot.slane %v529_v1, 5  ;;  %v582_v11 = vrot.slane %v529_v1, 6  ;;  %v609_v12 = vrot.slane %v529_v1, 7  ;;  %v637_v13 = vsel %vm537_vm3, %v529_v1, %v636_v14 }
  0xe1   : > { %v581_v15 = vsel %vm534_vm2, %v580_v61, %v579_v32  ;;  %v608_v16 = vsel %vm534_vm2, %v528_v36, %v607_v0  ;;  %v639_v17 = vpack.c.b16 %v637_v13, %v637_v13  ;;  %v465_v41 = vmul.f32 %v1370_v22, %v452_v7 }
  0xe2   : > { %v625_v18 = vsel %vm540_vm4, %v624_v59, %v623_v33  ;;  %v556_v19 = vsel %vm537_vm3, %v555_v8, %v554_v2  ;;  %v583_v20 = vsel %vm537_vm3, %v582_v11, %v581_v15  ;;  %v610_v23 = vsel %vm537_vm3, %v609_v12, %v608_v16 }
  0xe3   : > { %v558_v24 = vpack.c.b16 %v556_v19, %v556_v19  ;;  %v585_v26 = vpack.c.b16 %v583_v20, %v583_v20  ;;  %v612_v28 = vpack.c.b16 %v610_v23, %v610_v23  ;;  %1040 = vst.msk [vmem:[%s1426_s28 + $0x1c] sm:$0x3] %vm562_vm7, %v639_v17  ;;  %v1082_v29 = vpack.c.bf16 %v465_v41, %v465_v41 }
  0xe4   : > { %v545_v30 = vrot.slane %v524_v6, 2  ;;  %v574_v31 = vrot.slane %v524_v6, 3  ;;  %v601_v4 = vrot.slane %v524_v6, 4  ;;  %v628_v34 = vrot.slane %v524_v6, 5 }
  0xe5   : > { %563 = vst.msk [vmem:[%s1426_s28 + $0x4] sm:$0x3] %vm562_vm7, %v558_v24  ;;  %1036 = vst.msk [vmem:[%s1426_s28 + $0xc] sm:$0x3] %vm562_vm7, %v585_v26  ;;  %v525_v22 = vunpack.c.l.b16 %v1082_v29  ;;  %v544_v35 = vsel %vm543_vm5, %v542_v40, %v541_v10  ;;  %v573_v36 = vsel %vm543_vm5, %v572_v3, %v571_v21  ;;  %v600_v38 = vsel %vm543_vm5, %v599_v54, %v598_v62 }
  0xe6   : > { %1038 = vst.msk [vmem:[%s1426_s28 + $0x14] sm:$0x3] %vm562_vm7, %v612_v28  ;;  %v627_v39 = vsel %vm543_vm5, %v626_v58, %v625_v18  ;;  %v547_v44 = vsel %vm546_vm6, %v545_v30, %v544_v35  ;;  %v575_v27 = vsel %vm546_vm6, %v574_v31, %v573_v36  ;;  %v602_v40 = vsel %vm546_vm6, %v601_v4, %v600_v38 }
  0xe7   : > { %v548_v9 = vrot.slane %v525_v22, 1  ;;  %v576_v42 = vrot.slane %v525_v22, 2  ;;  %v603_v33 = vrot.slane %v525_v22, 3  ;;  %v630_v43 = vrot.slane %v525_v22, 4 }
  0xe8   : > { %v629_v3 = vsel %vm546_vm6, %v628_v34, %v627_v39 }
  0xe9   : > { %v550_v45 = vsel %vm549_vm8, %v548_v9, %v547_v44  ;;  %v577_v46 = vsel %vm549_vm8, %v576_v42, %v575_v27  ;;  %v604_v47 = vsel %vm549_vm8, %v603_v33, %v602_v40  ;;  %v631_v48 = vsel %vm549_vm8, %v630_v43, %v629_v3 }
  0xea   : > { %v557_v49 = vpack.c.b16 %v550_v45, %v550_v45  ;;  %v584_v50 = vpack.c.b16 %v577_v46, %v577_v46  ;;  %v611_v5 = vpack.c.b16 %v604_v47, %v604_v47  ;;  %v638_v51 = vpack.c.b16 %v631_v48, %v631_v48 }
  0xec   : > { %561 = vst.msk [vmem:[%s1426_s28] sm:$0xf] %vm273_vm0, %v557_v49  ;;  %1035 = vst.msk [vmem:[%s1426_s28 + $0x8] sm:$0xf] %vm273_vm0, %v584_v50 }
  0xed   : > { %1037 = vst.msk [vmem:[%s1426_s28 + $0x10] sm:$0xf] %vm273_vm0, %v611_v5  ;;  %1039 = vst.msk [vmem:[%s1426_s28 + $0x18] sm:$0xf] %vm273_vm0, %v638_v51 }
  0xee PF: > { %s14_s14 = sadd.s32 1, %s1158_s14   ;;  %s1479_s12 = smov %s1154_s13 }
  0xef   : > { %p11_p5 = scmp.ge.s32.totalorder %s14_s14, 4   ;;  %s1480_s13 = smov %s1482_s15 }
  0xf1   :  { %13 = sbr.rel (!%p11_p5) target bundleno = 2 (0x2), region = 77 }

// kernel: wan_attention_block.20
= control target key start
LH: loop header
LB: loop body
LE: loop exit
PB: predicated region body
PF: predicated region fallthrough
CT: control target
= control target key end

     0   :  { %s813_s12 = smov 0   ;;  %s815_s13 = smov 0   ;;  %s895_s0 = inlined_call_operand.vmem [shape: bf16[2,4,8,8], index: 0, kind: input, shape index: {}]   ;;  %s896_s1 = inlined_call_operand.vmem [shape: bf16[2,4,12,8], index: 1, kind: input, shape index: {}]   ;;  %s897_s2 = inlined_call_operand.vmem [shape: bf16[2,4,12,8], index: 2, kind: input, shape index: {}]   ;;  %s898_s3 = inlined_call_operand.vmem [shape: bf16[2,4,8,8], index: 3, kind: output, shape index: {}]  }
   0x1   :  { %s817_s14 = smov 0   ;;  %s819_s15 = smov 0  }
   0x2   :  { %s821_s16 = smov 0  }
   0x3 LB: > { %s35_s17 = sadd.s32 1, %s779_s14  ;;  %s39_s18 = sadd.s32 1, %s783_s15  ;;  %s787_s16 = sphi %s821_s16, %s13_s16   ;;  %s783_s15 = sphi %s819_s15, %s902_s15   ;;  %s779_s14 = sphi %s817_s14, %s901_s14   ;;  %s775_s13 = sphi %s815_s13, %s900_s13   ;;  %s771_s12 = sphi %s813_s12, %s899_s12  }
   0x4   : > { %p37_p0 = scmp.ge.s32.totalorder %s35_s17, 4  ;;  %p662_p1 = scmp.ge.s32.totalorder %s787_s16, 1 }
   0x5   : > { %p223_p2 = scmp.lt.s32.totalorder %s787_s16, 9 }
   0x6   : > { %s904_s17 = smov (%p37_p0, %s35_s17), 0  ;;  %s906_s18 = smov (!%p37_p0, %s39_s18), %s783_s15 }
   0x7   : > { %p224_p3 = pnand %p662_p1, %p223_p2  ;;  %p41_p4 = scmp.ge.s32.totalorder %s906_s18, 2 }
   0x8   : > { %p285_p5 = scmp.lt.s32.totalorder (!%p224_p3), %s775_s13, 1  ;;  %p287_p6 = scmp.lt.s32.totalorder (!%p224_p3), %s771_s12, 3 }
   0x9   : > { %s908_s18 = smov (%p41_p4, %s906_s18), 0  ;;  %227 = sbr.rel (%p224_p3) target bundleno = 799 (0x31f), region = 32 }
   0xe   : > { %vm343_vm0 = vcmask 64512   ;;  %v789_v0 = vmov 0.0   ;;  %vm790_vm1 = vmmov 0   ;;  %s910_s13 = smov (!%p285_p5, %s775_s13), 1  ;;  %s912_s12 = smov (!%p287_p6, %s771_s12), 3  ;;  %vm340_vm2 = vcmask 7168  }
   0xf   : > { %683 = vmatprep.subr.bf16.mxu0 %v789_v0  ;;  %344 = vst.msk [vmem:[#allocation4] sm:$0xff] %vm343_vm0, %v789_v0  ;;  %685 = vmatprep.mubr.msk.bf16.mxu0 %vm790_vm1, %v789_v0  ;;  %s666_s19 = sshll.u32 %s910_s13, 3  ;;  %s663_s20 = sshll.u32 %s910_s13, 2  ;;  %v791_v4 = vmov -inf   ;;  %vm401_vm3 = vcmask 97280   ;;  %v792_v10 = vmov 0  }
  0x10   : > { %689 = vmatprep.subr.bf16.mxu1 %v789_v0  ;;  %691 = vmatprep.mubr.msk.bf16.mxu1 %vm790_vm1, %v789_v0  ;;  %s665_s21 = sshll.u32 %s912_s12, 1  ;;  %s847_s24 = sadd.s32 %s663_s20, %s912_s12  ;;  %341 = vst.msk [vmem:[#allocation2] sm:$0xff] %vm340_vm2, %v791_v4  ;;  %342 = vst.msk [vmem:[#allocation3] sm:$0xff] %vm340_vm2, %v789_v0  ;;  %vm443_vm4 = vcmask 1045504   ;;  %vm503_vm5 = vcmask 60416  }
  0x11   : > { %s844_s22 = sadd.s32 %s666_s19, %s665_s21  ;;  %s664_s28 = sshll.u32 %s847_s24, 2  ;;  %739 = vset.pattern.permute.xlu0 %v792_v10  ;;  %740 = vset.pattern.permute.xlu1 %v792_v10 }
  0x12   : > { %s667_s23 = sshll.u32 %s844_s22, 2  ;;  %s295_s4 = scalar_lea.vmem %s895_s0, %s664_s28 }
  0x13   : > { %s308_s27 = scalar_lea.vmem %s896_s1, %s667_s23  ;;  %v345_v3 = vld [vmem:[%s295_s4] sm:$0xf]  ;;  %s322_s7 = scalar_lea.vmem %s897_s2, %s667_s23 }
  0x14   : > { %v741_v1 = vld [vmem:[%s308_s27] sm:$0x3f]   ;;  %s334_s10 = scalar_lea.vmem %s898_s3, %s664_s28 }
  0x15   : > { %v358_v2 = vsel %vm343_vm0, %v741_v1, 0  ;;  %v742_v15 = vld [vmem:[%s322_s7] sm:$0x3f]  }
  0x16   : > { %684 = vmatpush3.bf16.xpose.msra.mxu0 %v358_v2  ;;  %v445_v16 = vsel %vm443_vm4, %v742_v15, 0  ;;  %v425_v35 = vld [vmem:[#allocation4] sm:$0xff] }
  0x17   : > { %v400_v11 = vld [vmem:[#allocation2] sm:$0xff]  ;;  %690 = vmatpush3.bf16.msra.mxu1 %v445_v16  ;;  %v417_v25 = vld [vmem:[#allocation3] sm:$0xff] }
  0x1d   : > { %686 = vmatmul.mubr.msk.bf16.vlgmr.msra.gmra.mxu0 %vm343_vm0, %v345_v3 }
  0xdd   : > { %v394_v5 = vpop.f32.mrf.mxu0 }
  0xde   : > { %v402_v6 = vsel %vm401_vm3, %v394_v5, -inf }
  0xdf   : > { %403 = vmax.xlane.f32.xlu0 %v402_v6  ;;  %v687_v7 = vpop.f32.mrf.mxu0 }
  0xe1   : > { %v397_v8 = vpop.f32.mrf.mxu0 }
  0xe3   : > { %v688_v9 = vpop.f32.mrf.mxu0 }
 0x168   : > { %v404_v12 = vpop.xlane.xlu0 %403 }
 0x169   : > { %v405_v13 = vmax.f32 %v400_v11, %v404_v12 }
 0x16b   : > { %v406_v14 = vsub.f32 %v400_v11, %v405_v13  ;;  %489 = vst.msk [vmem:[#allocation2] sm:$0xff] %vm340_vm2, %v405_v13  ;;  %411 = vperm.xlu0 %739, %v405_v13  }
 0x16d   : > { %v407_v23 = vmul.f32 1.442695, %v406_v14 }
 0x1e6   : > { %v412_v17 = vpop.permute.xlu0 %411 }
 0x1e7   : > { %v414_v18 = vsub.f32 %v394_v5, %v412_v17 }
 0x1e9   : > { %v415_v19 = vmul.f32 1.442695, %v414_v18 }
 0x1eb   : > { %743 = vpow2.f32 %v415_v19 }
 0x1ec   : > { %745 = vpow2.f32 %v407_v23 }
 0x1f8   : > { %v744_v20 = vpop.eup %743 }
 0x1f9   : > { %v419_v21 = vsel %vm401_vm3, %v744_v20, 0.0  ;;  %v432_v22 = vpack.c.bf16 %v744_v20, %v744_v20  ;;  %v746_v24 = vpop.eup %745 }
 0x1fa   : > { %420 = vadd.xlane.f32.xlu1 %v419_v21  ;;  %v418_v26 = vmul.f32 %v746_v24, %v417_v25 }
 0x1fb   : > { %692 = vmatmul.mubr.msk.bf16.vlgmr.msra.gmra.mxu1 %vm401_vm3, %v432_v22 }
 0x283   : > { %v421_v27 = vpop.xlane.xlu1 %420 }
 0x284   : > { %v422_v28 = vadd.f32 %v421_v27, %v418_v26 }
 0x286   : > { %424 = vst.msk [vmem:[#allocation3] sm:$0xff] %vm340_vm2, %v422_v28 }
 0x28d   : > { %v494_v29 = vld [vmem:[#allocation3] sm:$0xff] }
 0x28e   : > { %497 = vperm.xlu1 %740, %v494_v29  }
 0x292   : > { %428 = vperm.xlu1 %740, %v746_v24  }
 0x2bb   : > { %v481_v30 = vpop.f32.mrf.mxu1 }
 0x2bd   : > { %v693_v31 = vpop.f32.mrf.mxu1 }
 0x2bf   : > { %v484_v32 = vpop.f32.mrf.mxu1 }
 0x2c1   : > { %v694_v33 = vpop.f32.mrf.mxu1 }
 0x309   : > { %v498_v34 = vpop.permute.xlu1 %497 }
 0x30a   : > { %747 = vrcp.f32 %v498_v34 }
 0x30d   : > { %v429_v36 = vpop.permute.xlu1 %428 }
 0x30e   : > { %v431_v37 = vmul.f32 %v429_v36, %v425_v35 }
 0x310   : > { %v487_v38 = vadd.f32 %v481_v30, %v431_v37 }
 0x312   : > { %488 = vst.msk [vmem:[#allocation4] sm:$0xff] %vm343_vm0, %v487_v38 }
 0x317   : > { %v748_v39 = vpop.eup %747 }
 0x319   : > { %v493_v40 = vld [vmem:[#allocation4] sm:$0xff] }
 0x31a   : > { %v501_v41 = vmul.f32 %v748_v39, %v493_v40 }
 0x31c   : > { %v502_v42 = vpack.c.bf16 %v501_v41, %v501_v41 }
 0x31e   : > { %504 = vst.msk [vmem:[%s334_s10] sm:$0xf] %vm503_vm5, %v502_v42 }
 0x31f PF: > { %s13_s16 = sadd.s32 1, %s787_s16   ;;  %s899_s12 = smov %s779_s14 }
 0x320   : > { %p10_p7 = scmp.ge.s32.totalorder %s13_s16, 10   ;;  %s900_s13 = smov %s783_s15 }
 0x321   : > { %s901_s14 = smov %s904_s17  ;;  %s902_s15 = smov %s908_s18 }
 0x322   :  { %12 = sbr.rel (!%p10_p7) target bundleno = 3 (0x3), region = 76 }

// kernel: wan_attention_block.23
= control target key start
LH: loop header
LB: loop body
LE: loop exit
PB: predicated region body
PF: predicated region fallthrough
CT: control target
= control target key end

     0   :  { %10 = vsyncpa [#allocation4], 0  ;;  %s1083_s0 = inlined_call_operand.vmem [shape: bf16[2,8,64], index: 0, kind: input, shape index: {}]   ;;  %s1084_s1 = inlined_call_operand.vmem [shape: bf16[64,32], index: 1, kind: input, shape index: {}]   ;;  %s1085_s2 = inlined_call_operand.vmem [shape: f32[1,32], index: 2, kind: input, shape index: {}]   ;;  %s1086_s3 = inlined_call_operand.hbm [shape: bf16[2,8,32], index: 3, kind: input, shape index: {}, may-alias: {3,5}]   ;;  %s1087_s4 = inlined_call_operand.vmem [shape: f32[2,1,32], index: 4, kind: input, shape index: {}]   ;;  %s1088_s5 = inlined_call_operand.hbm [shape: bf16[2,8,32], index: 5, kind: output, shape index: {}, may-alias: {3,5}]  }
   0x1   :  { %12 = vsyncpa [#allocation4 + $0x1], 0 }
   0x2   :  { %13 = vsyncpa [#allocation5], 0 }
   0x3   :  { %15 = vsyncpa [#allocation5 + $0x1], 0  ;;  %s917_s18 = smov 0   ;;  %s919_s19 = smov 0  }
   0x4   :  { %s921_s20 = smov 0   ;;  %s923_s21 = smov 0  }
   0x5   :  { %s925_s22 = smov 0   ;;  %s927_s23 = smov 0  }
   0x6 LB: > { %s665_s24 = sadd.s32 4294967295, %s881_s23   ;;  %s666_s25 = sadd.s32 4294967294, %s881_s23   ;;  %s881_s23 = sphi %s927_s23, %s21_s23   ;;  %s877_s22 = sphi %s925_s22, %s1100_s22   ;;  %s873_s21 = sphi %s923_s21, %s1099_s21   ;;  %s869_s20 = sphi %s921_s20, %s1098_s20   ;;  %s865_s19 = sphi %s919_s19, %s1097_s19   ;;  %s861_s18 = sphi %s917_s18, %s1096_s18  }
   0x7   : > { %s47_s26 = sadd.s32 1, %s877_s22  ;;  %s142_s27 = sadd.s32 1, %s869_s20 }
   0x8   : > { %p49_p0 = scmp.ge.s32.totalorder %s47_s26, 2  ;;  %p149_p1 = scmp.ne.s32.totalorder %s869_s20, %s865_s19 }
   0x9   : > { %p150_p2 = scmp.eq.s32.totalorder %s881_s23, 0  ;;  %p155_p3 = scmp.ne.s32.totalorder %s865_s19, %s861_s18 }
   0xa   : > { %s1102_s26 = smov (%p49_p0, %s47_s26), 0  ;;  %p156_p5 = scmp.eq.s32.totalorder %s665_s24, 0 }
   0xb   : > { %p958_p4 = por %p150_p2, %p149_p1  ;;  %s135_s29 = ssub.s32 %s877_s22, %s1102_s26 }
   0xc   : > { %p211_p6 = scmp.eq.s32.totalorder %s665_s24, 1  ;;  %p140_p7 = scmp.eq.s32.totalorder %s135_s29, 0 }
   0xd   : > { %p964_p8 = por %p156_p5, %p155_p3  ;;  %p217_p10 = scmp.eq.s32.totalorder %s666_s25, 1 }
   0xe   : > { %p968_p9 = por %p211_p6, %p149_p1  ;;  %p717_p13 = scmp.lt.s32.totalorder %s881_s23, 2 }
   0xf   : > { %s973_s7 = scalar_select %p140_p7, %s869_s20, %s142_s27  }
  0x10   : > { %p975_p11 = por %p217_p10, %p155_p3  ;;  %s268_s9 = sand.u32 1, %s869_s20  }
  0x11   : > { %s671_s10 = sshll.u32 %s268_s9, 2  ;;  %s672_s11 = sshll.u32 %s877_s22, 6 }
  0x12   : > { %s1092_s8 = scalar_select %p975_p11, 1, 0 }
  0x13   : > { %s279_s14 = scalar_lea.hbm %s1086_s3, %s672_s11  ;;  %s272_s15 = scalar_lea.vmem [#allocation3], %s671_s10 }
  0x14   : > { %s281_s16 = sshll.u32 %s272_s15, 4  ;;  %p988_p0 = pnand %p717_p13, %p958_p4  ;;  %s282_s16 = int_to_ptr.vmem [resolvable:$true] %s281_s16 }
  0x15   : > { %p673_p1 = scmp.ge.s32.totalorder %s881_s23, 1  ;;  %p295_p2 = scmp.lt.s32.totalorder %s881_s23, 3 }
  0x16   : > { %s269_s24 = scalar_lea.sflag [#allocation4], %s268_s9  ;;  %p775_p3 = pneg %p988_p0 }
  0x17   : > { %s786_s25 = scalar_lea.vmem %s282_s16, 64  ;;  %s883_s27 = smov [#allocation3]  }
  0x18   : > { %p787_p5 = scmp.ne.s32.totalorder %s282_s16, %s786_s25  ;;  %s791_s29 = sshll.u32 %s883_s27, 4  ;;  %s792_s29 = int_to_ptr.vmem [resolvable:$false] %s791_s29 }
  0x19   : > { %s793_s10 = scalar_lea.vmem %s792_s29, 128  ;;  %p794_p10 = scmp.lt.s32.totalorder %s282_s16, %s792_s29 }
  0x1a   : > { %p789_p6 = pnand %p787_p5, %p775_p3  ;;  %p795_p12 = scmp.lt.s32.totalorder %s793_s10, %s786_s25 }
  0x1c   : > { %p790_p7 = pneg %p789_p6  ;;  %p796_p4 = por %p795_p12, %p794_p10 }
  0x1e   : > { %p797_p13 = pnand %p796_p4, %p790_p7 }
  0x20   : > { %800 = shalt.err (!%p797_p13)
}
  0x21   : > { %712 = dma.hbm_to_vmem [thread:$0]  (!%p988_p0), %s279_s14, 64, %s282_s16, %s269_s24  }
  0x22   : > { %p296_p11 = pnand %p673_p1, %p295_p2 }
  0x23   : > { %s1003_s28 = sand.u32 (!%p296_p11), 1, %s865_s19  }
  0x24   : > { %299 = sbr.rel (%p296_p11) target bundleno = 283 (0x11b), region = 40  ;;  %s674_s9 = sshll.u32 (!%p296_p11), %s1003_s28, 2 }
  0x25   : > { %s302_s11 = scalar_lea.sflag (!%p296_p11), [#allocation4], %s1003_s28  ;;  %s1009_s12 = scalar_lea.vmem (!%p296_p11), [#allocation3], %s674_s9 }
  0x29   : > { %852 = dma.done.wait (%p964_p8), %s302_s11, 64  }
  0x2a   : > { %854 = vsyncadd (%p964_p8), %s302_s11, 4294967232  ;;  %vm392_vm0 = vcmask 261120   ;;  %v884_v0 = vmov 0.0   ;;  %vm885_vm1 = vmmov 0   ;;  %v769_v1 = vld [vmem:[%s1084_s1 + $0x18] sm:$0xff]   ;;  %p359_p11 = scmp.lt.s32.totalorder %s873_s21, 1 }
  0x2b   : > { %693 = vmatprep.subr.bf16.mxu0 %v884_v0  ;;  %701 = vmatprep.mubr.msk.bf16.mxu0 %vm885_vm1, %v884_v0  ;;  %393 = vst.msk [vmem:[#allocation2] sm:$0xff] %vm392_vm0, %v884_v0  ;;  %v770_v2 = vld [vmem:[%s1084_s1 + $0x10] sm:$0xff]   ;;  %v771_v3 = vld [vmem:[%s1084_s1 + $0x8] sm:$0xff]   ;;  %v772_v4 = vld [vmem:[%s1084_s1] sm:$0xff]   ;;  %vm428_vm2 = vcmask 523264   ;;  %s358_s27 = scalar_lea.vmem [#allocation6], %s674_s9 }
  0x2c   : > { %694 = vmatpush3.bf16.msra.mxu0 %v769_v1  ;;  %s360_s30 = scalar_select %p359_p11, %s873_s21, 1  ;;  %v682_v12 = vld [vmem:[%s1085_s2] ss:$0 sm:$0xff]  ;;  %v487_v13 = vld [vmem:[%s1009_s12] sm:$0xf]  ;;  %vm499_vm3 = vcmask 257024  }
  0x2d   : > { %695 = vmatprep.subr.bf16.mxu0 %v884_v0  ;;  %v488_v17 = vunpack.c.l.bf16 %v487_v13  ;;  %s517_s29 = sshll.u32 %s358_s27, 4  ;;  %s502_s12 = scalar_lea.sflag [#allocation5], %s1003_s28  ;;  %s518_s29 = int_to_ptr.vmem [resolvable:$true] %s517_s29 }
  0x2e   : > { %s676_s25 = sshll.u32 %s360_s30, 2  ;;  %s386_s16 = scalar_lea.vmem %s1087_s4, %s360_s30 }
  0x2f   : > { %s368_s13 = scalar_lea.vmem %s1083_s0, %s676_s25  ;;  %v683_v14 = vld [vmem:[%s386_s16] ss:$0 sm:$0xff]  ;;  %s685_s25 = sshll.u32 %s873_s21, 6 }
  0x30   : > { %696 = vmatpush3.bf16.msra.mxu0 %v770_v2  ;;  %v394_v5 = vld [vmem:[%s368_s13] sm:$0xf]  ;;  %s515_s11 = scalar_lea.hbm %s1088_s5, %s685_s25  ;;  %s801_s13 = scalar_lea.vmem %s518_s29, 64 }
  0x31   : > { %697 = vmatprep.subr.bf16.mxu0 %v884_v0  ;;  %p802_p8 = scmp.ne.s32.totalorder %s518_s29, %s801_s13  ;;  %s886_s14 = smov [#allocation6]  }
  0x32   : > { %v395_v6 = vld [vmem:[#allocation2] sm:$0xff]  ;;  %s805_s21 = sshll.u32 %s886_s14, 4  ;;  %s806_s21 = int_to_ptr.vmem [resolvable:$false] %s805_s21 }
  0x33   : > { %p803_p12 = pnand %p802_p8, %p968_p9  ;;  %s807_s9 = scalar_lea.vmem %s806_s21, 128 }
  0x34   : > { %698 = vmatpush3.bf16.msra.mxu0 %v771_v3  ;;  %p808_p1 = scmp.lt.s32.totalorder %s518_s29, %s806_s21  ;;  %p809_p2 = scmp.lt.s32.totalorder %s807_s9, %s801_s13 }
  0x35   : > { %699 = vmatprep.subr.bf16.mxu0 %v884_v0  ;;  %p804_p0 = pneg %p803_p12 }
  0x36   : > { %p810_p3 = por %p809_p2, %p808_p1 }
  0x38   : > { %700 = vmatpush3.bf16.msra.mxu0 %v772_v4  ;;  %p811_p5 = pnand %p810_p3, %p804_p0 }
  0x3b   : > { %702 = vmatmul.mubr.msk.bf16.vlgmr.msra.gmra.mxu0 %vm428_vm2, %v394_v5 }
  0xfb   : > { %v466_v7 = vpop.f32.mrf.mxu0 }
  0xfc   : > { %v472_v8 = vadd.f32 %v466_v7, %v395_v6 }
  0xfd   : > { %v703_v9 = vpop.f32.mrf.mxu0 }
  0xfe   : > { %474 = vst.msk [vmem:[#allocation2] sm:$0xff] %vm392_vm0, %v472_v8 }
  0xff   : > { %v469_v10 = vpop.f32.mrf.mxu0 }
 0x101   : > { %v704_v11 = vpop.f32.mrf.mxu0 }
 0x105   : > { %v478_v15 = vld [vmem:[#allocation2] sm:$0xff] }
 0x106   : > { %v486_v16 = vadd.f32 %v682_v12, %v478_v15 }
 0x108   : > { %v496_v18 = vmul.f32 %v683_v14, %v486_v16 }
 0x10a   : > { %v497_v19 = vadd.f32 %v496_v18, %v488_v17 }
 0x10c   : > { %v498_v20 = vpack.c.bf16 %v497_v19, %v497_v19 }
 0x10e   : > { %500 = vst.msk [vmem:[%s358_s27] sm:$0xf] %vm499_vm3, %v498_v20 }
 0x10f   : > { %814 = shalt.err (!%p811_p5)
}
 0x110   : > { %s815_s15 = scalar_lea.hbm %s515_s11, 64  ;;  %s819_s17 = scalar_lea.hbm %s1088_s5, 128 }
 0x111   : > { %p816_p6 = scmp.ne.s32.totalorder %s515_s11, %s815_s15  ;;  %p820_p4 = scmp.lt.s32.totalorder %s515_s11, %s1088_s5 }
 0x112   : > { %p821_p13 = scmp.lt.s32.totalorder %s819_s17, %s815_s15 }
 0x113   : > { %p817_p7 = pnand %p816_p6, %p968_p9 }
 0x114   : > { %p822_p11 = por %p821_p13, %p820_p4 }
 0x115   : > { %p818_p10 = pneg %p817_p7 }
 0x117   : > { %p823_p8 = pnand %p822_p11, %p818_p10 }
 0x119   : > { %826 = shalt.err (!%p823_p8)
}
 0x11a   : > { %707 = dma.vmem_to_hbm [thread:$0]  (%p968_p9), %s518_s29, 64, %s515_s11, %s502_s12  }
 0x11b PF: > { %s529_s27 = sand.u32 1, %s861_s18   ;;  %p1094_p12 = scmp.ne.s32.totalorder %s1092_s8, 0 }
 0x11c   : > { %p1095_p0 = scmp.ge.s32.totalorder %s881_s23, 2  ;;  %s530_s30 = scalar_lea.sflag [#allocation5], %s529_s27 }
 0x11e   : > { %p714_p1 = pnand %p1095_p0, %p1094_p12 }
 0x120   : > { %p715_p2 = pneg %p714_p1 }
 0x122   : > { %856 = dma.done.wait (%p715_p2), %s530_s30, 64  }
 0x123   : > { %858 = vsyncadd (%p715_p2), %s530_s30, 4294967232  ;;  %s21_s23 = sadd.s32 1, %s881_s23   ;;  %s1096_s18 = smov %s865_s19 }
 0x124   : > { %p18_p3 = scmp.ge.s32.totalorder %s21_s23, 4   ;;  %s1097_s19 = smov %s869_s20 }
 0x125   : > { %s1098_s20 = smov %s973_s7  ;;  %s1099_s21 = smov %s877_s22 }
 0x126   : > { %s1100_s22 = smov %s1102_s26  ;;  %20 = sbr.rel (!%p18_p3) target bundleno = 6 (0x6), region = 105 }
 0x12b   :  { %535 = vsyncpa [#allocation4], 1 }
 0x12c   :  { %537 = vsyncpa [#allocation4 + $0x1], 1 }
 0x12d   :  { %538 = vsyncpa [#allocation5], 1 }
 0x12e   :  { %540 = vsyncpa [#allocation5 + $0x1], 1 }

</bundles_post_ra>
